<compile_context>
chip_gen: v6e
topology: v6e:2x2x1
jax: 0.10.0
libtpu: 0.0.40
codegen_flags: <defaults>
</compile_context>

<pallas_src>
import numpy as np
import jax
import jax.numpy as jnp
from jax import lax
from jax.experimental import pallas as pl
from jax.experimental.pallas import tpu as pltpu


def resblock_kernel(xp_ref, w1_ref, b1_ref, w2_ref, b2_ref, out_ref, mid_ref):
    # xp_ref : (B, H+2, W+2, C)  bf16  zero-padded input (center tap = residual)
    # w1_ref : (9, C, F)         bf16  conv1 taps (k = dy*3+dx), BN1 scale folded in
    # b1_ref : (1, F)            f32   BN1 shift
    # w2_ref : (9, F, F)         bf16  conv2 taps, BN2 scale folded in
    # b2_ref : (1, F)            f32   BN2 shift
    # out_ref: (B, H, W, F)      f32
    # mid_ref: (B, H+2, W+2, F)  f32   VMEM scratch for padded intermediate
    #          (kept f32 so the (1,1)-offset interior store is a plain
    #           sublane-aligned store; conv2 still feeds the MXU in bf16)
    B, H, W, F = out_ref.shape
    C = xp_ref.shape[3]
    M = B * H * W

    # ---- conv1 (BN1 scale pre-folded into the weights) ----------------------
    # Upcast the padded slab once so the three width-shifted column slabs are
    # plain f32 relayouts (no packed-sublane shifted copies), then drop each
    # slab back to bf16 for the MXU.  The dy taps are free major-dim slices.
    xslab = xp_ref[...].astype(jnp.float32)                    # (B, H+2, W+2, C)
    acc1 = jnp.zeros((M, F), jnp.float32)
    x_center = None
    for dx in range(3):                                        # static unroll (3)
        col = xslab[:, :, dx:dx + W, :].astype(jnp.bfloat16)   # (B, H+2, W, C)
        for dy in range(3):                                    # static unroll (3)
            tap = col[:, dy:dy + H, :, :].reshape(M, C)        # (M, C) bf16
            if dy == 1 and dx == 1:
                x_center = tap                                 # == x, reused as residual
            acc1 = acc1 + jnp.dot(tap, w1_ref[dy * 3 + dx],
                                  preferred_element_type=jnp.float32)
    h1 = jnp.maximum(acc1 + b1_ref[...], 0.0)                  # BN1 shift + ReLU (f32)

    # ---- re-pad the intermediate activation inside VMEM scratch -------------
    # Zero only the 1-px border ring each step; the interior is fully
    # overwritten every step.  (Not gated on program_id==0: the "parallel"
    # batch axis may be split across TensorCores, each with its own scratch.)
    zrow = jnp.zeros((B, 1, W + 2, F), mid_ref.dtype)
    zcol = jnp.zeros((B, H, 1, F), mid_ref.dtype)
    mid_ref[:, 0:1, :, :] = zrow
    mid_ref[:, H + 1:H + 2, :, :] = zrow
    mid_ref[:, 1:1 + H, 0:1, :] = zcol
    mid_ref[:, 1:1 + H, W + 1:W + 2, :] = zcol
    mid_ref[:, 1:1 + H, 1:1 + W, :] = h1.reshape(B, H, W, F)

    # ---- conv2 (BN2 scale pre-folded) + shift + residual + ReLU -------------
    acc2 = jnp.zeros((M, F), jnp.float32)
    for dx in range(3):
        col = mid_ref[:, :, dx:dx + W, :].astype(jnp.bfloat16)  # (B, H+2, W, F)
        for dy in range(3):
            tap = col[:, dy:dy + H, :, :].reshape(M, F)
            acc2 = acc2 + jnp.dot(tap, w2_ref[dy * 3 + dx],
                                  preferred_element_type=jnp.float32)

    out = jnp.maximum(acc2 + b2_ref[...] + x_center.astype(jnp.float32), 0.0)
    out_ref[...] = out.reshape(B, H, W, F).astype(out_ref.dtype)


def fold_bn(gamma, beta, mean, var, eps=1e-5):
    scale = gamma / jnp.sqrt(var + eps)
    shift = beta - mean * scale
    return scale, shift


def res_block_net(x_nchw, params, *, batch_tile=None):
    """Pallas ResBlockNet forward. x_nchw: (N, C, H, W) f32 -> (N, C, H, W) f32."""
    w1, g1, b1, m1, v1, w2, g2, b2, m2, v2 = params
    N, C, H, W = x_nchw.shape
    F = w1.shape[0]
    assert F == C, "residual add requires ind == block_filters"

    # ---- batch tiling: largest divisor of N (<=8) that leaves >= 2 grid steps
    if batch_tile is None:
        cands = [d for d in range(1, min(N, 8) + 1) if N % d == 0]
        two_step = [d for d in cands if N // d >= 2]
        batch_tile = max(two_step) if two_step else max(cands)
    assert N % batch_tile == 0
    bt = batch_tile
    grid = (N // bt,)

    # ---- NCHW -> NHWC, bf16 MXU inputs, spatial zero-pad by 1
    x = jnp.transpose(x_nchw, (0, 2, 3, 1)).astype(jnp.bfloat16)
    x_pad = jnp.pad(x, ((0, 0), (1, 1), (1, 1), (0, 0)))

    # ---- fold eval-mode BN into scale/shift; fold the scale into the weights
    s1, sh1 = fold_bn(g1, b1, m1, v1)
    s2, sh2 = fold_bn(g2, b2, m2, v2)
    # PyTorch OIHW (F, Cin, 3, 3) * scale(F) -> (9, Cin, F), k = ky*3+kx
    w1_t = jnp.transpose(w1 * s1[:, None, None, None],
                         (2, 3, 1, 0)).reshape(9, C, F).astype(jnp.bfloat16)
    w2_t = jnp.transpose(w2 * s2[:, None, None, None],
                         (2, 3, 1, 0)).reshape(9, F, F).astype(jnp.bfloat16)
    sh1 = sh1.reshape(1, F).astype(jnp.float32)
    sh2 = sh2.reshape(1, F).astype(jnp.float32)

    # ---- advisory cost estimate (helps XLA schedule surrounding transposes)
    flops = 2 * 9 * N * H * W * (C * F + F * F)
    bytes_accessed = int(x_pad.size * 2 + N * H * W * F * 4
                         + (w1_t.size + w2_t.size) * 2 + 2 * F * 4)
    cost = pl.CostEstimate(flops=flops, transcendentals=0,
                           bytes_accessed=bytes_accessed)

    # ---- explicit VMEM budget with headroom (v7x: 64 MiB physical / 32 MiB
    #      scoped default; v5e/v6e: 128 MiB physical).  Double-buffered blocks.
    def nbytes(shape, dt):
        return int(np.prod(shape)) * jnp.dtype(dt).itemsize
    need = (2 * (nbytes((bt, H + 2, W + 2, C), jnp.bfloat16)
                 + nbytes((bt, H, W, F), jnp.float32))
            + nbytes((bt, H + 2, W + 2, F), jnp.float32)
            + int(w1_t.size + w2_t.size) * 2 + 2 * F * 4)
    vmem_limit = int(min(max(4 * need, 32 * 1024 * 1024), 56 * 1024 * 1024))

    out_nhwc = pl.pallas_call(
        resblock_kernel,
        out_shape=jax.ShapeDtypeStruct((N, H, W, F), jnp.float32),
        grid_spec=pltpu.PrefetchScalarGridSpec(
            num_scalar_prefetch=0,
            grid=grid,
            in_specs=[
                pl.BlockSpec((bt, H + 2, W + 2, C), lambda n: (n, 0, 0, 0)),
                pl.BlockSpec((9, C, F), lambda n: (0, 0, 0)),
                pl.BlockSpec((1, F), lambda n: (0, 0)),
                pl.BlockSpec((9, F, F), lambda n: (0, 0, 0)),
                pl.BlockSpec((1, F), lambda n: (0, 0)),
            ],
            out_specs=pl.BlockSpec((bt, H, W, F), lambda n: (n, 0, 0, 0)),
            scratch_shapes=[pltpu.VMEM((bt, H + 2, W + 2, F), jnp.float32)],
        ),
        compiler_params=pltpu.CompilerParams(
            dimension_semantics=("parallel",),
            vmem_limit_bytes=vmem_limit),
        cost_estimate=cost,
    )(x_pad, w1_t, sh1, w2_t, sh2)

    return jnp.transpose(out_nhwc, (0, 3, 1, 2))  # back to NCHW


# ----------------------- pure-f32 reference (PyTorch semantics) --------------
def reference_f32(x, params, eps=1e-5):
    w1, g1, b1, m1, v1, w2, g2, b2, m2, v2 = params
    dn = ('NCHW', 'OIHW', 'NCHW')

    def conv(a, w):
        return lax.conv_general_dilated(a, w, (1, 1), ((1, 1), (1, 1)),
                                        dimension_numbers=dn)

    def bn(a, g, b, m, v):
        c = a.shape[1]
        return ((a - m.reshape(1, c, 1, 1)) / jnp.sqrt(v.reshape(1, c, 1, 1) + eps)
                * g.reshape(1, c, 1, 1) + b.reshape(1, c, 1, 1))

    h = jax.nn.relu(bn(conv(x, w1), g1, b1, m1, v1))
    return jax.nn.relu(bn(conv(h, w2), g2, b2, m2, v2) + x)


# --------------- reference matching the kernel's precision policy ------------
def reference_matched(x, params, eps=1e-5):
    """Same math as the kernel: bf16-quantized inputs/weights (conv accumulated
    in f32), BN scale folded into weights, bf16-quantized intermediate and
    residual."""
    w1, g1, b1, m1, v1, w2, g2, b2, m2, v2 = params
    s1, sh1 = fold_bn(g1, b1, m1, v1, eps)
    s2, sh2 = fold_bn(g2, b2, m2, v2, eps)
    dn = ('NHWC', 'HWIO', 'NHWC')

    def q(a):  # bf16 quantize, keep f32 for the conv math
        return a.astype(jnp.bfloat16).astype(jnp.float32)

    xb = q(jnp.transpose(x, (0, 2, 3, 1)))
    w1b = q(jnp.transpose(w1 * s1[:, None, None, None], (2, 3, 1, 0)))
    w2b = q(jnp.transpose(w2 * s2[:, None, None, None], (2, 3, 1, 0)))

    def conv(a, w):
        return lax.conv_general_dilated(a, w, (1, 1), ((1, 1), (1, 1)),
                                        dimension_numbers=dn)

    h = q(jnp.maximum(conv(xb, w1b) + sh1.reshape(1, 1, 1, -1), 0.0))
    out = jnp.maximum(conv(h, w2b) + sh2.reshape(1, 1, 1, -1) + xb, 0.0)
    return jnp.transpose(out, (0, 3, 1, 2))


if __name__ == "__main__":
    # small shapes consistent with the module (ind == block_filters)
    N, C, H, W = 2, 8, 16, 16
    F = C

    key = jax.random.PRNGKey(0)
    ks = jax.random.split(key, 11)
    x = jax.random.normal(ks[0], (N, C, H, W), jnp.float32)

    # deterministic synthetic parameters (inference-mode BatchNorm stats)
    # TODO(synk): training-mode BatchNorm (batch statistics / running-stat
    # updates) not implemented; BN is folded into scale/shift as in eval().
    w1 = 0.1 * jax.random.normal(ks[1], (F, C, 3, 3), jnp.float32)
    g1 = 1.0 + 0.1 * jax.random.normal(ks[2], (F,), jnp.float32)
    b1 = 0.1 * jax.random.normal(ks[3], (F,), jnp.float32)
    m1 = 0.1 * jax.random.normal(ks[4], (F,), jnp.float32)
    v1 = jax.random.uniform(ks[5], (F,), jnp.float32, 0.5, 1.5)
    w2 = 0.1 * jax.random.normal(ks[6], (F, F, 3, 3), jnp.float32)
    g2 = 1.0 + 0.1 * jax.random.normal(ks[7], (F,), jnp.float32)
    b2 = 0.1 * jax.random.normal(ks[8], (F,), jnp.float32)
    m2 = 0.1 * jax.random.normal(ks[9], (F,), jnp.float32)
    v2 = jax.random.uniform(ks[10], (F,), jnp.float32, 0.5, 1.5)
    params = (w1, g1, b1, m1, v1, w2, g2, b2, m2, v2)

    out = jax.block_until_ready(res_block_net(x, params))
    assert out.shape == (N, C, H, W)

    # tight check against a reference computing the same bf16-input /
    # f32-accumulate math as the kernel
    ref_m = jax.block_until_ready(reference_matched(x, params))
    assert np.allclose(np.asarray(out), np.asarray(ref_m), atol=2e-3, rtol=2e-3), \
        "Pallas output mismatch vs precision-matched reference"

    # loose sanity check against the pure-f32 PyTorch semantics (tolerance
    # reflects bf16 MXU inputs with f32 accumulation)
    ref_f = jax.block_until_ready(reference_f32(x, params))
    assert np.allclose(np.asarray(out), np.asarray(ref_f), atol=1e-1, rtol=1e-1), \
        "Pallas output diverged from f32 reference beyond bf16 tolerance"

    print("KERNEL_OK")
</pallas_src>

<mosaic_0001>
module attributes {stable_mosaic.version = 11 : i64} {
  func.func @resblock_kernel(%arg0: i32, %arg1: memref<1x18x18x8xbf16, #tpu.memory_space<vmem>>, %arg2: memref<9x8x8xbf16, #tpu.memory_space<vmem>>, %arg3: memref<1x8xf32, #tpu.memory_space<vmem>>, %arg4: memref<9x8x8xbf16, #tpu.memory_space<vmem>>, %arg5: memref<1x8xf32, #tpu.memory_space<vmem>>, %arg6: memref<1x16x16x8xf32, #tpu.memory_space<vmem>>, %arg7: memref<1x18x18x8xf32, #tpu.memory_space<vmem>>) attributes {dimension_semantics = [#tpu.dimension_semantics<parallel>], iteration_bounds = array<i64: 2>, scalar_prefetch = 0 : i64, scratch_operands = 1 : i64, tpu.core_type = #tpu.core_type<tc>, window_params = [{transform_indices = @transform_0, window_bounds = array<i64: 1, 18, 18, 8>}, {pipeline_mode = #tpu.pipeline_mode<synchronous>, transform_indices = @transform_1, window_bounds = array<i64: 9, 8, 8>}, {pipeline_mode = #tpu.pipeline_mode<synchronous>, transform_indices = @transform_2, window_bounds = array<i64: 1, 8>}, {pipeline_mode = #tpu.pipeline_mode<synchronous>, transform_indices = @transform_3, window_bounds = array<i64: 9, 8, 8>}, {pipeline_mode = #tpu.pipeline_mode<synchronous>, transform_indices = @transform_4, window_bounds = array<i64: 1, 8>}, {transform_indices = @transform_5, window_bounds = array<i64: 1, 16, 16, 8>}]} {
    %c0 = arith.constant 0 : index
    %c0_0 = arith.constant 0 : index
    %c0_1 = arith.constant 0 : index
    %c0_2 = arith.constant 0 : index
    %0 = vector.load %arg1[%c0, %c0_0, %c0_1, %c0_2] : memref<1x18x18x8xbf16, #tpu.memory_space<vmem>>, vector<1x18x18x8xbf16>
    %1 = arith.extf %0 : vector<1x18x18x8xbf16> to vector<1x18x18x8xf32>
    %cst = arith.constant 0.000000e+00 : f32
    %2 = vector.broadcast %cst : f32 to vector<256x8xf32>
    %3 = vector.extract_strided_slice %1 {offsets = [0, 0, 0, 0], sizes = [1, 18, 16, 8], strides = [1, 1, 1, 1]} : vector<1x18x18x8xf32> to vector<1x18x16x8xf32>
    %4 = arith.truncf %3 : vector<1x18x16x8xf32> to vector<1x18x16x8xbf16>
    %5 = vector.extract_strided_slice %4 {offsets = [0, 0, 0, 0], sizes = [1, 16, 16, 8], strides = [1, 1, 1, 1]} : vector<1x18x16x8xbf16> to vector<1x16x16x8xbf16>
    %6 = vector.shape_cast %5 : vector<1x16x16x8xbf16> to vector<256x8xbf16>
    %c0_3 = arith.constant 0 : index
    %c0_4 = arith.constant 0 : index
    %c0_5 = arith.constant 0 : index
    %7 = vector.load %arg2[%c0_3, %c0_4, %c0_5] : memref<9x8x8xbf16, #tpu.memory_space<vmem>>, vector<1x8x8xbf16>
    %8 = vector.shape_cast %7 : vector<1x8x8xbf16> to vector<8x8xbf16>
    %cst_6 = arith.constant dense<0.000000e+00> : vector<256x8xf32>
    %9 = tpu.matmul %6, %8, %cst_6 {dimension_numbers = #tpu.dot_dimension_numbers<[1], [0], [0], [1], [0, 0, 1, 1], [], []>} : vector<256x8xbf16>, vector<8x8xbf16>, vector<256x8xf32> -> vector<256x8xf32>
    %10 = arith.addf %2, %9 : vector<256x8xf32>
    %11 = vector.extract_strided_slice %4 {offsets = [0, 1, 0, 0], sizes = [1, 16, 16, 8], strides = [1, 1, 1, 1]} : vector<1x18x16x8xbf16> to vector<1x16x16x8xbf16>
    %12 = vector.shape_cast %11 : vector<1x16x16x8xbf16> to vector<256x8xbf16>
    %c3 = arith.constant 3 : index
    %c0_7 = arith.constant 0 : index
    %c0_8 = arith.constant 0 : index
    %13 = vector.load %arg2[%c3, %c0_7, %c0_8] : memref<9x8x8xbf16, #tpu.memory_space<vmem>>, vector<1x8x8xbf16>
    %14 = vector.shape_cast %13 : vector<1x8x8xbf16> to vector<8x8xbf16>
    %cst_9 = arith.constant dense<0.000000e+00> : vector<256x8xf32>
    %15 = tpu.matmul %12, %14, %cst_9 {dimension_numbers = #tpu.dot_dimension_numbers<[1], [0], [0], [1], [0, 0, 1, 1], [], []>} : vector<256x8xbf16>, vector<8x8xbf16>, vector<256x8xf32> -> vector<256x8xf32>
    %16 = arith.addf %10, %15 : vector<256x8xf32>
    %17 = vector.extract_strided_slice %4 {offsets = [0, 2, 0, 0], sizes = [1, 16, 16, 8], strides = [1, 1, 1, 1]} : vector<1x18x16x8xbf16> to vector<1x16x16x8xbf16>
    %18 = vector.shape_cast %17 : vector<1x16x16x8xbf16> to vector<256x8xbf16>
    %c6 = arith.constant 6 : index
    %c0_10 = arith.constant 0 : index
    %c0_11 = arith.constant 0 : index
    %19 = vector.load %arg2[%c6, %c0_10, %c0_11] : memref<9x8x8xbf16, #tpu.memory_space<vmem>>, vector<1x8x8xbf16>
    %20 = vector.shape_cast %19 : vector<1x8x8xbf16> to vector<8x8xbf16>
    %cst_12 = arith.constant dense<0.000000e+00> : vector<256x8xf32>
    %21 = tpu.matmul %18, %20, %cst_12 {dimension_numbers = #tpu.dot_dimension_numbers<[1], [0], [0], [1], [0, 0, 1, 1], [], []>} : vector<256x8xbf16>, vector<8x8xbf16>, vector<256x8xf32> -> vector<256x8xf32>
    %22 = arith.addf %16, %21 : vector<256x8xf32>
    %23 = vector.extract_strided_slice %1 {offsets = [0, 0, 1, 0], sizes = [1, 18, 16, 8], strides = [1, 1, 1, 1]} : vector<1x18x18x8xf32> to vector<1x18x16x8xf32>
    %24 = arith.truncf %23 : vector<1x18x16x8xf32> to vector<1x18x16x8xbf16>
    %25 = vector.extract_strided_slice %24 {offsets = [0, 0, 0, 0], sizes = [1, 16, 16, 8], strides = [1, 1, 1, 1]} : vector<1x18x16x8xbf16> to vector<1x16x16x8xbf16>
    %26 = vector.shape_cast %25 : vector<1x16x16x8xbf16> to vector<256x8xbf16>
    %c1 = arith.constant 1 : index
    %c0_13 = arith.constant 0 : index
    %c0_14 = arith.constant 0 : index
    %27 = vector.load %arg2[%c1, %c0_13, %c0_14] : memref<9x8x8xbf16, #tpu.memory_space<vmem>>, vector<1x8x8xbf16>
    %28 = vector.shape_cast %27 : vector<1x8x8xbf16> to vector<8x8xbf16>
    %cst_15 = arith.constant dense<0.000000e+00> : vector<256x8xf32>
    %29 = tpu.matmul %26, %28, %cst_15 {dimension_numbers = #tpu.dot_dimension_numbers<[1], [0], [0], [1], [0, 0, 1, 1], [], []>} : vector<256x8xbf16>, vector<8x8xbf16>, vector<256x8xf32> -> vector<256x8xf32>
    %30 = arith.addf %22, %29 : vector<256x8xf32>
    %31 = vector.extract_strided_slice %24 {offsets = [0, 1, 0, 0], sizes = [1, 16, 16, 8], strides = [1, 1, 1, 1]} : vector<1x18x16x8xbf16> to vector<1x16x16x8xbf16>
    %32 = vector.shape_cast %31 : vector<1x16x16x8xbf16> to vector<256x8xbf16>
    %c4 = arith.constant 4 : index
    %c0_16 = arith.constant 0 : index
    %c0_17 = arith.constant 0 : index
    %33 = vector.load %arg2[%c4, %c0_16, %c0_17] : memref<9x8x8xbf16, #tpu.memory_space<vmem>>, vector<1x8x8xbf16>
    %34 = vector.shape_cast %33 : vector<1x8x8xbf16> to vector<8x8xbf16>
    %cst_18 = arith.constant dense<0.000000e+00> : vector<256x8xf32>
    %35 = tpu.matmul %32, %34, %cst_18 {dimension_numbers = #tpu.dot_dimension_numbers<[1], [0], [0], [1], [0, 0, 1, 1], [], []>} : vector<256x8xbf16>, vector<8x8xbf16>, vector<256x8xf32> -> vector<256x8xf32>
    %36 = arith.addf %30, %35 : vector<256x8xf32>
    %37 = vector.extract_strided_slice %24 {offsets = [0, 2, 0, 0], sizes = [1, 16, 16, 8], strides = [1, 1, 1, 1]} : vector<1x18x16x8xbf16> to vector<1x16x16x8xbf16>
    %38 = vector.shape_cast %37 : vector<1x16x16x8xbf16> to vector<256x8xbf16>
    %c7 = arith.constant 7 : index
    %c0_19 = arith.constant 0 : index
    %c0_20 = arith.constant 0 : index
    %39 = vector.load %arg2[%c7, %c0_19, %c0_20] : memref<9x8x8xbf16, #tpu.memory_space<vmem>>, vector<1x8x8xbf16>
    %40 = vector.shape_cast %39 : vector<1x8x8xbf16> to vector<8x8xbf16>
    %cst_21 = arith.constant dense<0.000000e+00> : vector<256x8xf32>
    %41 = tpu.matmul %38, %40, %cst_21 {dimension_numbers = #tpu.dot_dimension_numbers<[1], [0], [0], [1], [0, 0, 1, 1], [], []>} : vector<256x8xbf16>, vector<8x8xbf16>, vector<256x8xf32> -> vector<256x8xf32>
    %42 = arith.addf %36, %41 : vector<256x8xf32>
    %43 = vector.extract_strided_slice %1 {offsets = [0, 0, 2, 0], sizes = [1, 18, 16, 8], strides = [1, 1, 1, 1]} : vector<1x18x18x8xf32> to vector<1x18x16x8xf32>
    %44 = arith.truncf %43 : vector<1x18x16x8xf32> to vector<1x18x16x8xbf16>
    %45 = vector.extract_strided_slice %44 {offsets = [0, 0, 0, 0], sizes = [1, 16, 16, 8], strides = [1, 1, 1, 1]} : vector<1x18x16x8xbf16> to vector<1x16x16x8xbf16>
    %46 = vector.shape_cast %45 : vector<1x16x16x8xbf16> to vector<256x8xbf16>
    %c2 = arith.constant 2 : index
    %c0_22 = arith.constant 0 : index
    %c0_23 = arith.constant 0 : index
    %47 = vector.load %arg2[%c2, %c0_22, %c0_23] : memref<9x8x8xbf16, #tpu.memory_space<vmem>>, vector<1x8x8xbf16>
    %48 = vector.shape_cast %47 : vector<1x8x8xbf16> to vector<8x8xbf16>
    %cst_24 = arith.constant dense<0.000000e+00> : vector<256x8xf32>
    %49 = tpu.matmul %46, %48, %cst_24 {dimension_numbers = #tpu.dot_dimension_numbers<[1], [0], [0], [1], [0, 0, 1, 1], [], []>} : vector<256x8xbf16>, vector<8x8xbf16>, vector<256x8xf32> -> vector<256x8xf32>
    %50 = arith.addf %42, %49 : vector<256x8xf32>
    %51 = vector.extract_strided_slice %44 {offsets = [0, 1, 0, 0], sizes = [1, 16, 16, 8], strides = [1, 1, 1, 1]} : vector<1x18x16x8xbf16> to vector<1x16x16x8xbf16>
    %52 = vector.shape_cast %51 : vector<1x16x16x8xbf16> to vector<256x8xbf16>
    %c5 = arith.constant 5 : index
    %c0_25 = arith.constant 0 : index
    %c0_26 = arith.constant 0 : index
    %53 = vector.load %arg2[%c5, %c0_25, %c0_26] : memref<9x8x8xbf16, #tpu.memory_space<vmem>>, vector<1x8x8xbf16>
    %54 = vector.shape_cast %53 : vector<1x8x8xbf16> to vector<8x8xbf16>
    %cst_27 = arith.constant dense<0.000000e+00> : vector<256x8xf32>
    %55 = tpu.matmul %52, %54, %cst_27 {dimension_numbers = #tpu.dot_dimension_numbers<[1], [0], [0], [1], [0, 0, 1, 1], [], []>} : vector<256x8xbf16>, vector<8x8xbf16>, vector<256x8xf32> -> vector<256x8xf32>
    %56 = arith.addf %50, %55 : vector<256x8xf32>
    %57 = vector.extract_strided_slice %44 {offsets = [0, 2, 0, 0], sizes = [1, 16, 16, 8], strides = [1, 1, 1, 1]} : vector<1x18x16x8xbf16> to vector<1x16x16x8xbf16>
    %58 = vector.shape_cast %57 : vector<1x16x16x8xbf16> to vector<256x8xbf16>
    %c8 = arith.constant 8 : index
    %c0_28 = arith.constant 0 : index
    %c0_29 = arith.constant 0 : index
    %59 = vector.load %arg2[%c8, %c0_28, %c0_29] : memref<9x8x8xbf16, #tpu.memory_space<vmem>>, vector<1x8x8xbf16>
    %60 = vector.shape_cast %59 : vector<1x8x8xbf16> to vector<8x8xbf16>
    %cst_30 = arith.constant dense<0.000000e+00> : vector<256x8xf32>
    %61 = tpu.matmul %58, %60, %cst_30 {dimension_numbers = #tpu.dot_dimension_numbers<[1], [0], [0], [1], [0, 0, 1, 1], [], []>} : vector<256x8xbf16>, vector<8x8xbf16>, vector<256x8xf32> -> vector<256x8xf32>
    %62 = arith.addf %56, %61 : vector<256x8xf32>
    %c0_31 = arith.constant 0 : index
    %c0_32 = arith.constant 0 : index
    %63 = vector.load %arg3[%c0_31, %c0_32] : memref<1x8xf32, #tpu.memory_space<vmem>>, vector<1x8xf32>
    %64 = vector.broadcast %63 : vector<1x8xf32> to vector<256x8xf32>
    %65 = arith.addf %62, %64 : vector<256x8xf32>
    %cst_33 = arith.constant 0.000000e+00 : f32
    %66 = vector.broadcast %cst_33 : f32 to vector<256x8xf32>
    %67 = arith.maximumf %65, %66 : vector<256x8xf32>
    %cst_34 = arith.constant 0.000000e+00 : f32
    %68 = vector.broadcast %cst_34 : f32 to vector<1x1x18x8xf32>
    %cst_35 = arith.constant 0.000000e+00 : f32
    %69 = vector.broadcast %cst_35 : f32 to vector<1x16x1x8xf32>
    %c0_36 = arith.constant 0 : index
    %c0_37 = arith.constant 0 : index
    %c0_38 = arith.constant 0 : index
    %c0_39 = arith.constant 0 : index
    %70 = vector.load %arg7[%c0_36, %c0_37, %c0_38, %c0_39] : memref<1x18x18x8xf32, #tpu.memory_space<vmem>>, vector<1x1x18x8xf32>
    tpu.vector_store %arg7[%c0_36, %c0_37, %c0_38, %c0_39], %68 {strides = array<i32>} : memref<1x18x18x8xf32, #tpu.memory_space<vmem>>, vector<1x1x18x8xf32>,
    %c0_40 = arith.constant 0 : index
    %c17 = arith.constant 17 : index
    %c0_41 = arith.constant 0 : index
    %c0_42 = arith.constant 0 : index
    %71 = vector.load %arg7[%c0_40, %c17, %c0_41, %c0_42] : memref<1x18x18x8xf32, #tpu.memory_space<vmem>>, vector<1x1x18x8xf32>
    tpu.vector_store %arg7[%c0_40, %c17, %c0_41, %c0_42], %68 {strides = array<i32>} : memref<1x18x18x8xf32, #tpu.memory_space<vmem>>, vector<1x1x18x8xf32>,
    %c0_43 = arith.constant 0 : index
    %c1_44 = arith.constant 1 : index
    %c0_45 = arith.constant 0 : index
    %c0_46 = arith.constant 0 : index
    %72 = vector.load %arg7[%c0_43, %c1_44, %c0_45, %c0_46] : memref<1x18x18x8xf32, #tpu.memory_space<vmem>>, vector<1x16x1x8xf32>
    tpu.vector_store %arg7[%c0_43, %c1_44, %c0_45, %c0_46], %69 {strides = array<i32>} : memref<1x18x18x8xf32, #tpu.memory_space<vmem>>, vector<1x16x1x8xf32>,
    %c0_47 = arith.constant 0 : index
    %c1_48 = arith.constant 1 : index
    %c17_49 = arith.constant 17 : index
    %c0_50 = arith.constant 0 : index
    %73 = vector.load %arg7[%c0_47, %c1_48, %c17_49, %c0_50] : memref<1x18x18x8xf32, #tpu.memory_space<vmem>>, vector<1x16x1x8xf32>
    tpu.vector_store %arg7[%c0_47, %c1_48, %c17_49, %c0_50], %69 {strides = array<i32>} : memref<1x18x18x8xf32, #tpu.memory_space<vmem>>, vector<1x16x1x8xf32>,
    %74 = vector.shape_cast %67 : vector<256x8xf32> to vector<1x16x16x8xf32>
    %c0_51 = arith.constant 0 : index
    %c1_52 = arith.constant 1 : index
    %c1_53 = arith.constant 1 : index
    %c0_54 = arith.constant 0 : index
    %75 = vector.load %arg7[%c0_51, %c1_52, %c1_53, %c0_54] : memref<1x18x18x8xf32, #tpu.memory_space<vmem>>, vector<1x16x16x8xf32>
    tpu.vector_store %arg7[%c0_51, %c1_52, %c1_53, %c0_54], %74 {strides = array<i32>} : memref<1x18x18x8xf32, #tpu.memory_space<vmem>>, vector<1x16x16x8xf32>,
    %cst_55 = arith.constant 0.000000e+00 : f32
    %76 = vector.broadcast %cst_55 : f32 to vector<256x8xf32>
    %c0_56 = arith.constant 0 : index
    %c0_57 = arith.constant 0 : index
    %c0_58 = arith.constant 0 : index
    %c0_59 = arith.constant 0 : index
    %77 = vector.load %arg7[%c0_56, %c0_57, %c0_58, %c0_59] : memref<1x18x18x8xf32, #tpu.memory_space<vmem>>, vector<1x18x16x8xf32>
    %78 = arith.truncf %77 : vector<1x18x16x8xf32> to vector<1x18x16x8xbf16>
    %79 = vector.extract_strided_slice %78 {offsets = [0, 0, 0, 0], sizes = [1, 16, 16, 8], strides = [1, 1, 1, 1]} : vector<1x18x16x8xbf16> to vector<1x16x16x8xbf16>
    %80 = vector.shape_cast %79 : vector<1x16x16x8xbf16> to vector<256x8xbf16>
    %c0_60 = arith.constant 0 : index
    %c0_61 = arith.constant 0 : index
    %c0_62 = arith.constant 0 : index
    %81 = vector.load %arg4[%c0_60, %c0_61, %c0_62] : memref<9x8x8xbf16, #tpu.memory_space<vmem>>, vector<1x8x8xbf16>
    %82 = vector.shape_cast %81 : vector<1x8x8xbf16> to vector<8x8xbf16>
    %cst_63 = arith.constant dense<0.000000e+00> : vector<256x8xf32>
    %83 = tpu.matmul %80, %82, %cst_63 {dimension_numbers = #tpu.dot_dimension_numbers<[1], [0], [0], [1], [0, 0, 1, 1], [], []>} : vector<256x8xbf16>, vector<8x8xbf16>, vector<256x8xf32> -> vector<256x8xf32>
    %84 = arith.addf %76, %83 : vector<256x8xf32>
    %85 = vector.extract_strided_slice %78 {offsets = [0, 1, 0, 0], sizes = [1, 16, 16, 8], strides = [1, 1, 1, 1]} : vector<1x18x16x8xbf16> to vector<1x16x16x8xbf16>
    %86 = vector.shape_cast %85 : vector<1x16x16x8xbf16> to vector<256x8xbf16>
    %c3_64 = arith.constant 3 : index
    %c0_65 = arith.constant 0 : index
    %c0_66 = arith.constant 0 : index
    %87 = vector.load %arg4[%c3_64, %c0_65, %c0_66] : memref<9x8x8xbf16, #tpu.memory_space<vmem>>, vector<1x8x8xbf16>
    %88 = vector.shape_cast %87 : vector<1x8x8xbf16> to vector<8x8xbf16>
    %cst_67 = arith.constant dense<0.000000e+00> : vector<256x8xf32>
    %89 = tpu.matmul %86, %88, %cst_67 {dimension_numbers = #tpu.dot_dimension_numbers<[1], [0], [0], [1], [0, 0, 1, 1], [], []>} : vector<256x8xbf16>, vector<8x8xbf16>, vector<256x8xf32> -> vector<256x8xf32>
    %90 = arith.addf %84, %89 : vector<256x8xf32>
    %91 = vector.extract_strided_slice %78 {offsets = [0, 2, 0, 0], sizes = [1, 16, 16, 8], strides = [1, 1, 1, 1]} : vector<1x18x16x8xbf16> to vector<1x16x16x8xbf16>
    %92 = vector.shape_cast %91 : vector<1x16x16x8xbf16> to vector<256x8xbf16>
    %c6_68 = arith.constant 6 : index
    %c0_69 = arith.constant 0 : index
    %c0_70 = arith.constant 0 : index
    %93 = vector.load %arg4[%c6_68, %c0_69, %c0_70] : memref<9x8x8xbf16, #tpu.memory_space<vmem>>, vector<1x8x8xbf16>
    %94 = vector.shape_cast %93 : vector<1x8x8xbf16> to vector<8x8xbf16>
    %cst_71 = arith.constant dense<0.000000e+00> : vector<256x8xf32>
    %95 = tpu.matmul %92, %94, %cst_71 {dimension_numbers = #tpu.dot_dimension_numbers<[1], [0], [0], [1], [0, 0, 1, 1], [], []>} : vector<256x8xbf16>, vector<8x8xbf16>, vector<256x8xf32> -> vector<256x8xf32>
    %96 = arith.addf %90, %95 : vector<256x8xf32>
    %c0_72 = arith.constant 0 : index
    %c0_73 = arith.constant 0 : index
    %c1_74 = arith.constant 1 : index
    %c0_75 = arith.constant 0 : index
    %97 = vector.load %arg7[%c0_72, %c0_73, %c1_74, %c0_75] : memref<1x18x18x8xf32, #tpu.memory_space<vmem>>, vector<1x18x16x8xf32>
    %98 = arith.truncf %97 : vector<1x18x16x8xf32> to vector<1x18x16x8xbf16>
    %99 = vector.extract_strided_slice %98 {offsets = [0, 0, 0, 0], sizes = [1, 16, 16, 8], strides = [1, 1, 1, 1]} : vector<1x18x16x8xbf16> to vector<1x16x16x8xbf16>
    %100 = vector.shape_cast %99 : vector<1x16x16x8xbf16> to vector<256x8xbf16>
    %c1_76 = arith.constant 1 : index
    %c0_77 = arith.constant 0 : index
    %c0_78 = arith.constant 0 : index
    %101 = vector.load %arg4[%c1_76, %c0_77, %c0_78] : memref<9x8x8xbf16, #tpu.memory_space<vmem>>, vector<1x8x8xbf16>
    %102 = vector.shape_cast %101 : vector<1x8x8xbf16> to vector<8x8xbf16>
    %cst_79 = arith.constant dense<0.000000e+00> : vector<256x8xf32>
    %103 = tpu.matmul %100, %102, %cst_79 {dimension_numbers = #tpu.dot_dimension_numbers<[1], [0], [0], [1], [0, 0, 1, 1], [], []>} : vector<256x8xbf16>, vector<8x8xbf16>, vector<256x8xf32> -> vector<256x8xf32>
    %104 = arith.addf %96, %103 : vector<256x8xf32>
    %105 = vector.extract_strided_slice %98 {offsets = [0, 1, 0, 0], sizes = [1, 16, 16, 8], strides = [1, 1, 1, 1]} : vector<1x18x16x8xbf16> to vector<1x16x16x8xbf16>
    %106 = vector.shape_cast %105 : vector<1x16x16x8xbf16> to vector<256x8xbf16>
    %c4_80 = arith.constant 4 : index
    %c0_81 = arith.constant 0 : index
    %c0_82 = arith.constant 0 : index
    %107 = vector.load %arg4[%c4_80, %c0_81, %c0_82] : memref<9x8x8xbf16, #tpu.memory_space<vmem>>, vector<1x8x8xbf16>
    %108 = vector.shape_cast %107 : vector<1x8x8xbf16> to vector<8x8xbf16>
    %cst_83 = arith.constant dense<0.000000e+00> : vector<256x8xf32>
    %109 = tpu.matmul %106, %108, %cst_83 {dimension_numbers = #tpu.dot_dimension_numbers<[1], [0], [0], [1], [0, 0, 1, 1], [], []>} : vector<256x8xbf16>, vector<8x8xbf16>, vector<256x8xf32> -> vector<256x8xf32>
    %110 = arith.addf %104, %109 : vector<256x8xf32>
    %111 = vector.extract_strided_slice %98 {offsets = [0, 2, 0, 0], sizes = [1, 16, 16, 8], strides = [1, 1, 1, 1]} : vector<1x18x16x8xbf16> to vector<1x16x16x8xbf16>
    %112 = vector.shape_cast %111 : vector<1x16x16x8xbf16> to vector<256x8xbf16>
    %c7_84 = arith.constant 7 : index
    %c0_85 = arith.constant 0 : index
    %c0_86 = arith.constant 0 : index
    %113 = vector.load %arg4[%c7_84, %c0_85, %c0_86] : memref<9x8x8xbf16, #tpu.memory_space<vmem>>, vector<1x8x8xbf16>
    %114 = vector.shape_cast %113 : vector<1x8x8xbf16> to vector<8x8xbf16>
    %cst_87 = arith.constant dense<0.000000e+00> : vector<256x8xf32>
    %115 = tpu.matmul %112, %114, %cst_87 {dimension_numbers = #tpu.dot_dimension_numbers<[1], [0], [0], [1], [0, 0, 1, 1], [], []>} : vector<256x8xbf16>, vector<8x8xbf16>, vector<256x8xf32> -> vector<256x8xf32>
    %116 = arith.addf %110, %115 : vector<256x8xf32>
    %c0_88 = arith.constant 0 : index
    %c0_89 = arith.constant 0 : index
    %c2_90 = arith.constant 2 : index
    %c0_91 = arith.constant 0 : index
    %117 = vector.load %arg7[%c0_88, %c0_89, %c2_90, %c0_91] : memref<1x18x18x8xf32, #tpu.memory_space<vmem>>, vector<1x18x16x8xf32>
    %118 = arith.truncf %117 : vector<1x18x16x8xf32> to vector<1x18x16x8xbf16>
    %119 = vector.extract_strided_slice %118 {offsets = [0, 0, 0, 0], sizes = [1, 16, 16, 8], strides = [1, 1, 1, 1]} : vector<1x18x16x8xbf16> to vector<1x16x16x8xbf16>
    %120 = vector.shape_cast %119 : vector<1x16x16x8xbf16> to vector<256x8xbf16>
    %c2_92 = arith.constant 2 : index
    %c0_93 = arith.constant 0 : index
    %c0_94 = arith.constant 0 : index
    %121 = vector.load %arg4[%c2_92, %c0_93, %c0_94] : memref<9x8x8xbf16, #tpu.memory_space<vmem>>, vector<1x8x8xbf16>
    %122 = vector.shape_cast %121 : vector<1x8x8xbf16> to vector<8x8xbf16>
    %cst_95 = arith.constant dense<0.000000e+00> : vector<256x8xf32>
    %123 = tpu.matmul %120, %122, %cst_95 {dimension_numbers = #tpu.dot_dimension_numbers<[1], [0], [0], [1], [0, 0, 1, 1], [], []>} : vector<256x8xbf16>, vector<8x8xbf16>, vector<256x8xf32> -> vector<256x8xf32>
    %124 = arith.addf %116, %123 : vector<256x8xf32>
    %125 = vector.extract_strided_slice %118 {offsets = [0, 1, 0, 0], sizes = [1, 16, 16, 8], strides = [1, 1, 1, 1]} : vector<1x18x16x8xbf16> to vector<1x16x16x8xbf16>
    %126 = vector.shape_cast %125 : vector<1x16x16x8xbf16> to vector<256x8xbf16>
    %c5_96 = arith.constant 5 : index
    %c0_97 = arith.constant 0 : index
    %c0_98 = arith.constant 0 : index
    %127 = vector.load %arg4[%c5_96, %c0_97, %c0_98] : memref<9x8x8xbf16, #tpu.memory_space<vmem>>, vector<1x8x8xbf16>
    %128 = vector.shape_cast %127 : vector<1x8x8xbf16> to vector<8x8xbf16>
    %cst_99 = arith.constant dense<0.000000e+00> : vector<256x8xf32>
    %129 = tpu.matmul %126, %128, %cst_99 {dimension_numbers = #tpu.dot_dimension_numbers<[1], [0], [0], [1], [0, 0, 1, 1], [], []>} : vector<256x8xbf16>, vector<8x8xbf16>, vector<256x8xf32> -> vector<256x8xf32>
    %130 = arith.addf %124, %129 : vector<256x8xf32>
    %131 = vector.extract_strided_slice %118 {offsets = [0, 2, 0, 0], sizes = [1, 16, 16, 8], strides = [1, 1, 1, 1]} : vector<1x18x16x8xbf16> to vector<1x16x16x8xbf16>
    %132 = vector.shape_cast %131 : vector<1x16x16x8xbf16> to vector<256x8xbf16>
    %c8_100 = arith.constant 8 : index
    %c0_101 = arith.constant 0 : index
    %c0_102 = arith.constant 0 : index
    %133 = vector.load %arg4[%c8_100, %c0_101, %c0_102] : memref<9x8x8xbf16, #tpu.memory_space<vmem>>, vector<1x8x8xbf16>
    %134 = vector.shape_cast %133 : vector<1x8x8xbf16> to vector<8x8xbf16>
    %cst_103 = arith.constant dense<0.000000e+00> : vector<256x8xf32>
    %135 = tpu.matmul %132, %134, %cst_103 {dimension_numbers = #tpu.dot_dimension_numbers<[1], [0], [0], [1], [0, 0, 1, 1], [], []>} : vector<256x8xbf16>, vector<8x8xbf16>, vector<256x8xf32> -> vector<256x8xf32>
    %136 = arith.addf %130, %135 : vector<256x8xf32>
    %c0_104 = arith.constant 0 : index
    %c0_105 = arith.constant 0 : index
    %137 = vector.load %arg5[%c0_104, %c0_105] : memref<1x8xf32, #tpu.memory_space<vmem>>, vector<1x8xf32>
    %138 = vector.broadcast %137 : vector<1x8xf32> to vector<256x8xf32>
    %139 = arith.addf %136, %138 : vector<256x8xf32>
    %140 = arith.extf %32 : vector<256x8xbf16> to vector<256x8xf32>
    %141 = arith.addf %139, %140 : vector<256x8xf32>
    %cst_106 = arith.constant 0.000000e+00 : f32
    %142 = vector.broadcast %cst_106 : f32 to vector<256x8xf32>
    %143 = arith.maximumf %141, %142 : vector<256x8xf32>
    %144 = vector.shape_cast %143 : vector<256x8xf32> to vector<1x16x16x8xf32>
    %c0_107 = arith.constant 0 : index
    %c0_108 = arith.constant 0 : index
    %c0_109 = arith.constant 0 : index
    %c0_110 = arith.constant 0 : index
    %145 = vector.load %arg6[%c0_107, %c0_108, %c0_109, %c0_110] : memref<1x16x16x8xf32, #tpu.memory_space<vmem>>, vector<1x16x16x8xf32>
    tpu.vector_store %arg6[%c0_107, %c0_108, %c0_109, %c0_110], %144 {strides = array<i32>} : memref<1x16x16x8xf32, #tpu.memory_space<vmem>>, vector<1x16x16x8xf32>,
    return
  }
  func.func @transform_0(%arg0: i32) -> (i32, i32, i32, i32) {
    %c0_i32 = arith.constant 0 : i32
    %c0_i32_0 = arith.constant 0 : i32
    %c0_i32_1 = arith.constant 0 : i32
    %c0_i32_2 = arith.constant 0 : i32
    return %arg0, %c0_i32, %c0_i32_0, %c0_i32_1 : i32, i32, i32, i32
  }
  func.func @transform_1(%arg0: i32) -> (i32, i32, i32) {
    %c0_i32 = arith.constant 0 : i32
    %c0_i32_0 = arith.constant 0 : i32
    %c0_i32_1 = arith.constant 0 : i32
    %c0_i32_2 = arith.constant 0 : i32
    return %c0_i32, %c0_i32_0, %c0_i32_1 : i32, i32, i32
  }
  func.func @transform_2(%arg0: i32) -> (i32, i32) {
    %c0_i32 = arith.constant 0 : i32
    %c0_i32_0 = arith.constant 0 : i32
    %c0_i32_1 = arith.constant 0 : i32
    return %c0_i32, %c0_i32_0 : i32, i32
  }
  func.func @transform_3(%arg0: i32) -> (i32, i32, i32) {
    %c0_i32 = arith.constant 0 : i32
    %c0_i32_0 = arith.constant 0 : i32
    %c0_i32_1 = arith.constant 0 : i32
    %c0_i32_2 = arith.constant 0 : i32
    return %c0_i32, %c0_i32_0, %c0_i32_1 : i32, i32, i32
  }
  func.func @transform_4(%arg0: i32) -> (i32, i32) {
    %c0_i32 = arith.constant 0 : i32
    %c0_i32_0 = arith.constant 0 : i32
    %c0_i32_1 = arith.constant 0 : i32
    return %c0_i32, %c0_i32_0 : i32, i32
  }
  func.func @transform_5(%arg0: i32) -> (i32, i32, i32, i32) {
    %c0_i32 = arith.constant 0 : i32
    %c0_i32_0 = arith.constant 0 : i32
    %c0_i32_1 = arith.constant 0 : i32
    %c0_i32_2 = arith.constant 0 : i32
    return %arg0, %c0_i32, %c0_i32_0, %c0_i32_1 : i32, i32, i32, i32
  }
}

</mosaic_0001>

<bundles_post_ra>
// kernel: tpu_custom_call.1
= control target key start
LH: loop header
LB: loop body
LE: loop exit
PB: predicated region body
PF: predicated region fallthrough
CT: control target
= control target key end

     0   :  { %s6339_s18 = smov 0   ;;  %s8787_s0 = inlined_call_operand.vmem [shape: bf16[2,18,18,8], index: 0, kind: input, shape index: {}]   ;;  %s8788_s1 = inlined_call_operand.vmem [shape: bf16[9,8,8], index: 1, kind: input, shape index: {}]   ;;  %s8789_s2 = inlined_call_operand.vmem [shape: f32[1,8], index: 2, kind: input, shape index: {}]   ;;  %s8790_s3 = inlined_call_operand.vmem [shape: bf16[9,8,8], index: 3, kind: input, shape index: {}]   ;;  %s8791_s4 = inlined_call_operand.vmem [shape: f32[1,8], index: 4, kind: input, shape index: {}]   ;;  %s8792_s5 = inlined_call_operand.vmem [shape: f32[2,16,16,8], index: 5, kind: output, shape index: {}]  }
   0x1 LB: > { %s4965_s19 = sadd.s32 4294967295, %s6306_s18   ;;  %p4969_p0 = scmp.ge.s32.totalorder %s6306_s18, 1  ;;  %s6306_s18 = sphi %s6339_s18, %s15_s18  }
   0x2   : > { %p187_p1 = scmp.lt.s32.totalorder %s6306_s18, 3 }
   0x4   : > { %p188_p2 = pnand %p4969_p0, %p187_p1 }
   0x6   : > { %191 = sbr.rel (%p188_p2) target bundleno = 1011 (0x3f3), region = 40 }
   0xb   : > { %v4991_v0 = vld [vmem:[%s8788_s1 + $0xc] sm:$0xf]  ;;  %vm404_vm0 = vcmask 1043456   ;;  %v352_v1 = vld [vmem:[%s8788_s1] sm:$0xf]  ;;  %p215_p3 = scmp.lt.s32.totalorder %s4965_s19, 1 }
   0xc   : > { %6236 = vmatprep.subr.msk.bf16.mxu0 %vm404_vm0, %v4991_v0  ;;  %v406_v2 = vsel %vm404_vm0, %v4991_v0, 0  ;;  %6237 = vmatprep.subr.msk.bf16.mxu1 %vm404_vm0, %v352_v1  ;;  %v573_v3 = vsel %vm404_vm0, %v352_v1, 0  ;;  %v5024_v4 = vld [vmem:[%s8788_s1 + $0x18] sm:$0xf]  ;;  %v5059_v5 = vld [vmem:[%s8788_s1 + $0x4] sm:$0xf] }
   0xd   : > { %5625 = vmatpush3.bf16.msra.mxu0 %v406_v2  ;;  %5659 = vmatpush3.bf16.msra.mxu1 %v573_v3  ;;  %s9135_s19 = smov (!%p215_p3, %s4965_s19), 1  ;;  %vm355_vm1 = vcmask 64512   ;;  %v742_v9 = vsel %vm404_vm0, %v5024_v4, 0  ;;  %v6388_v10 = vld [vmem:[%s8788_s1 + $0x10] sm:$0xf]  ;;  %v1183_v12 = vsel %vm404_vm0, %v5059_v5, 0 }
   0xe   : > { %6238 = vmatprep.subr.msk.bf16.mxu0 %vm404_vm0, %v5024_v4  ;;  %6239 = vmatprep.subr.msk.bf16.mxu1 %vm404_vm0, %v5059_v5  ;;  %s6254_s28 = smul.u32 216, %s9135_s19  ;;  %v6403_v13 = vld [vmem:[%s8788_s1 + $0x1c] sm:$0xf]  ;;  %vm955_vm2 = vsmask.f32 7424  ;;  %vm1850_vm3 = vcmask 1046528  }
   0xf   : > { %v1411_v56 = vsel %vm404_vm0, %v6388_v10, 0  ;;  %v1623_v2 = vsel %vm404_vm0, %v6403_v13, 0  ;;  %vm2637_vm4 = vcmask 57344   ;;  %vm2630_vm5 = vcmask 58368   ;;  %s5317_s16 = sshll.u32 %s9135_s19, 8 }
  0x10   : > { %s6371_s6 = scalar_lea.vmem %s8787_s0, %s6254_s28  ;;  %s8548_s20 = scalar_lea.vmem %s8792_s5, %s5317_s16 }
  0x11   : > { %v6374_v6 = vld [vmem:[%s6371_s6 + $0xc] sm:$0xff]   ;;  %v6377_v7 = vld [vmem:[%s6371_s6] sm:$0xff]   ;;  %v6382_v8 = vld [vmem:[%s6371_s6 + $0x18] sm:$0xff]  }
  0x12   : > { %5626 = vmatprep.mubr.msk.bf16.mxu0 %vm355_vm1, %v6374_v6  ;;  %5660 = vmatprep.mubr.msk.bf16.mxu1 %vm355_vm1, %v6377_v7  ;;  %v6393_v11 = vld [vmem:[%s6371_s6 + $0x24] sm:$0xff]   ;;  %v6414_v14 = vld [vmem:[%s6371_s6 + $0x30] sm:$0xff]   ;;  %v6417_v15 = vld [vmem:[%s6371_s6 + $0x3c] sm:$0xff]   ;;  %v958_v25 = vshll.u32 %v6377_v7, 16  ;;  %v956_v28 = vshrl.u32 %v6377_v7, 16  ;;  %v969_v32 = vshll.u32 %v6374_v6, 16 }
  0x13   : > { %5627 = vmatmul.mubr.msk.bf16.vlgmr.msra.gmra.mxu0 %vm355_vm1, %v6382_v8  ;;  %5661 = vmatmul.mubr.msk.bf16.vlgmr.msra.gmra.mxu1 %vm355_vm1, %v6374_v6  ;;  %v6428_v16 = vld [vmem:[%s6371_s6 + $0x48] sm:$0xff]   ;;  %v6431_v17 = vld [vmem:[%s6371_s6 + $0x54] sm:$0xff]   ;;  %v6442_v18 = vld [vmem:[%s6371_s6 + $0x60] sm:$0xff]   ;;  %v980_v36 = vshll.u32 %v6382_v8, 16  ;;  %v967_v38 = vshrl.u32 %v6374_v6, 16  ;;  %v978_v42 = vshrl.u32 %v6382_v8, 16 }
  0x14   : > { %5693 = vmatpush3.bf16.msra.mxu0 %v742_v9  ;;  %5630 = vmatprep.mubr.msk.bf16.mxu0 %vm355_vm1, %v6393_v11  ;;  %v6445_v19 = vld [vmem:[%s6371_s6 + $0x6c] sm:$0xff]   ;;  %v6456_v20 = vld [vmem:[%s6371_s6 + $0x78] sm:$0xff]   ;;  %v6459_v21 = vld [vmem:[%s6371_s6 + $0x84] sm:$0xff]   ;;  %v960_v29 = vrot.slane %v958_v25, 1  ;;  %v971_v39 = vrot.slane %v969_v32, 1  ;;  %v991_v45 = vshll.u32 %v6393_v11, 16 }
  0x15   : > { %5664 = vmatprep.mubr.msk.bf16.mxu1 %vm355_vm1, %v6382_v8  ;;  %5727 = vmatpush3.bf16.msra.mxu1 %v1183_v12  ;;  %v6470_v22 = vld [vmem:[%s6371_s6 + $0x90] sm:$0xff]   ;;  %v6473_v23 = vld [vmem:[%s6371_s6 + $0x9c] sm:$0xff]   ;;  %v6281_v24 = vld [vmem:[%s6371_s6 + $0x8] ss:$0 sps:$4 sm:$0x11]   ;;  %v982_v43 = vrot.slane %v980_v36, 1 }
  0x16   : > { %6240 = vmatprep.subr.msk.bf16.mxu0 %vm404_vm0, %v6388_v10  ;;  %6241 = vmatprep.subr.msk.bf16.mxu1 %vm404_vm0, %v6403_v13  ;;  %v6486_v26 = vld [vmem:[%s6371_s6 + $0xa8] sm:$0xff]   ;;  %v6489_v27 = vld [vmem:[%s6371_s6 + $0xb4] sm:$0xff]   ;;  %v963_v30 = vshll.u32 %v6281_v24, 16  ;;  %v961_v33 = vor.u32 %v960_v29, %v956_v28  ;;  %v6283_v35 = vld [vmem:[%s6371_s6 + $0x20] ss:$0 sps:$4 sm:$0x11]   ;;  %v972_v48 = vor.u32 %v971_v39, %v967_v38 }
  0x17   : > { %v6282_v31 = vld [vmem:[%s6371_s6 + $0x14] ss:$0 sps:$4 sm:$0x11]   ;;  %v6505_v37 = vld [vmem:[%s6371_s6 + $0xc0] sm:$0xff]   ;;  %v985_v44 = vshll.u32 %v6283_v35, 16  ;;  %v1851_v46 = vrot.slane %v6377_v7, 1  ;;  %v983_v54 = vor.u32 %v982_v43, %v978_v42 }
  0x18   : > { %v965_v34 = vrot.slane %v963_v30, 1  ;;  %v974_v40 = vshll.u32 %v6282_v31, 16  ;;  %v1852_v47 = vrot.slane %v6281_v24, 1  ;;  %v6520_v50 = vld [vmem:[%s6371_s6 + $0x2c] ss:$0 sps:$4 sm:$0x11]  }
  0x19   : > { %v6285_v51 = vld [vmem:[%s6371_s6 + $0x38] ss:$0 sps:$4 sm:$0x11]   ;;  %v1002_v52 = vshll.u32 %v6414_v14, 16  ;;  %v987_v55 = vrot.slane %v985_v44, 1  ;;  %v989_v57 = vshrl.u32 %v6393_v11, 16 }
  0x1a   : > { %v966_v41 = vsel %vm955_vm2, %v961_v33, %v965_v34  ;;  %v976_v49 = vrot.slane %v974_v40, 1  ;;  %v6525_v53 = vsel %vm1850_vm3, %v1851_v46, %v1852_v47  ;;  %v993_v58 = vrot.slane %v991_v45, 1  ;;  %v6557_v9 = vld [vmem:[%s8788_s1 + $0x14] sm:$0xf] }
  0x1b   : > { %5631 = vmatmul.mubr.msk.bf16.gmra.mxu0 %vm355_vm1, %v6414_v14  ;;  %5665 = vmatmul.mubr.msk.bf16.gmra.mxu1 %vm355_vm1, %v6393_v11  ;;  %v996_v60 = vshll.u32 %v6520_v50, 16  ;;  %v1854_v61 = vrot.slane %v6374_v6, 1  ;;  %v1855_v62 = vrot.slane %v6282_v31, 1  ;;  %v1000_v63 = vshrl.u32 %v6414_v14, 16  ;;  %v6552_v6 = vld [vmem:[%s8788_s1 + $0x8] sm:$0xf] }
  0x1c   : > { %5634 = vmatprep.mubr.msk.bf16.mxu0 %vm355_vm1, %v6417_v15  ;;  %5668 = vmatprep.mubr.msk.bf16.mxu1 %vm355_vm1, %v6414_v14  ;;  %v6531_v59 = vsel %vm955_vm2, %v972_v48, %v976_v49  ;;  %v1004_v0 = vrot.slane %v1002_v52, 1  ;;  %v1007_v1 = vshll.u32 %v6285_v51, 16  ;;  %v6539_v3 = vsel %vm955_vm2, %v983_v54, %v987_v55  ;;  %v6562_v12 = vld [vmem:[%s6371_s6 + $0x44] ss:$0 sps:$4 sm:$0x11]  }
  0x1d   : > { %8829 = vst [vmem:[#allocation3_spill] sm:$0xff] %v6531_v59  ;;  %8830 = vst [vmem:[#allocation4_spill] sm:$0xff] %v6539_v3  ;;  %v6542_v4 = vsel %vm1850_vm3, %v1854_v61, %v1855_v62  ;;  %v1857_v5 = vrot.slane %v6382_v8, 1  ;;  %v1858_v7 = vrot.slane %v6283_v35, 1  ;;  %v998_v10 = vrot.slane %v996_v60, 1 }
  0x1e   : > { %v1013_v13 = vshll.u32 %v6417_v15, 16  ;;  %v1005_v25 = vor.u32 %v1004_v0, %v1000_v63  ;;  %v1009_v28 = vrot.slane %v1007_v1, 1  ;;  %v6287_v29 = vld [vmem:[%s6371_s6 + $0x50] ss:$0 sps:$4 sm:$0x11]   ;;  %v1024_v30 = vshll.u32 %v6428_v16, 16 }
  0x1f   : > { %v6566_v24 = vsel %vm1850_vm3, %v1857_v5, %v1858_v7  ;;  %v1011_v32 = vshrl.u32 %v6417_v15, 16  ;;  %v1018_v34 = vshll.u32 %v6562_v12, 16  ;;  %v1022_v36 = vshrl.u32 %v6428_v16, 16  ;;  %v6595_v44 = vld [vmem:[%s6371_s6 + $0x5c] ss:$0 sps:$4 sm:$0x11]  }
  0x20   : > { %v1015_v33 = vrot.slane %v1013_v13, 1  ;;  %v6582_v35 = vsel %vm955_vm2, %v1005_v25, %v1009_v28  ;;  %v1026_v38 = vrot.slane %v1024_v30, 1  ;;  %v1029_v39 = vshll.u32 %v6287_v29, 16  ;;  %v6289_v48 = vld [vmem:[%s6371_s6 + $0x68] ss:$0 sps:$4 sm:$0x11]  }
  0x21   : > { %8832 = vst [vmem:[#allocation6_spill] sm:$0xff] %v6582_v35  ;;  %v1863_v40 = vrot.slane %v6414_v14, 1  ;;  %v1020_v43 = vrot.slane %v1018_v34, 1  ;;  %v1035_v45 = vshll.u32 %v6431_v17, 16  ;;  %v1046_v49 = vshll.u32 %v6442_v18, 16 }
  0x22   : > { %v1016_v42 = vor.u32 %v1015_v33, %v1011_v32  ;;  %v1027_v46 = vor.u32 %v1026_v38, %v1022_v36  ;;  %v1031_v47 = vrot.slane %v1029_v39, 1  ;;  %v1033_v52 = vshrl.u32 %v6431_v17, 16  ;;  %v6622_v1 = vld [vmem:[%s6371_s6 + $0x74] ss:$0 sps:$4 sm:$0x11]  }
  0x23   : > { %5635 = vmatmul.mubr.msk.bf16.gmra.mxu0 %vm355_vm1, %v6428_v16  ;;  %5669 = vmatmul.mubr.msk.bf16.gmra.mxu1 %vm355_vm1, %v6417_v15  ;;  %v1037_v54 = vrot.slane %v1035_v45, 1  ;;  %v1040_v55 = vshll.u32 %v6595_v44, 16  ;;  %v1051_v60 = vshll.u32 %v6289_v48, 16  ;;  %v1869_v61 = vrot.slane %v6428_v16, 1 }
  0x24   : > { %5638 = vmatprep.mubr.msk.bf16.mxu0 %vm355_vm1, %v6431_v17  ;;  %5672 = vmatprep.mubr.msk.bf16.mxu1 %vm355_vm1, %v6428_v16  ;;  %v1870_v62 = vrot.slane %v6287_v29, 1  ;;  %v1055_v25 = vshrl.u32 %v6445_v19, 16  ;;  %v1062_v29 = vshll.u32 %v6622_v1, 16  ;;  %v1066_v32 = vshrl.u32 %v6456_v20, 16 }
  0x25   : > { %v1038_v63 = vor.u32 %v1037_v54, %v1033_v52  ;;  %v1042_v0 = vrot.slane %v1040_v55, 1  ;;  %v1053_v7 = vrot.slane %v1051_v60, 1  ;;  %v1875_v36 = vrot.slane %v6442_v18, 1 }
  0x26   : > { %v1876_v38 = vrot.slane %v6289_v48, 1 }
  0x27   : > { %v6633_v13 = vsel %vm955_vm2, %v1038_v63, %v1042_v0  ;;  %v6681_v63 = vld [vmem:[%s6371_s6 + $0xa4] ss:$0 sps:$4 sm:$0x11]   ;;  %v1101_v0 = vshll.u32 %v6473_v23, 16 }
  0x28   : > { %8835 = vst [vmem:[#allocation9_spill] sm:$0xff] %v6633_v13 }
  0x2b   : > { %5639 = vmatmul.mubr.msk.bf16.gmra.mxu0 %vm355_vm1, %v6442_v18  ;;  %5673 = vmatmul.mubr.msk.bf16.gmra.mxu1 %vm355_vm1, %v6431_v17 }
  0x2c   : > { %5642 = vmatprep.mubr.msk.bf16.mxu0 %vm355_vm1, %v6445_v19  ;;  %5676 = vmatprep.mubr.msk.bf16.mxu1 %vm355_vm1, %v6442_v18 }
  0x33   : > { %5643 = vmatmul.mubr.msk.bf16.gmra.mxu0 %vm355_vm1, %v6456_v20  ;;  %5677 = vmatmul.mubr.msk.bf16.gmra.mxu1 %vm355_vm1, %v6445_v19 }
  0x34   : > { %5646 = vmatprep.mubr.msk.bf16.mxu0 %vm355_vm1, %v6459_v21  ;;  %5680 = vmatprep.mubr.msk.bf16.mxu1 %vm355_vm1, %v6456_v20 }
  0x3b   : > { %5647 = vmatmul.mubr.msk.bf16.gmra.mxu0 %vm355_vm1, %v6470_v22  ;;  %5681 = vmatmul.mubr.msk.bf16.gmra.mxu1 %vm355_vm1, %v6459_v21 }
  0x3c   : > { %5650 = vmatprep.mubr.msk.bf16.mxu0 %vm355_vm1, %v6473_v23  ;;  %5684 = vmatprep.mubr.msk.bf16.mxu1 %vm355_vm1, %v6470_v22 }
  0x43   : > { %5651 = vmatmul.mubr.msk.bf16.gmra.mxu0 %vm355_vm1, %v6486_v26  ;;  %5685 = vmatmul.mubr.msk.bf16.gmra.mxu1 %vm355_vm1, %v6473_v23 }
  0x44   : > { %5654 = vmatprep.mubr.msk.bf16.mxu0 %vm355_vm1, %v6489_v27  ;;  %5688 = vmatprep.mubr.msk.bf16.mxu1 %vm355_vm1, %v6486_v26 }
  0x4b   : > { %5655 = vmatmul.mubr.msk.bf16.gmra.mxu0 %vm355_vm1, %v6505_v37  ;;  %5689 = vmatmul.mubr.msk.bf16.gmra.mxu1 %vm355_vm1, %v6489_v27 }
  0x4c   : > { %5694 = vmatprep.mubr.msk.bf16.mxu0 %vm355_vm1, %v6382_v8  ;;  %5728 = vmatprep.mubr.msk.bf16.mxu1 %vm355_vm1, %v966_v41  ;;  %v994_v8 = vor.u32 %v993_v58, %v989_v57  ;;  %v1864_v41 = vrot.slane %v6285_v51, 1  ;;  %v6604_v51 = vsel %vm955_vm2, %v1016_v42, %v1020_v43  ;;  %v1044_v57 = vshrl.u32 %v6442_v18, 16 }
  0x4d   : > { %8833 = vst [vmem:[#allocation7_spill] sm:$0xff] %v6604_v51  ;;  %v1048_v58 = vrot.slane %v1046_v49, 1  ;;  %v1079_v42 = vshll.u32 %v6459_v21, 16  ;;  %v1077_v49 = vshrl.u32 %v6459_v21, 16 }
  0x4e   : > { %v6577_v31 = vsel %vm955_vm2, %v994_v8, %v998_v10  ;;  %v6629_v8 = vld [vmem:[%s6371_s6 + $0x80] ss:$0 sps:$4 sm:$0x11]   ;;  %v1068_v10 = vshll.u32 %v6456_v20, 16 }
  0x4f   : > { %8831 = vst [vmem:[#allocation5_spill] sm:$0xff] %v6577_v31  ;;  %v1049_v5 = vor.u32 %v1048_v58, %v1044_v57  ;;  %v1073_v34 = vshll.u32 %v6629_v8, 16  ;;  %v1081_v52 = vrot.slane %v1079_v42, 1  ;;  %v1088_v57 = vshrl.u32 %v6470_v22, 16 }
  0x50   : > { %v1070_v33 = vrot.slane %v1068_v10, 1  ;;  %v1112_v10 = vshll.u32 %v6486_v26, 16  ;;  %v6707_v42 = vld [vmem:[%s6371_s6 + $0xbc] ss:$0 sps:$4 sm:$0x11]  }
  0x51   : > { %v6638_v30 = vsel %vm955_vm2, %v1049_v5, %v1053_v7  ;;  %v1075_v45 = vrot.slane %v1073_v34, 1  ;;  %v6685_v7 = vld [vmem:[%s6371_s6 + $0xb0] ss:$0 sps:$4 sm:$0x11]   ;;  %v1110_v34 = vshrl.u32 %v6486_v26, 16 }
  0x52   : > { %8836 = vst [vmem:[#allocation10_spill] sm:$0xff] %v6638_v30  ;;  %v1071_v43 = vor.u32 %v1070_v33, %v1066_v32  ;;  %v1106_v32 = vshll.u32 %v6681_v63, 16 }
  0x53   : > { %5695 = vmatmul.mubr.msk.bf16.vlgmr.msra.gmra.mxu0 %vm355_vm1, %v6393_v11  ;;  %5729 = vmatmul.mubr.msk.bf16.vlgmr.msra.gmra.mxu1 %vm355_vm1, %v6531_v59 }
  0x54   : > { %5761 = vmatpush3.bf16.msra.mxu0 %v1411_v56  ;;  %5698 = vmatprep.mubr.msk.bf16.mxu0 %vm355_vm1, %v6414_v14  ;;  %v6599_v14 = vsel %vm1850_vm3, %v1863_v40, %v1864_v41  ;;  %v6609_v56 = vsel %vm955_vm2, %v1027_v46, %v1031_v47  ;;  %v1064_v40 = vrot.slane %v1062_v29, 1  ;;  %v6652_v41 = vld [vmem:[%s6371_s6 + $0x8c] ss:$0 sps:$4 sm:$0x11]   ;;  %v1090_v47 = vshll.u32 %v6470_v22, 16 }
  0x55   : > { %5732 = vmatprep.mubr.msk.bf16.mxu1 %vm355_vm1, %v6539_v3  ;;  %5795 = vmatpush3.bf16.msra.mxu1 %v1623_v2  ;;  %8834 = vst [vmem:[#allocation8_spill] sm:$0xff] %v6609_v56  ;;  %v1057_v2 = vshll.u32 %v6445_v19, 16  ;;  %v6659_v46 = vld [vmem:[%s6371_s6 + $0x98] ss:$0 sps:$4 sm:$0x11]   ;;  %v1084_v54 = vshll.u32 %v6652_v41, 16  ;;  %v6668_v55 = vsel %vm955_vm2, %v1071_v43, %v1075_v45 }
  0x56   : > { %6242 = vmatprep.subr.msk.bf16.mxu0 %vm404_vm0, %v6552_v6  ;;  %6243 = vmatprep.subr.msk.bf16.mxu1 %vm404_vm0, %v6557_v9  ;;  %8838 = vst [vmem:[#allocation12_spill] sm:$0xff] %v6668_v55  ;;  %v1092_v58 = vrot.slane %v1090_v47, 1  ;;  %v1095_v60 = vshll.u32 %v6659_v46, 16  ;;  %v1103_v29 = vrot.slane %v1101_v0, 1  ;;  %v1123_v43 = vshll.u32 %v6489_v27, 16 }
  0x57   : > { %v1059_v28 = vrot.slane %v1057_v2, 1 }
  0x58   : > { %v1093_v2 = vor.u32 %v1092_v58, %v1088_v57  ;;  %v1097_v5 = vrot.slane %v1095_v60, 1  ;;  %v1128_v57 = vshll.u32 %v6707_v42, 16 }
  0x59   : > { %v1060_v39 = vor.u32 %v1059_v28, %v1055_v25  ;;  %v1099_v28 = vshrl.u32 %v6473_v23, 16 }
  0x5a   : > { %v6694_v33 = vsel %vm955_vm2, %v1093_v2, %v1097_v5  ;;  %v1950_v2 = vsel %vm404_vm0, %v6552_v6, 0  ;;  %v2156_v5 = vsel %vm404_vm0, %v6557_v9, 0  ;;  %v6789_v6 = vld [vmem:[%s6371_s6 + $0xc8] ss:$0 sps:$4 sm:$0x11]   ;;  %v1380_v9 = vshll.u32 %v6505_v37, 16 }
  0x5b   : > { %5699 = vmatmul.mubr.msk.bf16.gmra.mxu0 %vm355_vm1, %v6417_v15  ;;  %5733 = vmatmul.mubr.msk.bf16.gmra.mxu1 %vm355_vm1, %v6577_v31  ;;  %v6663_v48 = vsel %vm955_vm2, %v1060_v39, %v1064_v40  ;;  %8840 = vst [vmem:[#allocation14_spill] sm:$0xff] %v6694_v33  ;;  %v1104_v39 = vor.u32 %v1103_v29, %v1099_v28  ;;  %v1108_v40 = vrot.slane %v1106_v32, 1  ;;  %v1378_v28 = vshrl.u32 %v6505_v37, 16 }
  0x5c   : > { %5702 = vmatprep.mubr.msk.bf16.mxu0 %vm355_vm1, %v6428_v16  ;;  %5736 = vmatprep.mubr.msk.bf16.mxu1 %vm355_vm1, %v6582_v35  ;;  %v6626_v16 = vsel %vm1850_vm3, %v1869_v61, %v1870_v62  ;;  %8837 = vst [vmem:[#allocation11_spill] sm:$0xff] %v6663_v48  ;;  %v1082_v61 = vor.u32 %v1081_v52, %v1077_v49  ;;  %v1086_v62 = vrot.slane %v1084_v54, 1  ;;  %v1121_v52 = vshrl.u32 %v6489_v27, 16 }
  0x5d   : > { %v6711_v49 = vsel %vm955_vm2, %v1104_v39, %v1108_v40  ;;  %v1125_v54 = vrot.slane %v1123_v43, 1  ;;  %v1382_v29 = vrot.slane %v1380_v9, 1  ;;  %v1385_v32 = vshll.u32 %v6789_v6, 16 }
  0x5e   : > { %v6689_v25 = vsel %vm955_vm2, %v1082_v61, %v1086_v62  ;;  %8841 = vst [vmem:[#allocation15_spill] sm:$0xff] %v6711_v49  ;;  %v1130_v61 = vrot.slane %v1128_v57, 1  ;;  %v6727_v62 = vld [vmem:[%s6371_s6 + $0xcc] sm:$0xff]  }
  0x5f   : > { %8839 = vst [vmem:[#allocation13_spill] sm:$0xff] %v6689_v25  ;;  %v1126_v60 = vor.u32 %v1125_v54, %v1121_v52  ;;  %v1387_v39 = vrot.slane %v1385_v32, 1  ;;  %v1606_v40 = vshrl.u32 %v6727_v62, 16 }
  0x61   : > { %v6730_v0 = vsel %vm955_vm2, %v1126_v60, %v1130_v61  ;;  %v1860_v60 = vrot.slane %v6393_v11, 1  ;;  %v1861_v61 = vrot.slane %v6520_v50, 1 }
  0x62   : > { %8843 = vst [vmem:[#allocation17_spill] sm:$0xff] %v6730_v0 }
  0x63   : > { %5703 = vmatmul.mubr.msk.bf16.gmra.mxu0 %vm355_vm1, %v6431_v17  ;;  %5737 = vmatmul.mubr.msk.bf16.gmra.mxu1 %vm355_vm1, %v6604_v51 }
  0x64   : > { %5706 = vmatprep.mubr.msk.bf16.mxu0 %vm355_vm1, %v6442_v18  ;;  %5740 = vmatprep.mubr.msk.bf16.mxu1 %vm355_vm1, %v6609_v56  ;;  %v6656_v18 = vsel %vm1850_vm3, %v1875_v36, %v1876_v38  ;;  %v1114_v36 = vrot.slane %v1112_v10, 1  ;;  %v1117_v38 = vshll.u32 %v6685_v7, 16  ;;  %v5144_v10 = vld [vmem:[%s8788_s1 + $0x20] sm:$0xf] }
  0x66   : > { %v1115_v45 = vor.u32 %v1114_v36, %v1110_v34  ;;  %v1119_v47 = vrot.slane %v1117_v38, 1  ;;  %v6803_v34 = vld [vmem:[%s6371_s6 + $0xd4] ss:$0 sps:$4 sm:$0x11]   ;;  %v1608_v36 = vshll.u32 %v6727_v62, 16  ;;  %v1383_v38 = vor.u32 %v1382_v29, %v1378_v28 }
  0x67   : > { %v1867_v29 = vrot.slane %v6562_v12, 1 }
  0x68   : > { %v6716_v58 = vsel %vm955_vm2, %v1115_v45, %v1119_v47  ;;  %v1610_v43 = vrot.slane %v1608_v36, 1  ;;  %v1613_v45 = vshll.u32 %v6803_v34, 16  ;;  %v6809_v47 = vsel %vm955_vm2, %v1383_v38, %v1387_v39 }
  0x69   : > { %8842 = vst [vmem:[#allocation16_spill] sm:$0xff] %v6716_v58  ;;  %8844 = vst [vmem:[#allocation18_spill] sm:$0xff] %v6809_v47 }
  0x6a   : > { %v1611_v52 = vor.u32 %v1610_v43, %v1606_v40  ;;  %v1615_v54 = vrot.slane %v1613_v45, 1 }
  0x6b   : > { %5707 = vmatmul.mubr.msk.bf16.gmra.mxu0 %vm355_vm1, %v6445_v19  ;;  %5741 = vmatmul.mubr.msk.bf16.gmra.mxu1 %vm355_vm1, %v6633_v13 }
  0x6c   : > { %5710 = vmatprep.mubr.msk.bf16.mxu0 %vm355_vm1, %v6456_v20  ;;  %5744 = vmatprep.mubr.msk.bf16.mxu1 %vm355_vm1, %v6638_v30  ;;  %v1616_v57 = vsel %vm955_vm2, %v1611_v52, %v1615_v54 }
  0x73   : > { %5711 = vmatmul.mubr.msk.bf16.gmra.mxu0 %vm355_vm1, %v6459_v21  ;;  %5745 = vmatmul.mubr.msk.bf16.gmra.mxu1 %vm355_vm1, %v6663_v48 }
  0x74   : > { %5714 = vmatprep.mubr.msk.bf16.mxu0 %vm355_vm1, %v6470_v22  ;;  %5748 = vmatprep.mubr.msk.bf16.mxu1 %vm355_vm1, %v6668_v55 }
  0x7b   : > { %5715 = vmatmul.mubr.msk.bf16.gmra.mxu0 %vm355_vm1, %v6473_v23  ;;  %5749 = vmatmul.mubr.msk.bf16.gmra.mxu1 %vm355_vm1, %v6689_v25 }
  0x7c   : > { %5718 = vmatprep.mubr.msk.bf16.mxu0 %vm355_vm1, %v6486_v26  ;;  %5752 = vmatprep.mubr.msk.bf16.mxu1 %vm355_vm1, %v6694_v33 }
  0x83   : > { %5719 = vmatmul.mubr.msk.bf16.gmra.mxu0 %vm355_vm1, %v6489_v27  ;;  %5753 = vmatmul.mubr.msk.bf16.gmra.mxu1 %vm355_vm1, %v6711_v49 }
  0x84   : > { %5722 = vmatprep.mubr.msk.bf16.mxu0 %vm355_vm1, %v6505_v37  ;;  %5756 = vmatprep.mubr.msk.bf16.mxu1 %vm355_vm1, %v6716_v58 }
  0x8b   : > { %5723 = vmatmul.mubr.msk.bf16.gmra.mxu0 %vm355_vm1, %v6727_v62  ;;  %5757 = vmatmul.mubr.msk.bf16.gmra.mxu1 %vm355_vm1, %v6730_v0 }
  0x8c   : > { %5762 = vmatprep.mubr.msk.bf16.mxu0 %vm355_vm1, %v6531_v59  ;;  %5796 = vmatprep.mubr.msk.bf16.mxu1 %vm355_vm1, %v6539_v3 }
  0x93   : > { %5763 = vmatmul.mubr.msk.bf16.vlgmr.msra.gmra.mxu0 %vm355_vm1, %v6539_v3  ;;  %5797 = vmatmul.mubr.msk.bf16.vlgmr.msra.gmra.mxu1 %vm355_vm1, %v6577_v31 }
  0x94   : > { %5829 = vmatpush3.bf16.msra.mxu0 %v1950_v2  ;;  %5766 = vmatprep.mubr.msk.bf16.mxu0 %vm355_vm1, %v6577_v31  ;;  %v2362_v2 = vsel %vm404_vm0, %v5144_v10, 0 }
  0x95   : > { %5800 = vmatprep.mubr.msk.bf16.mxu1 %vm355_vm1, %v6582_v35  ;;  %5863 = vmatpush3.bf16.msra.mxu1 %v2156_v5  ;;  %v6831_v5 = vsel %vm1850_vm3, %v1860_v60, %v1861_v61  ;;  %v1872_v60 = vrot.slane %v6431_v17, 1  ;;  %v1873_v61 = vrot.slane %v6595_v44, 1 }
  0x96   : > { %6244 = vmatprep.subr.msk.bf16.mxu0 %vm404_vm0, %v5144_v10  ;;  %v1866_v10 = vrot.slane %v6417_v15, 1 }
  0x98   : > { %v6850_v43 = vsel %vm1850_vm3, %v1866_v10, %v1867_v29  ;;  %v6871_v29 = vsel %vm1850_vm3, %v1872_v60, %v1873_v61 }
  0x9b   : > { %5767 = vmatmul.mubr.msk.bf16.gmra.mxu0 %vm355_vm1, %v6582_v35  ;;  %5801 = vmatmul.mubr.msk.bf16.gmra.mxu1 %vm355_vm1, %v6604_v51 }
  0x9c   : > { %5770 = vmatprep.mubr.msk.bf16.mxu0 %vm355_vm1, %v6604_v51  ;;  %5804 = vmatprep.mubr.msk.bf16.mxu1 %vm355_vm1, %v6609_v56 }
  0xa3   : > { %5771 = vmatmul.mubr.msk.bf16.gmra.mxu0 %vm355_vm1, %v6609_v56  ;;  %5805 = vmatmul.mubr.msk.bf16.gmra.mxu1 %vm355_vm1, %v6633_v13 }
  0xa4   : > { %5774 = vmatprep.mubr.msk.bf16.mxu0 %vm355_vm1, %v6633_v13  ;;  %5808 = vmatprep.mubr.msk.bf16.mxu1 %vm355_vm1, %v6638_v30 }
  0xab   : > { %5775 = vmatmul.mubr.msk.bf16.gmra.mxu0 %vm355_vm1, %v6638_v30  ;;  %5809 = vmatmul.mubr.msk.bf16.gmra.mxu1 %vm355_vm1, %v6663_v48 }
  0xac   : > { %5778 = vmatprep.mubr.msk.bf16.mxu0 %vm355_vm1, %v6663_v48  ;;  %5812 = vmatprep.mubr.msk.bf16.mxu1 %vm355_vm1, %v6668_v55 }
  0xb3   : > { %5779 = vmatmul.mubr.msk.bf16.gmra.mxu0 %vm355_vm1, %v6668_v55  ;;  %5813 = vmatmul.mubr.msk.bf16.gmra.mxu1 %vm355_vm1, %v6689_v25 }
  0xb4   : > { %5782 = vmatprep.mubr.msk.bf16.mxu0 %vm355_vm1, %v6689_v25  ;;  %5816 = vmatprep.mubr.msk.bf16.mxu1 %vm355_vm1, %v6694_v33 }
  0xbb   : > { %5783 = vmatmul.mubr.msk.bf16.gmra.mxu0 %vm355_vm1, %v6694_v33  ;;  %5817 = vmatmul.mubr.msk.bf16.gmra.mxu1 %vm355_vm1, %v6711_v49 }
  0xbc   : > { %5786 = vmatprep.mubr.msk.bf16.mxu0 %vm355_vm1, %v6711_v49  ;;  %5820 = vmatprep.mubr.msk.bf16.mxu1 %vm355_vm1, %v6716_v58 }
  0xc3   : > { %5787 = vmatmul.mubr.msk.bf16.gmra.mxu0 %vm355_vm1, %v6716_v58  ;;  %5821 = vmatmul.mubr.msk.bf16.gmra.mxu1 %vm355_vm1, %v6730_v0 }
  0xc4   : > { %5790 = vmatprep.mubr.msk.bf16.mxu0 %vm355_vm1, %v6730_v0  ;;  %5824 = vmatprep.mubr.msk.bf16.mxu1 %vm355_vm1, %v6809_v47 }
  0xcb   : > { %5791 = vmatmul.mubr.msk.bf16.gmra.mxu0 %vm355_vm1, %v6809_v47  ;;  %5825 = vmatmul.mubr.msk.bf16.gmra.mxu1 %vm355_vm1, %v1616_v57 }
  0xcc   : > { %5830 = vmatprep.mubr.msk.bf16.mxu0 %vm355_vm1, %v6525_v53  ;;  %5864 = vmatprep.mubr.msk.bf16.mxu1 %vm355_vm1, %v6542_v4 }
  0xd3   : > { %v5628_v9 = vpop.f32.mrf.mxu0  ;;  %v5662_v28 = vpop.f32.mrf.mxu1  ;;  %5831 = vmatmul.mubr.msk.bf16.vlgmr.msra.gmra.mxu0 %vm355_vm1, %v6542_v4  ;;  %5865 = vmatmul.mubr.msk.bf16.vlgmr.msra.gmra.mxu1 %vm355_vm1, %v6566_v24 }
  0xd4   : > { %v6837_v53 = vadd.f32 %v5662_v28, %v5628_v9  ;;  %5897 = vmatpush3.bf16.msra.mxu0 %v2362_v2  ;;  %5834 = vmatprep.mubr.msk.bf16.mxu0 %vm355_vm1, %v6566_v24 }
  0xd5   : > { %v442_v11 = vpop.f32.mrf.mxu0  ;;  %v609_v50 = vpop.f32.mrf.mxu1  ;;  %5868 = vmatprep.mubr.msk.bf16.mxu1 %vm355_vm1, %v6831_v5 }
  0xd6   : > { %v6845_v32 = vadd.f32 %v609_v50, %v442_v11 }
  0xd7   : > { %v5629_v4 = vpop.f32.mrf.mxu0  ;;  %v5663_v36 = vpop.f32.mrf.mxu1 }
  0xd8   : > { %v6847_v38 = vadd.f32 %v5663_v36, %v5629_v4 }
  0xd9   : > { %v445_v39 = vpop.f32.mrf.mxu0  ;;  %v612_v40 = vpop.f32.mrf.mxu1 }
  0xda   : > { %v6852_v45 = vadd.f32 %v612_v40, %v445_v39 }
  0xdb   : > { %v5632_v52 = vpop.f32.mrf.mxu0  ;;  %v5666_v54 = vpop.f32.mrf.mxu1  ;;  %5835 = vmatmul.mubr.msk.bf16.gmra.mxu0 %vm355_vm1, %v6831_v5  ;;  %5869 = vmatmul.mubr.msk.bf16.gmra.mxu1 %vm355_vm1, %v6599_v14 }
  0xdc   : > { %v6858_v15 = vadd.f32 %v5666_v54, %v5632_v52  ;;  %5838 = vmatprep.mubr.msk.bf16.mxu0 %vm355_vm1, %v6599_v14  ;;  %5872 = vmatprep.mubr.msk.bf16.mxu1 %vm355_vm1, %v6850_v43  ;;  %v1878_v52 = vrot.slane %v6445_v19, 1  ;;  %v1879_v54 = vrot.slane %v6622_v1, 1  ;;  %v1881_v1 = vrot.slane %v6456_v20, 1 }
  0xdd   : > { %v458_v12 = vpop.f32.mrf.mxu0  ;;  %v625_v57 = vpop.f32.mrf.mxu1 }
  0xde   : > { %v6866_v2 = vadd.f32 %v625_v57, %v458_v12 }
  0xdf   : > { %v5633_v9 = vpop.f32.mrf.mxu0  ;;  %v5667_v28 = vpop.f32.mrf.mxu1 }
  0xe0   : > { %v6868_v11 = vadd.f32 %v5667_v28, %v5633_v9 }
  0xe1   : > { %v461_v50 = vpop.f32.mrf.mxu0  ;;  %v628_v10 = vpop.f32.mrf.mxu1 }
  0xe2   : > { %v6873_v4 = vadd.f32 %v628_v10, %v461_v50  ;;  %v6892_v50 = vsel %vm1850_vm3, %v1878_v52, %v1879_v54  ;;  %v1884_v54 = vrot.slane %v6459_v21, 1 }
  0xe3   : > { %v5636_v36 = vpop.f32.mrf.mxu0  ;;  %v5670_v39 = vpop.f32.mrf.mxu1  ;;  %5839 = vmatmul.mubr.msk.bf16.gmra.mxu0 %vm355_vm1, %v6850_v43  ;;  %5873 = vmatmul.mubr.msk.bf16.gmra.mxu1 %vm355_vm1, %v6626_v16 }
  0xe4   : > { %v6879_v17 = vadd.f32 %v5670_v39, %v5636_v36  ;;  %5842 = vmatprep.mubr.msk.bf16.mxu0 %vm355_vm1, %v6626_v16  ;;  %5876 = vmatprep.mubr.msk.bf16.mxu1 %vm355_vm1, %v6871_v29 }
  0xe5   : > { %v474_v44 = vpop.f32.mrf.mxu0  ;;  %v641_v40 = vpop.f32.mrf.mxu1 }
  0xe6   : > { %v6887_v12 = vadd.f32 %v641_v40, %v474_v44  ;;  %v1882_v44 = vrot.slane %v6629_v8, 1 }
  0xe7   : > { %v5637_v57 = vpop.f32.mrf.mxu0  ;;  %v5671_v60 = vpop.f32.mrf.mxu1 }
  0xe8   : > { %v6889_v61 = vadd.f32 %v5671_v60, %v5637_v57  ;;  %v1885_v57 = vrot.slane %v6652_v41, 1 }
  0xe9   : > { %v477_v9 = vpop.f32.mrf.mxu0  ;;  %v644_v28 = vpop.f32.mrf.mxu1 }
  0xea   : > { %v6894_v10 = vadd.f32 %v644_v28, %v477_v9  ;;  %v6918_v20 = vsel %vm1850_vm3, %v1884_v54, %v1885_v57 }
  0xeb   : > { %v5640_v36 = vpop.f32.mrf.mxu0  ;;  %v5674_v39 = vpop.f32.mrf.mxu1  ;;  %5843 = vmatmul.mubr.msk.bf16.gmra.mxu0 %vm355_vm1, %v6871_v29  ;;  %5877 = vmatmul.mubr.msk.bf16.gmra.mxu1 %vm355_vm1, %v6656_v18 }
  0xec   : > { %v6900_v19 = vadd.f32 %v5674_v39, %v5640_v36  ;;  %5846 = vmatprep.mubr.msk.bf16.mxu0 %vm355_vm1, %v6656_v18  ;;  %5880 = vmatprep.mubr.msk.bf16.mxu1 %vm355_vm1, %v6892_v50  ;;  %v6915_v39 = vsel %vm1850_vm3, %v1881_v1, %v1882_v44  ;;  %v1887_v1 = vrot.slane %v6470_v22, 1 }
  0xed   : > { %v490_v40 = vpop.f32.mrf.mxu0  ;;  %v657_v52 = vpop.f32.mrf.mxu1 }
  0xee   : > { %v6910_v60 = vadd.f32 %v657_v52, %v490_v40  ;;  %v1890_v40 = vrot.slane %v6473_v23, 1  ;;  %v1891_v52 = vrot.slane %v6681_v63, 1 }
  0xef   : > { %v5641_v9 = vpop.f32.mrf.mxu0  ;;  %v5675_v28 = vpop.f32.mrf.mxu1 }
  0xf0   : > { %v6912_v36 = vadd.f32 %v5675_v28, %v5641_v9 }
  0xf1   : > { %v493_v0 = vpop.f32.mrf.mxu0  ;;  %v660_v47 = vpop.f32.mrf.mxu1 }
  0xf2   : > { %v6920_v8 = vadd.f32 %v660_v47, %v493_v0  ;;  %v1888_v0 = vrot.slane %v6659_v46, 1  ;;  %v6948_v46 = vsel %vm1850_vm3, %v1890_v40, %v1891_v52  ;;  %v1896_v40 = vrot.slane %v6489_v27, 1 }
  0xf3   : > { %v5644_v49 = vpop.f32.mrf.mxu0  ;;  %v5678_v21 = vpop.f32.mrf.mxu1  ;;  %5847 = vmatmul.mubr.msk.bf16.gmra.mxu0 %vm355_vm1, %v6892_v50  ;;  %5881 = vmatmul.mubr.msk.bf16.gmra.mxu1 %vm355_vm1, %v6915_v39  ;;  %v1897_v52 = vrot.slane %v6707_v42, 1 }
  0xf4   : > { %v6926_v41 = vadd.f32 %v5678_v21, %v5644_v49  ;;  %5850 = vmatprep.mubr.msk.bf16.mxu0 %vm355_vm1, %v6915_v39  ;;  %5884 = vmatprep.mubr.msk.bf16.mxu1 %vm355_vm1, %v6918_v20  ;;  %v6941_v28 = vsel %vm1850_vm3, %v1887_v1, %v1888_v0  ;;  %v1893_v1 = vrot.slane %v6486_v26, 1  ;;  %v1894_v0 = vrot.slane %v6685_v7, 1 }
  0xf5   : > { %v506_v47 = vpop.f32.mrf.mxu0  ;;  %v673_v44 = vpop.f32.mrf.mxu1  ;;  %v6976_v7 = vsel %vm1850_vm3, %v1896_v40, %v1897_v52 }
  0xf6   : > { %v6936_v54 = vadd.f32 %v673_v44, %v506_v47  ;;  %v6969_v25 = vsel %vm1850_vm3, %v1893_v1, %v1894_v0  ;;  %v2147_v1 = vrot.slane %v6505_v37, 1  ;;  %v2148_v0 = vrot.slane %v6789_v6, 1 }
  0xf7   : > { %v5645_v49 = vpop.f32.mrf.mxu0  ;;  %v5679_v57 = vpop.f32.mrf.mxu1 }
  0xf8   : > { %v6938_v9 = vadd.f32 %v5679_v57, %v5645_v49 }
  0xf9   : > { %v6943_v21 = vpop.f32.mrf.mxu0  ;;  %v6945_v22 = vpop.f32.mrf.mxu1 }
  0xfb   : > { %v5648_v58 = vpop.f32.mrf.mxu0  ;;  %v5682_v23 = vpop.f32.mrf.mxu1  ;;  %5851 = vmatmul.mubr.msk.bf16.gmra.mxu0 %vm355_vm1, %v6918_v20  ;;  %5885 = vmatmul.mubr.msk.bf16.gmra.mxu1 %vm355_vm1, %v6941_v28 }
  0xfc   : > { %v6954_v63 = vadd.f32 %v5682_v23, %v5648_v58  ;;  %5854 = vmatprep.mubr.msk.bf16.mxu0 %vm355_vm1, %v6941_v28  ;;  %5888 = vmatprep.mubr.msk.bf16.mxu1 %vm355_vm1, %v6948_v46 }
  0xfd   : > { %v522_v47 = vpop.f32.mrf.mxu0  ;;  %v689_v44 = vpop.f32.mrf.mxu1 }
  0xfe   : > { %v6964_v49 = vadd.f32 %v689_v44, %v522_v47 }
  0xff   : > { %v5649_v58 = vpop.f32.mrf.mxu0  ;;  %v5683_v57 = vpop.f32.mrf.mxu1 }
 0x100   : > { %v6966_v23 = vadd.f32 %v5683_v57, %v5649_v58 }
 0x101   : > { %v6971_v33 = vpop.f32.mrf.mxu0  ;;  %v6973_v26 = vpop.f32.mrf.mxu1 }
 0x102   : > { %8845 = vst [vmem:[#allocation19_spill] sm:$0xff] %v6973_v26 }
 0x103   : > { %v5652_v48 = vpop.f32.mrf.mxu0  ;;  %v5686_v27 = vpop.f32.mrf.mxu1  ;;  %5855 = vmatmul.mubr.msk.bf16.gmra.mxu0 %vm355_vm1, %v6948_v46  ;;  %5889 = vmatmul.mubr.msk.bf16.gmra.mxu1 %vm355_vm1, %v6969_v25 }
 0x104   : > { %v6982_v42 = vadd.f32 %v5686_v27, %v5652_v48  ;;  %5858 = vmatprep.mubr.msk.bf16.mxu0 %vm355_vm1, %v6969_v25  ;;  %5892 = vmatprep.mubr.msk.bf16.mxu1 %vm355_vm1, %v6976_v7  ;;  %v6995_v48 = vsel %vm1850_vm3, %v2147_v1, %v2148_v0 }
 0x105   : > { %v538_v47 = vpop.f32.mrf.mxu0  ;;  %v705_v44 = vpop.f32.mrf.mxu1 }
 0x106   : > { %v6990_v40 = vadd.f32 %v705_v44, %v538_v47 }
 0x107   : > { %v5653_v52 = vpop.f32.mrf.mxu0  ;;  %v5687_v58 = vpop.f32.mrf.mxu1 }
 0x108   : > { %v6992_v57 = vadd.f32 %v5687_v58, %v5653_v52 }
 0x109   : > { %v6997_v27 = vpop.f32.mrf.mxu0  ;;  %v6999_v55 = vpop.f32.mrf.mxu1 }
 0x10a   : > { %8846 = vst [vmem:[#allocation20_spill] sm:$0xff] %v6997_v27  ;;  %8847 = vst [vmem:[#allocation21_spill] sm:$0xff] %v6999_v55 }
 0x10b   : > { %v5656_v13 = vpop.f32.mrf.mxu0  ;;  %v5690_v30 = vpop.f32.mrf.mxu1  ;;  %5859 = vmatmul.mubr.msk.bf16.gmra.mxu0 %vm355_vm1, %v6976_v7  ;;  %5893 = vmatmul.mubr.msk.bf16.gmra.mxu1 %vm355_vm1, %v6995_v48 }
 0x10c   : > { %v7005_v37 = vadd.f32 %v5690_v30, %v5656_v13  ;;  %5898 = vmatprep.mubr.msk.bf16.mxu0 %vm355_vm1, %v6566_v24 }
 0x10d   : > { %v554_v6 = vpop.f32.mrf.mxu0  ;;  %v721_v1 = vpop.f32.mrf.mxu1 }
 0x10e   : > { %v7009_v0 = vadd.f32 %v721_v1, %v554_v6 }
 0x10f   : > { %v5657_v47 = vpop.f32.mrf.mxu0  ;;  %v5691_v44 = vpop.f32.mrf.mxu1 }
 0x110   : > { %v7011_v52 = vadd.f32 %v5691_v44, %v5657_v47 }
 0x111   : > { %v7013_v58 = vpop.f32.mrf.mxu0  ;;  %v7015_v51 = vpop.f32.mrf.mxu1 }
 0x112   : > { %8848 = vst [vmem:[#allocation22_spill] sm:$0xff] %v7013_v58  ;;  %8849 = vst [vmem:[#allocation23_spill] sm:$0xff] %v7015_v51 }
 0x113   : > { %v5696_v56 = vpop.f32.mrf.mxu0  ;;  %5899 = vmatmul.mubr.msk.bf16.vlgmr.msra.gmra.mxu0 %vm355_vm1, %v6831_v5  ;;  %v5730_v13 = vpop.f32.mrf.mxu1 }
 0x114   : > { %v907_v30 = vadd.f32 %v5696_v56, %v6837_v53  ;;  %5902 = vmatprep.mubr.msk.bf16.mxu0 %vm355_vm1, %v6599_v14 }
 0x115   : > { %v778_v24 = vpop.f32.mrf.mxu0  ;;  %v1219_v6 = vpop.f32.mrf.mxu1 }
 0x116   : > { %v905_v1 = vadd.f32 %v778_v24, %v6845_v32  ;;  %v7023_v47 = vadd.f32 %v5730_v13, %v907_v30 }
 0x117   : > { %v5697_v44 = vpop.f32.mrf.mxu0  ;;  %v5731_v31 = vpop.f32.mrf.mxu1 }
 0x118   : > { %v908_v35 = vadd.f32 %v5697_v44, %v6847_v38  ;;  %v7026_v59 = vadd.f32 %v1219_v6, %v905_v1 }
 0x119   : > { %v781_v3 = vpop.f32.mrf.mxu0  ;;  %v7028_v5 = vpop.f32.mrf.mxu1 }
 0x11a   : > { %v7031_v56 = vadd.f32 %v781_v3, %v6852_v45  ;;  %v7033_v53 = vadd.f32 %v5731_v31, %v908_v35 }
 0x11b   : > { %v5700_v14 = vpop.f32.mrf.mxu0  ;;  %5903 = vmatmul.mubr.msk.bf16.gmra.mxu0 %vm355_vm1, %v6850_v43  ;;  %v5734_v32 = vpop.f32.mrf.mxu1 }
 0x11c   : > { %v911_v13 = vadd.f32 %v5700_v14, %v6858_v15  ;;  %5906 = vmatprep.mubr.msk.bf16.mxu0 %vm355_vm1, %v6626_v16 }
 0x11d   : > { %v794_v38 = vpop.f32.mrf.mxu0  ;;  %v1235_v30 = vpop.f32.mrf.mxu1 }
 0x11e   : > { %v909_v24 = vadd.f32 %v794_v38, %v6866_v2  ;;  %v7041_v6 = vadd.f32 %v5734_v32, %v911_v13 }
 0x11f   : > { %v5701_v3 = vpop.f32.mrf.mxu0  ;;  %v5735_v45 = vpop.f32.mrf.mxu1 }
 0x120   : > { %v912_v31 = vadd.f32 %v5701_v3, %v6868_v11  ;;  %v7044_v35 = vadd.f32 %v1235_v30, %v909_v24 }
 0x121   : > { %v797_v1 = vpop.f32.mrf.mxu0  ;;  %v7046_v43 = vpop.f32.mrf.mxu1 }
 0x122   : > { %v7049_v15 = vadd.f32 %v797_v1, %v6873_v4  ;;  %v7051_v44 = vadd.f32 %v5735_v45, %v912_v31 }
 0x123   : > { %v5704_v16 = vpop.f32.mrf.mxu0  ;;  %5907 = vmatmul.mubr.msk.bf16.gmra.mxu0 %vm355_vm1, %v6871_v29  ;;  %v5738_v2 = vpop.f32.mrf.mxu1 }
 0x124   : > { %v915_v14 = vadd.f32 %v5704_v16, %v6879_v17  ;;  %5910 = vmatprep.mubr.msk.bf16.mxu0 %vm355_vm1, %v6656_v18  ;;  %v5162_v18 = vld [vmem:[%s8790_s3 + $0xc] sm:$0xf] }
 0x125   : > { %v810_v11 = vpop.f32.mrf.mxu0  ;;  %v1251_v32 = vpop.f32.mrf.mxu1  ;;  %6245 = vmatprep.subr.msk.bf16.mxu1 %vm404_vm0, %v5162_v18 }
 0x126   : > { %v913_v13 = vadd.f32 %v810_v11, %v6887_v12  ;;  %v7059_v38 = vadd.f32 %v5738_v2, %v915_v14 }
 0x127   : > { %v5705_v4 = vpop.f32.mrf.mxu0  ;;  %v5739_v30 = vpop.f32.mrf.mxu1 }
 0x128   : > { %v916_v24 = vadd.f32 %v5705_v4, %v6889_v61  ;;  %v7062_v3 = vadd.f32 %v1251_v32, %v913_v13 }
 0x129   : > { %v813_v45 = vpop.f32.mrf.mxu0  ;;  %v7064_v29 = vpop.f32.mrf.mxu1 }
 0x12a   : > { %v7067_v17 = vadd.f32 %v813_v45, %v6894_v10  ;;  %v7069_v31 = vadd.f32 %v5739_v30, %v916_v24  ;;  %v2808_v10 = vsel %vm404_vm0, %v5162_v18, 0 }
 0x12b   : > { %v5708_v12 = vpop.f32.mrf.mxu0  ;;  %5911 = vmatmul.mubr.msk.bf16.gmra.mxu0 %vm355_vm1, %v6892_v50  ;;  %v5742_v1 = vpop.f32.mrf.mxu1  ;;  %5931 = vmatpush3.bf16.msra.mxu1 %v2808_v10 }
 0x12c   : > { %v919_v61 = vadd.f32 %v5708_v12, %v6900_v19  ;;  %5914 = vmatprep.mubr.msk.bf16.mxu0 %vm355_vm1, %v6915_v39 }
 0x12d   : > { %v826_v16 = vpop.f32.mrf.mxu0  ;;  %v1267_v2 = vpop.f32.mrf.mxu1 }
 0x12e   : > { %v917_v14 = vadd.f32 %v826_v16, %v6910_v60  ;;  %v7082_v11 = vadd.f32 %v5742_v1, %v919_v61 }
 0x12f   : > { %v5709_v32 = vpop.f32.mrf.mxu0  ;;  %v5743_v13 = vpop.f32.mrf.mxu1 }
 0x130   : > { %v920_v50 = vadd.f32 %v5709_v32, %v6912_v36  ;;  %v7085_v4 = vadd.f32 %v1267_v2, %v917_v14 }
 0x131   : > { %v829_v30 = vpop.f32.mrf.mxu0  ;;  %v7087_v19 = vpop.f32.mrf.mxu1 }
 0x132   : > { %8850 = vst [vmem:[#allocation24_spill] sm:$0xff] %v7087_v19  ;;  %v7090_v39 = vadd.f32 %v829_v30, %v6920_v8  ;;  %v7092_v24 = vadd.f32 %v5743_v13, %v920_v50 }
 0x133   : > { %v5712_v45 = vpop.f32.mrf.mxu0  ;;  %5915 = vmatmul.mubr.msk.bf16.gmra.mxu0 %vm355_vm1, %v6918_v20  ;;  %v5746_v60 = vpop.f32.mrf.mxu1 }
 0x134   : > { %8851 = vst [vmem:[#allocation25_spill] sm:$0xff] %v7090_v39  ;;  %v923_v18 = vadd.f32 %v5712_v45, %v6926_v41  ;;  %5918 = vmatprep.mubr.msk.bf16.mxu0 %vm355_vm1, %v6941_v28 }
 0x135   : > { %v842_v36 = vpop.f32.mrf.mxu0  ;;  %v1283_v12 = vpop.f32.mrf.mxu1 }
 0x136   : > { %v921_v1 = vadd.f32 %v842_v36, %v6936_v54  ;;  %v7100_v61 = vadd.f32 %v5746_v60, %v923_v18 }
 0x137   : > { %v5713_v8 = vpop.f32.mrf.mxu0  ;;  %v5747_v10 = vpop.f32.mrf.mxu1 }
 0x138   : > { %v924_v16 = vadd.f32 %v5713_v8, %v6938_v9  ;;  %v7103_v2 = vadd.f32 %v1283_v12, %v921_v1  ;;  %v2354_v8 = vrot.slane %v6803_v34, 1 }
 0x139   : > { %v7105_v14 = vpop.f32.mrf.mxu0  ;;  %v7107_v20 = vpop.f32.mrf.mxu1 }
 0x13a   : > { %8852 = vst [vmem:[#allocation26_spill] sm:$0xff] %v7105_v14  ;;  %8853 = vst [vmem:[#allocation27_spill] sm:$0xff] %v7107_v20  ;;  %v7109_v41 = vadd.f32 %v5747_v10, %v924_v16 }
 0x13b   : > { %v5716_v32 = vpop.f32.mrf.mxu0  ;;  %5919 = vmatmul.mubr.msk.bf16.gmra.mxu0 %vm355_vm1, %v6948_v46  ;;  %v5750_v28 = vpop.f32.mrf.mxu1 }
 0x13c   : > { %v927_v54 = vadd.f32 %v5716_v32, %v6954_v63  ;;  %5922 = vmatprep.mubr.msk.bf16.mxu0 %vm355_vm1, %v6969_v25 }
 0x13d   : > { %v858_v13 = vpop.f32.mrf.mxu0  ;;  %v1299_v9 = vpop.f32.mrf.mxu1 }
 0x13e   : > { %v925_v50 = vadd.f32 %v858_v13, %v6964_v49  ;;  %v7117_v30 = vadd.f32 %v5750_v28, %v927_v54 }
 0x13f   : > { %v5717_v45 = vpop.f32.mrf.mxu0  ;;  %v5751_v60 = vpop.f32.mrf.mxu1 }
 0x140   : > { %v928_v18 = vadd.f32 %v5717_v45, %v6966_v23  ;;  %v7120_v36 = vadd.f32 %v1299_v9, %v925_v50  ;;  %v2353_v23 = vrot.slane %v6727_v62, 1 }
 0x141   : > { %v7122_v12 = vpop.f32.mrf.mxu0  ;;  %v7124_v46 = vpop.f32.mrf.mxu1 }
 0x142   : > { %8854 = vst [vmem:[#allocation28_spill] sm:$0xff] %v7122_v12  ;;  %8855 = vst [vmem:[#allocation29_spill] sm:$0xff] %v7124_v46  ;;  %v7126_v63 = vadd.f32 %v5751_v60, %v928_v18 }
 0x143   : > { %v5720_v1 = vpop.f32.mrf.mxu0  ;;  %5923 = vmatmul.mubr.msk.bf16.gmra.mxu0 %vm355_vm1, %v6976_v7  ;;  %v5754_v25 = vpop.f32.mrf.mxu1 }
 0x144   : > { %v931_v49 = vadd.f32 %v5720_v1, %v6982_v42  ;;  %5926 = vmatprep.mubr.msk.bf16.mxu0 %vm355_vm1, %v6995_v48  ;;  %v2355_v42 = vsel %vm1850_vm3, %v2353_v23, %v2354_v8 }
 0x145   : > { %v874_v10 = vpop.f32.mrf.mxu0  ;;  %v1315_v16 = vpop.f32.mrf.mxu1 }
 0x146   : > { %v929_v32 = vadd.f32 %v874_v10, %v6990_v40  ;;  %v7136_v28 = vadd.f32 %v5754_v25, %v931_v49 }
 0x147   : > { %v5721_v54 = vpop.f32.mrf.mxu0  ;;  %v5755_v13 = vpop.f32.mrf.mxu1 }
 0x148   : > { %v932_v7 = vadd.f32 %v5721_v54, %v6992_v57  ;;  %v7139_v9 = vadd.f32 %v1315_v16, %v929_v32 }
 0x149   : > { %v7142_v50 = vpop.f32.mrf.mxu0  ;;  %v7144_v48 = vpop.f32.mrf.mxu1 }
 0x14a   : > { %8856 = vst [vmem:[#allocation30_spill] sm:$0xff] %v7142_v50  ;;  %8857 = vst [vmem:[#allocation31_spill] sm:$0xff] %v7144_v48  ;;  %v7146_v62 = vadd.f32 %v5755_v13, %v932_v7 }
 0x14b   : > { %v5724_v34 = vpop.f32.mrf.mxu0  ;;  %5927 = vmatmul.mubr.msk.bf16.gmra.mxu0 %vm355_vm1, %v2355_v42  ;;  %v5758_v40 = vpop.f32.mrf.mxu1 }
 0x14c   : > { %v935_v45 = vadd.f32 %v5724_v34, %v7005_v37 }
 0x14d   : > { %v890_v60 = vpop.f32.mrf.mxu0  ;;  %v1331_v18 = vpop.f32.mrf.mxu1 }
 0x14e   : > { %v933_v57 = vadd.f32 %v890_v60, %v7009_v0  ;;  %v7151_v1 = vadd.f32 %v5758_v40, %v935_v45 }
 0x14f   : > { %v5725_v25 = vpop.f32.mrf.mxu0  ;;  %v5759_v49 = vpop.f32.mrf.mxu1 }
 0x150   : > { %v936_v23 = vadd.f32 %v5725_v25, %v7011_v52  ;;  %v7154_v8 = vadd.f32 %v1331_v18, %v933_v57  ;;  %v8825_v18 = vmov 0.0  }
 0x151   : > { %v7156_v10 = vpop.f32.mrf.mxu0  ;;  %v7158_v16 = vpop.f32.mrf.mxu1  ;;  %2628 = vst.msk [vmem:[#allocation2] sm:$0xff] %vm355_vm1, %v8825_v18  ;;  %2629 = vst.msk [vmem:[#allocation2 + $0x8] sm:$0xff] %vm355_vm1, %v8825_v18 }
 0x152   : > { %8858 = vst [vmem:[#allocation32_spill] sm:$0xff] %v7156_v10  ;;  %8859 = vst [vmem:[#allocation33_spill] sm:$0xff] %v7158_v16  ;;  %v7160_v32 = vadd.f32 %v5759_v49, %v936_v23 }
 0x153   : > { %v5764_v54 = vpop.f32.mrf.mxu0  ;;  %v7162_v37 = vpop.f32.mrf.mxu1  ;;  %2633 = vst.msk [vmem:[#allocation2 + $0x198] sm:$0xff] %vm355_vm1, %v8825_v18  ;;  %2634 = vst.msk [vmem:[#allocation2 + $0x1a0] sm:$0xff] %vm355_vm1, %v8825_v18 }
 0x154   : > { %v7165_v13 = vadd.f32 %v5764_v54, %v7023_v47  ;;  %2638 = vst.msk [vmem:[#allocation2 + $0x18] sm:$0x1] %vm2637_vm4, %v8825_v18  ;;  %2639 = vst.msk [vmem:[#allocation2 + $0x30] sm:$0x1] %vm2637_vm4, %v8825_v18 }
 0x155   : > { %v1447_v0 = vpop.f32.mrf.mxu0  ;;  %v7167_v7 = vpop.f32.mrf.mxu1  ;;  %2640 = vst.msk [vmem:[#allocation2 + $0x48] sm:$0x1] %vm2637_vm4, %v8825_v18  ;;  %2641 = vst.msk [vmem:[#allocation2 + $0x60] sm:$0x1] %vm2637_vm4, %v8825_v18 }
 0x156   : > { %v7170_v42 = vadd.f32 %v1447_v0, %v7026_v59  ;;  %2642 = vst.msk [vmem:[#allocation2 + $0x78] sm:$0x1] %vm2637_vm4, %v8825_v18  ;;  %2643 = vst.msk [vmem:[#allocation2 + $0x90] sm:$0x1] %vm2637_vm4, %v8825_v18 }
 0x157   : > { %v5765_v52 = vpop.f32.mrf.mxu0  ;;  %v7172_v34 = vpop.f32.mrf.mxu1  ;;  %2644 = vst.msk [vmem:[#allocation2 + $0xa8] sm:$0x1] %vm2637_vm4, %v8825_v18  ;;  %2645 = vst.msk [vmem:[#allocation2 + $0xc0] sm:$0x1] %vm2637_vm4, %v8825_v18 }
 0x158   : > { %v7175_v40 = vadd.f32 %v5765_v52, %v7033_v53  ;;  %2646 = vst.msk [vmem:[#allocation2 + $0xd8] sm:$0x1] %vm2637_vm4, %v8825_v18  ;;  %2647 = vst.msk [vmem:[#allocation2 + $0xf0] sm:$0x1] %vm2637_vm4, %v8825_v18  ;;  %v2703_v58 = vld [vmem:[#allocation2 + $0x8] sm:$0xff] }
 0x159   : > { %v7177_v45 = vpop.f32.mrf.mxu0  ;;  %v7179_v60 = vpop.f32.mrf.mxu1  ;;  %2648 = vst.msk [vmem:[#allocation2 + $0x108] sm:$0x1] %vm2637_vm4, %v8825_v18  ;;  %2649 = vst.msk [vmem:[#allocation2 + $0x120] sm:$0x1] %vm2637_vm4, %v8825_v18 }
 0x15a   : > { %2650 = vst.msk [vmem:[#allocation2 + $0x138] sm:$0x1] %vm2637_vm4, %v8825_v18  ;;  %2651 = vst.msk [vmem:[#allocation2 + $0x150] sm:$0x1] %vm2637_vm4, %v8825_v18 }
 0x15b   : > { %2652 = vst.msk [vmem:[#allocation2 + $0x168] sm:$0x1] %vm2637_vm4, %v8825_v18  ;;  %2653 = vst.msk [vmem:[#allocation2 + $0x180] sm:$0x1] %vm2637_vm4, %v8825_v18  ;;  %v5768_v59 = vpop.f32.mrf.mxu0  ;;  %v7253_v47 = vpop.f32.mrf.mxu1 }
 0x15c   : > { %2654 = vst.msk [vmem:[#allocation2 + $0x29] sm:$0x1] %vm2637_vm4, %v8825_v18  ;;  %2655 = vst.msk [vmem:[#allocation2 + $0x41] sm:$0x1] %vm2637_vm4, %v8825_v18  ;;  %v7256_v53 = vadd.f32 %v5768_v59, %v7041_v6 }
 0x15d   : > { %2656 = vst.msk [vmem:[#allocation2 + $0x59] sm:$0x1] %vm2637_vm4, %v8825_v18  ;;  %2657 = vst.msk [vmem:[#allocation2 + $0x71] sm:$0x1] %vm2637_vm4, %v8825_v18  ;;  %v1463_v57 = vpop.f32.mrf.mxu0  ;;  %v7258_v25 = vpop.f32.mrf.mxu1 }
 0x15e   : > { %2658 = vst.msk [vmem:[#allocation2 + $0x89] sm:$0x1] %vm2637_vm4, %v8825_v18  ;;  %2659 = vst.msk [vmem:[#allocation2 + $0xa1] sm:$0x1] %vm2637_vm4, %v8825_v18  ;;  %v7261_v49 = vadd.f32 %v1463_v57, %v7044_v35  ;;  %v2756_v35 = vld [vmem:[%s8790_s3] sm:$0xf] }
 0x15f   : > { %2660 = vst.msk [vmem:[#allocation2 + $0xb9] sm:$0x1] %vm2637_vm4, %v8825_v18  ;;  %2661 = vst.msk [vmem:[#allocation2 + $0xd1] sm:$0x1] %vm2637_vm4, %v8825_v18  ;;  %v5769_v23 = vpop.f32.mrf.mxu0  ;;  %v7263_v54 = vpop.f32.mrf.mxu1  ;;  %6246 = vmatprep.subr.msk.bf16.mxu0 %vm404_vm0, %v2756_v35  ;;  %v2975_v57 = vsel %vm404_vm0, %v2756_v35, 0 }
 0x160   : > { %2662 = vst.msk [vmem:[#allocation2 + $0xe9] sm:$0x1] %vm2637_vm4, %v8825_v18  ;;  %2663 = vst.msk [vmem:[#allocation2 + $0x101] sm:$0x1] %vm2637_vm4, %v8825_v18  ;;  %v7266_v0 = vadd.f32 %v5769_v23, %v7051_v44  ;;  %v2702_v23 = vld [vmem:[#allocation2] sm:$0xff]  ;;  %5965 = vmatpush3.bf16.msra.mxu0 %v2975_v57 }
 0x161   : > { %2664 = vst.msk [vmem:[#allocation2 + $0x119] sm:$0x1] %vm2637_vm4, %v8825_v18  ;;  %2665 = vst.msk [vmem:[#allocation2 + $0x131] sm:$0x1] %vm2637_vm4, %v8825_v18  ;;  %v7268_v52 = vpop.f32.mrf.mxu0 }
 0x162   : > { %2666 = vst.msk [vmem:[#allocation2 + $0x149] sm:$0x1] %vm2637_vm4, %v8825_v18  ;;  %2667 = vst.msk [vmem:[#allocation2 + $0x161] sm:$0x1] %vm2637_vm4, %v8825_v18 }
 0x163   : > { %2668 = vst.msk [vmem:[#allocation2 + $0x179] sm:$0x1] %vm2637_vm4, %v8825_v18  ;;  %2669 = vst.msk [vmem:[#allocation2 + $0x191] sm:$0x1] %vm2637_vm4, %v8825_v18  ;;  %v7270_v18 = vpop.f32.mrf.mxu1  ;;  %v5772_v16 = vpop.f32.mrf.mxu0 }
 0x164   : > { %v7275_v6 = vadd.f32 %v5772_v16, %v7059_v38  ;;  %v2738_v38 = vpack.c.bf16 %v2703_v58, %v2702_v23  ;;  %v7315_v23 = vld [vmem:[%s8790_s3 + $0x18] sm:$0xf] }
 0x165   : > { %v7272_v10 = vpop.f32.mrf.mxu1  ;;  %v1479_v59 = vpop.f32.mrf.mxu0  ;;  %8866 = vst [vmem:[#allocation40_spill] sm:$0xff] %v7315_v23  ;;  %6247 = vmatprep.subr.msk.bf16.mxu1 %vm404_vm0, %v7315_v23 }
 0x166   : > { %v7283_v44 = vadd.f32 %v1479_v59, %v7062_v3  ;;  %5966 = vmatprep.mubr.msk.bf16.mxu0 %vm355_vm1, %v2738_v38 }
 0x167   : > { %v7277_v51 = vpop.f32.mrf.mxu1  ;;  %v5773_v48 = vpop.f32.mrf.mxu0 }
 0x168   : > { %v7290_v16 = vadd.f32 %v5773_v48, %v7069_v31 }
 0x169   : > { %v7287_v50 = vpop.f32.mrf.mxu1  ;;  %v7292_v55 = vpop.f32.mrf.mxu0 }
 0x16b   : > { %v7294_v27 = vpop.f32.mrf.mxu1  ;;  %v5776_v3 = vpop.f32.mrf.mxu0 }
 0x16c   : > { %v7300_v35 = vadd.f32 %v5776_v3, %v7082_v11 }
 0x16d   : > { %v7297_v59 = vpop.f32.mrf.mxu1  ;;  %v1495_v46 = vpop.f32.mrf.mxu0 }
 0x16e   : > { %8860 = vst [vmem:[#allocation34_spill] sm:$0xff] %v7297_v59  ;;  %8861 = vst [vmem:[#allocation35_spill] sm:$0xff] %v7300_v35  ;;  %v7305_v58 = vadd.f32 %v1495_v46, %v7085_v4 }
 0x16f   : > { %v7302_v12 = vpop.f32.mrf.mxu1  ;;  %v5777_v31 = vpop.f32.mrf.mxu0 }
 0x170   : > { %8862 = vst [vmem:[#allocation36_spill] sm:$0xff] %v7302_v12  ;;  %8863 = vst [vmem:[#allocation37_spill] sm:$0xff] %v7305_v58  ;;  %v7310_v57 = vadd.f32 %v5777_v31, %v7092_v24 }
 0x171   : > { %v7307_v48 = vpop.f32.mrf.mxu1  ;;  %v7317_v38 = vpop.f32.mrf.mxu0 }
 0x172   : > { %8864 = vst [vmem:[#allocation38_spill] sm:$0xff] %v7307_v48  ;;  %8865 = vst [vmem:[#allocation39_spill] sm:$0xff] %v7310_v57 }
 0x173   : > { %8867 = vst [vmem:[#allocation41_spill] sm:$0xff] %v7317_v38  ;;  %v7319_v11 = vpop.f32.mrf.mxu1  ;;  %v5780_v4 = vpop.f32.mrf.mxu0 }
 0x174   : > { %8868 = vst [vmem:[#allocation42_spill] sm:$0xff] %v7319_v11  ;;  %v7326_v3 = vadd.f32 %v5780_v4, %v7100_v61 }
 0x175   : > { %v7323_v46 = vpop.f32.mrf.mxu1  ;;  %v1511_v24 = vpop.f32.mrf.mxu0 }
 0x176   : > { %8869 = vst [vmem:[#allocation43_spill] sm:$0xff] %v7323_v46  ;;  %8870 = vst [vmem:[#allocation44_spill] sm:$0xff] %v7326_v3  ;;  %v7331_v20 = vadd.f32 %v1511_v24, %v7103_v2 }
 0x177   : > { %v7328_v31 = vpop.f32.mrf.mxu1  ;;  %v5781_v48 = vpop.f32.mrf.mxu0 }
 0x178   : > { %8871 = vst [vmem:[#allocation45_spill] sm:$0xff] %v7328_v31  ;;  %8872 = vst [vmem:[#allocation46_spill] sm:$0xff] %v7331_v20  ;;  %v7336_v11 = vadd.f32 %v5781_v48, %v7109_v41 }
 0x179   : > { %v7333_v57 = vpop.f32.mrf.mxu1  ;;  %v7338_v38 = vpop.f32.mrf.mxu0 }
 0x17a   : > { %8873 = vst [vmem:[#allocation47_spill] sm:$0xff] %v7333_v57  ;;  %8874 = vst [vmem:[#allocation48_spill] sm:$0xff] %v7336_v11 }
 0x17b   : > { %8875 = vst [vmem:[#allocation49_spill] sm:$0xff] %v7338_v38  ;;  %v7340_v23 = vpop.f32.mrf.mxu1  ;;  %v5784_v46 = vpop.f32.mrf.mxu0 }
 0x17c   : > { %8876 = vst [vmem:[#allocation50_spill] sm:$0xff] %v7340_v23  ;;  %v7345_v61 = vadd.f32 %v5784_v46, %v7117_v30 }
 0x17d   : > { %v7342_v12 = vpop.f32.mrf.mxu1  ;;  %v1527_v4 = vpop.f32.mrf.mxu0 }
 0x17e   : > { %8877 = vst [vmem:[#allocation51_spill] sm:$0xff] %v7342_v12  ;;  %8878 = vst [vmem:[#allocation52_spill] sm:$0xff] %v7345_v61  ;;  %v7350_v2 = vadd.f32 %v1527_v4, %v7120_v36 }
 0x17f   : > { %v7347_v31 = vpop.f32.mrf.mxu1  ;;  %v5785_v24 = vpop.f32.mrf.mxu0 }
 0x180   : > { %8879 = vst [vmem:[#allocation53_spill] sm:$0xff] %v7347_v31  ;;  %8880 = vst [vmem:[#allocation54_spill] sm:$0xff] %v7350_v2  ;;  %v7355_v41 = vadd.f32 %v5785_v24, %v7126_v63 }
 0x181   : > { %v7352_v57 = vpop.f32.mrf.mxu1  ;;  %v7357_v48 = vpop.f32.mrf.mxu0 }
 0x182   : > { %8881 = vst [vmem:[#allocation55_spill] sm:$0xff] %v7352_v57  ;;  %8882 = vst [vmem:[#allocation56_spill] sm:$0xff] %v7355_v41 }
 0x183   : > { %8883 = vst [vmem:[#allocation57_spill] sm:$0xff] %v7357_v48  ;;  %v7359_v23 = vpop.f32.mrf.mxu1  ;;  %v5788_v12 = vpop.f32.mrf.mxu0 }
 0x184   : > { %8884 = vst [vmem:[#allocation58_spill] sm:$0xff] %v7359_v23  ;;  %v7364_v30 = vadd.f32 %v5788_v12, %v7136_v28 }
 0x185   : > { %v7361_v11 = vpop.f32.mrf.mxu1  ;;  %v1543_v46 = vpop.f32.mrf.mxu0 }
 0x186   : > { %8885 = vst [vmem:[#allocation59_spill] sm:$0xff] %v7361_v11  ;;  %8886 = vst [vmem:[#allocation60_spill] sm:$0xff] %v7364_v30  ;;  %v7369_v36 = vadd.f32 %v1543_v46, %v7139_v9 }
 0x187   : > { %v7366_v31 = vpop.f32.mrf.mxu1  ;;  %v5789_v4 = vpop.f32.mrf.mxu0 }
 0x188   : > { %8887 = vst [vmem:[#allocation61_spill] sm:$0xff] %v7366_v31  ;;  %8888 = vst [vmem:[#allocation62_spill] sm:$0xff] %v7369_v36  ;;  %v7374_v63 = vadd.f32 %v5789_v4, %v7146_v62  ;;  %v7424_v36 = vld [vmem:[%s8790_s3 + $0x4] sm:$0xf] }
 0x189   : > { %v7371_v57 = vpop.f32.mrf.mxu1  ;;  %v7376_v24 = vpop.f32.mrf.mxu0  ;;  %8902 = vst [vmem:[#allocation75_spill] sm:$0xff] %v7424_v36  ;;  %6248 = vmatprep.subr.msk.bf16.mxu0 %vm404_vm0, %v7424_v36 }
 0x18a   : > { %8889 = vst [vmem:[#allocation63_spill] sm:$0xff] %v7371_v57  ;;  %8890 = vst [vmem:[#allocation64_spill] sm:$0xff] %v7374_v63 }
 0x18b   : > { %8891 = vst [vmem:[#allocation65_spill] sm:$0xff] %v7376_v24  ;;  %v7378_v23 = vpop.f32.mrf.mxu1  ;;  %v5792_v11 = vpop.f32.mrf.mxu0 }
 0x18c   : > { %8892 = vst [vmem:[#allocation66_spill] sm:$0xff] %v7378_v23  ;;  %v7383_v12 = vadd.f32 %v5792_v11, %v7151_v1 }
 0x18d   : > { %v7380_v41 = vpop.f32.mrf.mxu1  ;;  %v1559_v28 = vpop.f32.mrf.mxu0 }
 0x18e   : > { %8893 = vst [vmem:[#allocation67_spill] sm:$0xff] %v7380_v41  ;;  %8894 = vst [vmem:[#allocation68_spill] sm:$0xff] %v7383_v12  ;;  %v7388_v9 = vadd.f32 %v1559_v28, %v7154_v8 }
 0x18f   : > { %v7385_v31 = vpop.f32.mrf.mxu1  ;;  %v5793_v46 = vpop.f32.mrf.mxu0 }
 0x190   : > { %8895 = vst [vmem:[#allocation69_spill] sm:$0xff] %v7385_v31  ;;  %8896 = vst [vmem:[#allocation70_spill] sm:$0xff] %v7388_v9  ;;  %v7393_v62 = vadd.f32 %v5793_v46, %v7160_v32  ;;  %v8901_v46 = vmov 0.0  }
 0x191   : > { %v7390_v57 = vpop.f32.mrf.mxu1  ;;  %v7395_v4 = vpop.f32.mrf.mxu0  ;;  %2631 = vst.msk [vmem:[#allocation2 + $0x10] sm:$0x3] %vm2630_vm5, %v8901_v46  ;;  %2635 = vst.msk [vmem:[#allocation2 + $0x1a8] sm:$0x3] %vm2630_vm5, %v8901_v46 }
 0x192   : > { %8897 = vst [vmem:[#allocation71_spill] sm:$0xff] %v7390_v57  ;;  %8898 = vst [vmem:[#allocation72_spill] sm:$0xff] %v7393_v62 }
 0x193   : > { %8899 = vst [vmem:[#allocation73_spill] sm:$0xff] %v7395_v4  ;;  %v7397_v23 = vpop.f32.mrf.mxu1  ;;  %v5832_v41 = vpop.f32.mrf.mxu0 }
 0x194   : > { %8900 = vst [vmem:[#allocation74_spill] sm:$0xff] %v7397_v23 }
 0x195   : > { %v5866_v63 = vpop.f32.mrf.mxu1  ;;  %v1986_v1 = vpop.f32.mrf.mxu0 }
 0x197   : > { %v7399_v11 = vpop.f32.mrf.mxu1  ;;  %v5833_v12 = vpop.f32.mrf.mxu0 }
 0x199   : > { %v7401_v31 = vpop.f32.mrf.mxu1  ;;  %v1989_v8 = vpop.f32.mrf.mxu0 }
 0x19b   : > { %v7403_v28 = vpop.f32.mrf.mxu0  ;;  %v7405_v9 = vpop.f32.mrf.mxu1 }
 0x19d   : > { %v7407_v57 = vpop.f32.mrf.mxu0  ;;  %v7413_v23 = vpop.f32.mrf.mxu1 }
 0x19f   : > { %v7409_v32 = vpop.f32.mrf.mxu0  ;;  %v7419_v24 = vpop.f32.mrf.mxu1 }
 0x1a1   : > { %v7415_v62 = vpop.f32.mrf.mxu0  ;;  %v7432_v46 = vpop.f32.mrf.mxu1 }
 0x1a3   : > { %v7417_v4 = vpop.f32.mrf.mxu0  ;;  %v7438_v38 = vpop.f32.mrf.mxu1 }
 0x1a5   : > { %v7426_v30 = vpop.f32.mrf.mxu0  ;;  %v7444_v58 = vpop.f32.mrf.mxu1 }
 0x1a7   : > { %v7430_v48 = vpop.f32.mrf.mxu0  ;;  %v7450_v36 = vpop.f32.mrf.mxu1 }
 0x1a8   : > { %8909 = vst [vmem:[#allocation82_spill] sm:$0xff] %v7450_v36 }
 0x1a9   : > { %v7434_v2 = vpop.f32.mrf.mxu0 }
 0x1aa   : > { %8903 = vst [vmem:[#allocation76_spill] sm:$0xff] %v7434_v2  ;;  %v7456_v2 = vpop.f32.mrf.mxu1 }
 0x1ab   : > { %v7436_v61 = vpop.f32.mrf.mxu0  ;;  %8912 = vst [vmem:[#allocation85_spill] sm:$0xff] %v7456_v2 }
 0x1ac   : > { %8904 = vst [vmem:[#allocation77_spill] sm:$0xff] %v7436_v61 }
 0x1ad   : > { %v7440_v20 = vpop.f32.mrf.mxu0 }
 0x1ae   : > { %8905 = vst [vmem:[#allocation78_spill] sm:$0xff] %v7440_v20  ;;  %v7462_v20 = vpop.f32.mrf.mxu1 }
 0x1af   : > { %v7442_v3 = vpop.f32.mrf.mxu0 }
 0x1b0   : > { %8906 = vst [vmem:[#allocation79_spill] sm:$0xff] %v7442_v3 }
 0x1b1   : > { %v7446_v14 = vpop.f32.mrf.mxu0 }
 0x1b2   : > { %8907 = vst [vmem:[#allocation80_spill] sm:$0xff] %v7446_v14  ;;  %v7468_v14 = vpop.f32.mrf.mxu1 }
 0x1b3   : > { %v7448_v59 = vpop.f32.mrf.mxu0  ;;  %8917 = vst [vmem:[#allocation90_spill] sm:$0xff] %v7468_v14 }
 0x1b4   : > { %8908 = vst [vmem:[#allocation81_spill] sm:$0xff] %v7448_v59 }
 0x1b5   : > { %v7452_v35 = vpop.f32.mrf.mxu0 }
 0x1b6   : > { %8910 = vst [vmem:[#allocation83_spill] sm:$0xff] %v7452_v35  ;;  %v7474_v35 = vpop.f32.mrf.mxu1 }
 0x1b7   : > { %v7454_v19 = vpop.f32.mrf.mxu0  ;;  %8920 = vst [vmem:[#allocation93_spill] sm:$0xff] %v7474_v35 }
 0x1b8   : > { %8911 = vst [vmem:[#allocation84_spill] sm:$0xff] %v7454_v19 }
 0x1b9   : > { %v7458_v61 = vpop.f32.mrf.mxu0 }
 0x1ba   : > { %8913 = vst [vmem:[#allocation86_spill] sm:$0xff] %v7458_v61  ;;  %v7480_v61 = vpop.f32.mrf.mxu1 }
 0x1bb   : > { %v7460_v39 = vpop.f32.mrf.mxu0  ;;  %8923 = vst [vmem:[#allocation96_spill] sm:$0xff] %v7480_v61 }
 0x1bc   : > { %8914 = vst [vmem:[#allocation87_spill] sm:$0xff] %v7460_v39  ;;  %v7490_v14 = vpop.f32.mrf.mxu1 }
 0x1bd   : > { %v7464_v3 = vpop.f32.mrf.mxu0 }
 0x1be   : > { %8915 = vst [vmem:[#allocation88_spill] sm:$0xff] %v7464_v3  ;;  %v1347_v3 = vadd.f32 %v7028_v5, %v7031_v56  ;;  %v1789_v5 = vadd.f32 %v7172_v34, %v7175_v40  ;;  %v7513_v34 = vld [vmem:[%s8789_s2] ss:$0 sm:$0xff] }
 0x1bf   : > { %v7466_v26 = vpop.f32.mrf.mxu0 }
 0x1c0   : > { %8916 = vst [vmem:[#allocation89_spill] sm:$0xff] %v7466_v26 }
 0x1c1   : > { %v7470_v59 = vpop.f32.mrf.mxu0 }
 0x1c2   : > { %8918 = vst [vmem:[#allocation91_spill] sm:$0xff] %v7470_v59  ;;  %v1788_v59 = vadd.f32 %v7162_v37, %v7165_v13 }
 0x1c3   : > { %v7472_v36 = vpop.f32.mrf.mxu0 }
 0x1c4   : > { %8919 = vst [vmem:[#allocation92_spill] sm:$0xff] %v7472_v36  ;;  %v1575_v36 = vadd.f32 %v7177_v45, %v1347_v3  ;;  %v2116_v45 = vadd.f32 %v5833_v12, %v1789_v5  ;;  %v1351_v3 = vadd.f32 %v7046_v43, %v7049_v15  ;;  %v1790_v15 = vadd.f32 %v7258_v25, %v7261_v49 }
 0x1c5   : > { %v7476_v19 = vpop.f32.mrf.mxu0 }
 0x1c6   : > { %8921 = vst [vmem:[#allocation94_spill] sm:$0xff] %v7476_v19  ;;  %v2115_v19 = vadd.f32 %v5832_v41, %v1788_v59  ;;  %v1787_v37 = vadd.f32 %v7179_v60, %v1575_v36 }
 0x1c7   : > { %v7478_v2 = vpop.f32.mrf.mxu0 }
 0x1c8   : > { %8922 = vst [vmem:[#allocation95_spill] sm:$0xff] %v7478_v2  ;;  %v1786_v2 = vadd.f32 %v7167_v7, %v7170_v42  ;;  %v1792_v7 = vadd.f32 %v7253_v47, %v7256_v53  ;;  %v2114_v42 = vadd.f32 %v1989_v8, %v1787_v37  ;;  %v2322_v47 = vadd.f32 %v7401_v31, %v2116_v45 }
 0x1c9   : > { %v7482_v39 = vpop.f32.mrf.mxu0 }
 0x1ca   : > { %8924 = vst [vmem:[#allocation97_spill] sm:$0xff] %v7482_v39  ;;  %v2113_v56 = vadd.f32 %v1986_v1, %v1786_v2  ;;  %v2321_v39 = vadd.f32 %v5866_v63, %v2115_v19  ;;  %v1579_v19 = vadd.f32 %v7268_v52, %v1351_v3  ;;  %v2119_v41 = vadd.f32 %v7403_v28, %v1792_v7 }
 0x1cb   : > { %v7486_v26 = vpop.f32.mrf.mxu0  ;;  %v1793_v63 = vadd.f32 %v7263_v54, %v7266_v0  ;;  %v2320_v12 = vadd.f32 %v7405_v9, %v2114_v42  ;;  %v1794_v42 = vadd.f32 %v7277_v51, %v7283_v44 }
 0x1cc   : > { %8925 = vst [vmem:[#allocation98_spill] sm:$0xff] %v7486_v26  ;;  %v7501_v26 = vpop.f32.mrf.mxu1  ;;  %v2319_v40 = vadd.f32 %v7399_v11, %v2113_v56  ;;  %v1791_v25 = vadd.f32 %v7270_v18, %v1579_v19  ;;  %v2325_v49 = vadd.f32 %v7413_v23, %v2119_v41  ;;  %v1796_v56 = vadd.f32 %v7272_v10, %v7275_v6 }
 0x1cd   : > { %v7493_v35 = vpop.f32.mrf.mxu0  ;;  %v2120_v5 = vadd.f32 %v7409_v32, %v1793_v63  ;;  %v2121_v51 = vadd.f32 %v7426_v30, %v1794_v42  ;;  %v677_v41 = vadd.f32 %v6945_v22, %v6943_v21  ;;  %v8927_v63 = vld [vmem:[#allocation25_spill] sm:$0xff]  ;;  %v8929_v22 = vld [vmem:[#allocation35_spill] sm:$0xff] }
 0x1ce   : > { %v7516_v60 = vpop.f32.mrf.mxu1  ;;  %v2118_v37 = vadd.f32 %v7415_v62, %v1791_v25 }
 0x1cf   : > { %v7497_v61 = vpop.f32.mrf.mxu0  ;;  %v2326_v6 = vadd.f32 %v7432_v46, %v2120_v5 }
 0x1d0   : > { %v7528_v52 = vpop.f32.mrf.mxu1 }
 0x1d1   : > { %v7504_v13 = vpop.f32.mrf.mxu0 }
 0x1d2   : > { %v7542_v45 = vpop.f32.mrf.mxu1 }
 0x1d3   : > { %v5900_v59 = vpop.f32.mrf.mxu0 }
 0x1d4   : > { %v2527_v2 = vadd.f32 %v5900_v59, %v2321_v39  ;;  %v2117_v39 = vadd.f32 %v7407_v57, %v1790_v15  ;;  %v1355_v57 = vadd.f32 %v7064_v29, %v7067_v17  ;;  %v2123_v17 = vadd.f32 %v7417_v4, %v1796_v56 }
 0x1d5   : > { %v2398_v43 = vpop.f32.mrf.mxu0 }
 0x1d6   : > { %v2566_v53 = vadd.f32 %v7513_v34, %v2527_v2  ;;  %v2525_v36 = vadd.f32 %v2398_v43, %v2319_v40  ;;  %v2323_v23 = vadd.f32 %v7419_v24, %v2117_v39  ;;  %v1583_v29 = vadd.f32 %v7292_v55, %v1355_v57  ;;  %v7557_v55 = vpop.f32.mrf.mxu1  ;;  %v8936_v57 = vld [vmem:[#allocation41_spill] sm:$0xff] }
 0x1d7   : > { %v5901_v1 = vpop.f32.mrf.mxu0  ;;  %v1797_v40 = vadd.f32 %v7287_v50, %v7290_v16  ;;  %v2324_v2 = vadd.f32 %v7438_v38, %v2118_v37  ;;  %v2329_v50 = vadd.f32 %v7444_v58, %v2123_v17  ;;  %v8931_v58 = vld [vmem:[#allocation76_spill] sm:$0xff]  ;;  %v8937_v37 = vld [vmem:[#allocation77_spill] sm:$0xff] }
 0x1d8   : > { %v2598_v11 = vmax.f32 %v2566_v53, 0.0  ;;  %v2564_v8 = vadd.f32 %v7513_v34, %v2525_v36  ;;  %v2528_v28 = vadd.f32 %v5901_v1, %v2322_v47  ;;  %v1795_v43 = vadd.f32 %v7294_v27, %v1583_v29  ;;  %v8926_v53 = vld [vmem:[#allocation19_spill] sm:$0xff]  ;;  %v8930_v27 = vld [vmem:[#allocation34_spill] sm:$0xff] }
 0x1d9   : > { %v2401_v31 = vpop.f32.mrf.mxu0  ;;  %v2124_v38 = vadd.f32 %v7430_v48, %v1797_v40  ;;  %v7570_v36 = vadd.f32 %v8926_v53, %v6971_v33  ;;  %v1800_v1 = vadd.f32 %v8930_v27, %v8929_v22  ;;  %v8932_v48 = vld [vmem:[#allocation82_spill] sm:$0xff]  ;;  %v8946_v22 = vld [vmem:[#allocation79_spill] sm:$0xff] }
 0x1da   : > { %2672 = vst.msk [vmem:[#allocation2 + $0x31] sm:$0xff] %vm355_vm1, %v2598_v11  ;;  %v2596_v54 = vmax.f32 %v2564_v8, 0.0  ;;  %v2567_v0 = vadd.f32 %v7513_v34, %v2528_v28  ;;  %v2526_v9 = vadd.f32 %v2401_v31, %v2320_v12  ;;  %v8928_v12 = vld [vmem:[#allocation24_spill] sm:$0xff]  ;;  %v2122_v39 = vadd.f32 %v8931_v58, %v1795_v43  ;;  %v7578_v28 = vpop.f32.mrf.mxu1  ;;  %v8933_v31 = vld [vmem:[#allocation26_spill] sm:$0xff] }
 0x1db   : > { %v5904_v18 = vpop.f32.mrf.mxu0  ;;  %v1359_v21 = vadd.f32 %v8928_v12, %v8927_v63  ;;  %v2327_v8 = vadd.f32 %v8932_v48, %v2121_v51  ;;  %v922_v5 = vadd.f32 %v8933_v31, %v677_v41  ;;  %v8945_v12 = vld [vmem:[#allocation75_spill] sm:$0xff]  ;;  %v7619_v48 = vld [vmem:[%s8790_s3 + $0x1c] sm:$0xf] }
 0x1dc   : > { %2670 = vst.msk [vmem:[#allocation2 + $0x19] sm:$0xff] %vm355_vm1, %v2596_v54  ;;  %v2599_v32 = vmax.f32 %v2567_v0, 0.0  ;;  %v2565_v3 = vadd.f32 %v7513_v34, %v2526_v9  ;;  %v2531_v7 = vadd.f32 %v5904_v18, %v2325_v49  ;;  %v8934_v54 = vld [vmem:[#allocation37_spill] sm:$0xff]  ;;  %v8935_v0 = vld [vmem:[#allocation36_spill] sm:$0xff]  ;;  %v2127_v18 = vadd.f32 %v8937_v37, %v1800_v1 }
 0x1dd   : > { %v2414_v10 = vpop.f32.mrf.mxu0  ;;  %v1798_v9 = vadd.f32 %v8935_v0, %v8934_v54  ;;  %v1587_v56 = vadd.f32 %v8936_v57, %v1359_v21  ;;  %v3444_v21 = vsel %vm404_vm0, %v8945_v12, 0  ;;  %v8950_v54 = vld [vmem:[#allocation80_spill] sm:$0xff]  ;;  %v8951_v57 = vld [vmem:[#allocation93_spill] sm:$0xff] }
 0x1de   : > { %2673 = vst.msk [vmem:[#allocation2 + $0x39] sm:$0xff] %vm355_vm1, %v2599_v32  ;;  %v2597_v24 = vmax.f32 %v2565_v3, 0.0  ;;  %v2570_v62 = vadd.f32 %v7513_v34, %v2531_v7  ;;  %v2529_v59 = vadd.f32 %v2414_v10, %v2323_v23  ;;  %v8938_v32 = vld [vmem:[#allocation85_spill] sm:$0xff]  ;;  %v8939_v10 = vld [vmem:[#allocation39_spill] sm:$0xff] }
 0x1df   : > { %v5905_v19 = vpop.f32.mrf.mxu0  ;;  %v2330_v3 = vadd.f32 %v8938_v32, %v2124_v38  ;;  %v8952_v32 = vld [vmem:[#allocation46_spill] sm:$0xff] }
 0x1e0   : > { %2671 = vst.msk [vmem:[#allocation2 + $0x21] sm:$0xff] %vm355_vm1, %v2597_v24  ;;  %v2602_v44 = vmax.f32 %v2570_v62, 0.0  ;;  %v2568_v4 = vadd.f32 %v7513_v34, %v2529_v59  ;;  %v2532_v46 = vadd.f32 %v5905_v19, %v2326_v6  ;;  %v8940_v6 = vld [vmem:[#allocation38_spill] sm:$0xff]  ;;  %v2328_v62 = vadd.f32 %v7462_v20, %v2122_v39 }
 0x1e1   : > { %v2417_v16 = vpop.f32.mrf.mxu0  ;;  %v1801_v24 = vadd.f32 %v8940_v6, %v8939_v10  ;;  %v8941_v59 = vld [vmem:[#allocation78_spill] sm:$0xff]  ;;  %v2706_v38 = vld [vmem:[#allocation2 + $0x30] sm:$0xff] }
 0x1e2   : > { %2676 = vst.msk [vmem:[#allocation2 + $0x61] sm:$0xff] %vm355_vm1, %v2602_v44  ;;  %v2600_v30 = vmax.f32 %v2568_v4, 0.0  ;;  %v2571_v15 = vadd.f32 %v7513_v34, %v2532_v46  ;;  %v2530_v47 = vadd.f32 %v2417_v16, %v2324_v2  ;;  %v2125_v40 = vadd.f32 %v8941_v59, %v1798_v9  ;;  %v8942_v44 = vld [vmem:[#allocation40_spill] sm:$0xff]  ;;  %v7596_v46 = vpop.f32.mrf.mxu1 }
 0x1e3   : > { %v5908_v11 = vpop.f32.mrf.mxu0  ;;  %v2704_v19 = vld [vmem:[#allocation2 + $0x18] sm:$0xff]  ;;  %v3144_v4 = vsel %vm404_vm0, %v8942_v44, 0  ;;  %v2128_v27 = vadd.f32 %v8946_v22, %v1801_v24 }
 0x1e4   : > { %2674 = vst.msk [vmem:[#allocation2 + $0x49] sm:$0xff] %vm355_vm1, %v2600_v30  ;;  %v2603_v25 = vmax.f32 %v2571_v15, 0.0  ;;  %v2569_v49 = vadd.f32 %v7513_v34, %v2530_v47  ;;  %v2535_v33 = vadd.f32 %v5908_v11, %v2329_v50  ;;  %v8943_v30 = vld [vmem:[#allocation42_spill] sm:$0xff]  ;;  %v7614_v11 = vld [vmem:[%s8790_s3 + $0x10] sm:$0xf]  ;;  %v7630_v37 = vpop.f32.mrf.mxu1  ;;  %v8956_v24 = vld [vmem:[#allocation96_spill] sm:$0xff] }
 0x1e5   : > { %v2430_v23 = vpop.f32.mrf.mxu0  ;;  %v2707_v17 = vld [vmem:[#allocation2 + $0x38] sm:$0xff]  ;;  %v1799_v20 = vadd.f32 %v8943_v30, %v1587_v56  ;;  %v8944_v15 = vld [vmem:[#allocation90_spill] sm:$0xff]  ;;  %v2331_v56 = vadd.f32 %v8951_v57, %v2125_v40 }
 0x1e6   : > { %2677 = vst.msk [vmem:[#allocation2 + $0x69] sm:$0xff] %vm355_vm1, %v2603_v25  ;;  %v2601_v7 = vmax.f32 %v2569_v49, 0.0  ;;  %v2574_v42 = vadd.f32 %v7513_v34, %v2535_v33  ;;  %v2533_v29 = vadd.f32 %v2430_v23, %v2327_v8  ;;  %v2333_v47 = vadd.f32 %v8944_v15, %v2127_v18  ;;  %v8947_v8 = vld [vmem:[#allocation27_spill] sm:$0xff]  ;;  %v8948_v49 = vld [vmem:[#allocation44_spill] sm:$0xff] }
 0x1e7   : > { %v5909_v2 = vpop.f32.mrf.mxu0  ;;  %v2705_v51 = vld [vmem:[#allocation2 + $0x20] sm:$0xff]  ;;  %v7602_v63 = vpack.c.bf16 %v2707_v17, %v2706_v38  ;;  %v1363_v25 = vadd.f32 %v8947_v8, %v922_v5  ;;  %v8949_v33 = vld [vmem:[#allocation43_spill] sm:$0xff]  ;;  %v2126_v0 = vadd.f32 %v8950_v54, %v1799_v20  ;;  %v8962_v8 = vld [vmem:[#allocation84_spill] sm:$0xff] }
 0x1e8   : > { %2675 = vst.msk [vmem:[#allocation2 + $0x51] sm:$0xff] %vm355_vm1, %v2601_v7  ;;  %v2606_v41 = vmax.f32 %v2574_v42, 0.0  ;;  %v2572_v43 = vadd.f32 %v7513_v34, %v2533_v29  ;;  %v2536_v50 = vadd.f32 %v5909_v2, %v2330_v3  ;;  %v2739_v16 = vpack.c.bf16 %v2705_v51, %v2704_v19  ;;  %v8953_v3 = vld [vmem:[#allocation45_spill] sm:$0xff]  ;;  %v8957_v51 = vld [vmem:[#allocation28_spill] sm:$0xff] }
 0x1e9   : > { %v2433_v53 = vpop.f32.mrf.mxu0  ;;  %v1804_v31 = vadd.f32 %v8949_v33, %v8948_v49  ;;  %v1802_v7 = vadd.f32 %v8953_v3, %v8952_v32  ;;  %v8954_v42 = vld [vmem:[#allocation49_spill] sm:$0xff]  ;;  %v926_v44 = vadd.f32 %v8957_v51, %v7570_v36 }
 0x1ea   : > { %2680 = vst.msk [vmem:[#allocation2 + $0x91] sm:$0xff] %vm355_vm1, %v2606_v41  ;;  %v2604_v1 = vmax.f32 %v2572_v43, 0.0  ;;  %v2575_v58 = vadd.f32 %v7513_v34, %v2536_v50  ;;  %v2534_v39 = vadd.f32 %v2433_v53, %v2328_v62  ;;  %5932 = vmatprep.mubr.msk.bf16.mxu1 %vm355_vm1, %v2739_v16  ;;  %5967 = vmatmul.mubr.msk.bf16.vlgmr.msra.gmra.mxu0 %vm355_vm1, %v2739_v16  ;;  %v8955_v17 = vld [vmem:[#allocation81_spill] sm:$0xff]  ;;  %v8959_v41 = vld [vmem:[#allocation47_spill] sm:$0xff] }
 0x1eb   : > { %v5912_v9 = vpop.f32.mrf.mxu0  ;;  %5933 = vmatmul.mubr.msk.bf16.vlgmr.msra.gmra.mxu1 %vm355_vm1, %v7602_v63  ;;  %5970 = vmatprep.mubr.msk.bf16.mxu0 %vm355_vm1, %v7602_v63  ;;  %v1591_v29 = vadd.f32 %v8954_v42, %v1363_v25  ;;  %v2131_v10 = vadd.f32 %v8955_v17, %v1804_v31  ;;  %v2334_v62 = vadd.f32 %v8956_v24, %v2128_v27  ;;  %v8960_v16 = vld [vmem:[#allocation83_spill] sm:$0xff]  ;;  %v2708_v20 = vld [vmem:[#allocation2 + $0x48] sm:$0xff]  ;;  %v2710_v36 = vld [vmem:[#allocation2 + $0x60] sm:$0xff] }
 0x1ec   : > { %2678 = vst.msk [vmem:[#allocation2 + $0x79] sm:$0xff] %vm355_vm1, %v2604_v1  ;;  %v2607_v18 = vmax.f32 %v2575_v58, 0.0  ;;  %v2573_v5 = vadd.f32 %v7513_v34, %v2534_v39  ;;  %v2539_v23 = vadd.f32 %v5912_v9, %v2333_v47  ;;  %5999 = vmatpush3.bf16.msra.mxu1 %v3144_v4  ;;  %6033 = vmatpush3.bf16.msra.mxu0 %v3444_v21  ;;  %v8958_v4 = vld [vmem:[#allocation48_spill] sm:$0xff]  ;;  %v7651_v47 = vpop.f32.mrf.mxu1  ;;  %v8961_v27 = vld [vmem:[#allocation50_spill] sm:$0xff]  ;;  %v8963_v54 = vld [vmem:[#allocation29_spill] sm:$0xff] }
 0x1ed   : > { %v2446_v6 = vpop.f32.mrf.mxu0  ;;  %6249 = vmatprep.subr.msk.bf16.mxu1 %vm404_vm0, %v7614_v11  ;;  %6250 = vmatprep.subr.msk.bf16.mxu0 %vm404_vm0, %v7619_v48  ;;  %v2711_v19 = vld [vmem:[#allocation2 + $0x68] sm:$0xff]  ;;  %v1805_v43 = vadd.f32 %v8959_v41, %v8958_v4  ;;  %v2332_v50 = vadd.f32 %v7490_v14, %v2126_v0  ;;  %v2129_v38 = vadd.f32 %v8960_v16, %v1802_v7  ;;  %v8965_v9 = vld [vmem:[#allocation51_spill] sm:$0xff]  ;;  %v8968_v17 = vld [vmem:[#allocation21_spill] sm:$0xff] }
 0x1ee   : > { %2681 = vst.msk [vmem:[#allocation2 + $0x99] sm:$0xff] %vm355_vm1, %v2607_v18  ;;  %v2605_v59 = vmax.f32 %v2573_v5, 0.0  ;;  %v2578_v40 = vadd.f32 %v7513_v34, %v2539_v23  ;;  %v2537_v2 = vadd.f32 %v2446_v6, %v2331_v56  ;;  %v1803_v1 = vadd.f32 %v8961_v27, %v1591_v29  ;;  %v8966_v56 = vld [vmem:[#allocation86_spill] sm:$0xff]  ;;  %v7677_v32 = vpop.f32.mrf.mxu1  ;;  %v8967_v29 = vld [vmem:[#allocation20_spill] sm:$0xff]  ;;  %v8970_v24 = vld [vmem:[#allocation53_spill] sm:$0xff] }
 0x1ef   : > { %v5913_v30 = vpop.f32.mrf.mxu0  ;;  %v2709_v15 = vld [vmem:[#allocation2 + $0x50] sm:$0xff]  ;;  %v2337_v14 = vadd.f32 %v7501_v26, %v2131_v10  ;;  %v7659_v39 = vpack.c.bf16 %v2711_v19, %v2710_v36  ;;  %v2132_v25 = vadd.f32 %v8962_v8, %v1805_v43  ;;  %v1367_v0 = vadd.f32 %v8963_v54, %v926_v44  ;;  %v8964_v26 = vld [vmem:[#allocation52_spill] sm:$0xff]  ;;  %v8969_v6 = vld [vmem:[#allocation54_spill] sm:$0xff] }
 0x1f0   : > { %2679 = vst.msk [vmem:[#allocation2 + $0x81] sm:$0xff] %vm355_vm1, %v2605_v59  ;;  %v2610_v53 = vmax.f32 %v2578_v40, 0.0  ;;  %v2576_v12 = vadd.f32 %v7513_v34, %v2537_v2  ;;  %v2540_v21 = vadd.f32 %v5913_v30, %v2334_v62  ;;  %v7655_v22 = vpack.c.bf16 %v2709_v15, %v2708_v20  ;;  %v8971_v59 = vld [vmem:[#allocation57_spill] sm:$0xff]  ;;  %v8972_v2 = vld [vmem:[#allocation87_spill] sm:$0xff] }
 0x1f1   : > { %v2449_v58 = vpop.f32.mrf.mxu0  ;;  %v1808_v57 = vadd.f32 %v8965_v9, %v8964_v26  ;;  %v2130_v18 = vadd.f32 %v8966_v56, %v1803_v1  ;;  %v2335_v23 = vadd.f32 %v7516_v60, %v2129_v38  ;;  %v709_v10 = vadd.f32 %v8968_v17, %v8967_v29  ;;  %v8974_v38 = vld [vmem:[#allocation56_spill] sm:$0xff]  ;;  %v8975_v30 = vld [vmem:[#allocation55_spill] sm:$0xff] }
 0x1f2   : > { %2684 = vst.msk [vmem:[#allocation2 + $0xc1] sm:$0xff] %vm355_vm1, %v2610_v53  ;;  %v2608_v49 = vmax.f32 %v2576_v12, 0.0  ;;  %v2579_v33 = vadd.f32 %v7513_v34, %v2540_v21  ;;  %v2538_v31 = vadd.f32 %v2449_v58, %v2332_v50  ;;  %5936 = vmatprep.mubr.msk.bf16.mxu1 %vm355_vm1, %v7655_v22  ;;  %5971 = vmatmul.mubr.msk.bf16.gmra.mxu0 %vm355_vm1, %v7655_v22  ;;  %v8973_v50 = vld [vmem:[#allocation30_spill] sm:$0xff]  ;;  %v8976_v53 = vld [vmem:[#allocation88_spill] sm:$0xff] }
 0x1f3   : > { %v5916_v5 = vpop.f32.mrf.mxu0  ;;  %5937 = vmatmul.mubr.msk.bf16.gmra.mxu1 %vm355_vm1, %v7659_v39  ;;  %5974 = vmatprep.mubr.msk.bf16.mxu0 %vm355_vm1, %v7659_v39  ;;  %v1806_v62 = vadd.f32 %v8970_v24, %v8969_v6  ;;  %v1595_v40 = vadd.f32 %v8971_v59, %v1367_v0  ;;  %v2135_v19 = vadd.f32 %v8972_v2, %v1808_v57  ;;  %v2712_v36 = vld [vmem:[#allocation2 + $0x78] sm:$0xff]  ;;  %v8978_v0 = vld [vmem:[#allocation89_spill] sm:$0xff]  ;;  %v8983_v59 = vld [vmem:[#allocation22_spill] sm:$0xff] }
 0x1f4   : > { %2682 = vst.msk [vmem:[#allocation2 + $0xa9] sm:$0xff] %vm355_vm1, %v2608_v49  ;;  %v2611_v3 = vmax.f32 %v2579_v33, 0.0  ;;  %v2577_v7 = vadd.f32 %v7513_v34, %v2538_v31  ;;  %v2543_v42 = vadd.f32 %v5916_v5, %v2337_v14  ;;  %v2338_v60 = vadd.f32 %v7528_v52, %v2132_v25  ;;  %v7695_v52 = vpop.f32.mrf.mxu1  ;;  %v2714_v25 = vld [vmem:[#allocation2 + $0x90] sm:$0xff]  ;;  %v8977_v49 = vld [vmem:[#allocation58_spill] sm:$0xff] }
 0x1f5   : > { %v2462_v51 = vpop.f32.mrf.mxu0  ;;  %v2715_v43 = vld [vmem:[#allocation2 + $0x98] sm:$0xff]  ;;  %v930_v16 = vadd.f32 %v8973_v50, %v709_v10  ;;  %v1809_v20 = vadd.f32 %v8975_v30, %v8974_v38  ;;  %v2336_v15 = vadd.f32 %v7542_v45, %v2130_v18  ;;  %v2133_v12 = vadd.f32 %v8976_v53, %v1806_v62  ;;  %v8979_v18 = vld [vmem:[#allocation31_spill] sm:$0xff] }
 0x1f6   : > { %2685 = vst.msk [vmem:[#allocation2 + $0xc9] sm:$0xff] %vm355_vm1, %v2611_v3  ;;  %v2609_v44 = vmax.f32 %v2577_v7, 0.0  ;;  %v2582_v4 = vadd.f32 %v7513_v34, %v2543_v42  ;;  %v2541_v41 = vadd.f32 %v2462_v51, %v2335_v23  ;;  %v1807_v33 = vadd.f32 %v8977_v49, %v1595_v40  ;;  %v8981_v23 = vld [vmem:[#allocation59_spill] sm:$0xff]  ;;  %v7721_v10 = vpop.f32.mrf.mxu1  ;;  %v8986_v51 = vld [vmem:[#allocation61_spill] sm:$0xff] }
 0x1f7   : > { %v5917_v21 = vpop.f32.mrf.mxu0  ;;  %v2713_v27 = vld [vmem:[#allocation2 + $0x80] sm:$0xff]  ;;  %v2341_v45 = vadd.f32 %v7557_v55, %v2135_v19  ;;  %v7703_v54 = vpack.c.bf16 %v2715_v43, %v2714_v25  ;;  %v2136_v26 = vadd.f32 %v8978_v0, %v1809_v20  ;;  %v1371_v5 = vadd.f32 %v8979_v18, %v930_v16  ;;  %v8980_v55 = vld [vmem:[#allocation60_spill] sm:$0xff]  ;;  %v8982_v7 = vld [vmem:[#allocation91_spill] sm:$0xff] }
 0x1f8   : > { %2683 = vst.msk [vmem:[#allocation2 + $0xb1] sm:$0xff] %vm355_vm1, %v2609_v44  ;;  %v2614_v1 = vmax.f32 %v2582_v4, 0.0  ;;  %v2580_v14 = vadd.f32 %v7513_v34, %v2541_v41  ;;  %v2544_v58 = vadd.f32 %v5917_v21, %v2338_v60  ;;  %v7699_v8 = vpack.c.bf16 %v2713_v27, %v2712_v36  ;;  %v8984_v40 = vld [vmem:[#allocation23_spill] sm:$0xff]  ;;  %v8985_v19 = vld [vmem:[#allocation62_spill] sm:$0xff]  ;;  %v8987_v44 = vld [vmem:[#allocation65_spill] sm:$0xff] }
 0x1f9   : > { %v2465_v31 = vpop.f32.mrf.mxu0  ;;  %v1812_v3 = vadd.f32 %v8981_v23, %v8980_v55  ;;  %v2134_v42 = vadd.f32 %v8982_v7, %v1807_v33  ;;  %v2339_v17 = vadd.f32 %v7578_v28, %v2133_v12  ;;  %v725_v2 = vadd.f32 %v8984_v40, %v8983_v59  ;;  %v8988_v41 = vld [vmem:[#allocation92_spill] sm:$0xff]  ;;  %v8991_v21 = vld [vmem:[#allocation63_spill] sm:$0xff] }
 0x1fa   : > { %2688 = vst.msk [vmem:[#allocation2 + $0xf1] sm:$0xff] %vm355_vm1, %v2614_v1  ;;  %v2612_v9 = vmax.f32 %v2580_v14, 0.0  ;;  %v2583_v57 = vadd.f32 %v7513_v34, %v2544_v58  ;;  %v2542_v56 = vadd.f32 %v2465_v31, %v2336_v15  ;;  %5940 = vmatprep.mubr.msk.bf16.mxu1 %vm355_vm1, %v7699_v8  ;;  %5975 = vmatmul.mubr.msk.bf16.gmra.mxu0 %vm355_vm1, %v7699_v8  ;;  %v8989_v15 = vld [vmem:[#allocation32_spill] sm:$0xff]  ;;  %v8992_v1 = vld [vmem:[#allocation94_spill] sm:$0xff] }
 0x1fb   : > { %v5920_v29 = vpop.f32.mrf.mxu0  ;;  %5941 = vmatmul.mubr.msk.bf16.gmra.mxu1 %vm355_vm1, %v7703_v54  ;;  %5978 = vmatprep.mubr.msk.bf16.mxu0 %vm355_vm1, %v7703_v54  ;;  %v1810_v60 = vadd.f32 %v8986_v51, %v8985_v19  ;;  %v1599_v4 = vadd.f32 %v8987_v44, %v1371_v5  ;;  %v2139_v43 = vadd.f32 %v8988_v41, %v1812_v3  ;;  %v8990_v12 = vld [vmem:[#allocation64_spill] sm:$0xff]  ;;  %v2716_v25 = vld [vmem:[#allocation2 + $0xa8] sm:$0xff]  ;;  %v8994_v5 = vld [vmem:[#allocation95_spill] sm:$0xff] }
 0x1fc   : > { %2686 = vst.msk [vmem:[#allocation2 + $0xd9] sm:$0xff] %vm355_vm1, %v2612_v9  ;;  %v2615_v6 = vmax.f32 %v2583_v57, 0.0  ;;  %v2581_v24 = vadd.f32 %v7513_v34, %v2542_v56  ;;  %v2547_v62 = vadd.f32 %v5920_v29, %v2341_v45  ;;  %v2342_v28 = vadd.f32 %v7596_v46, %v2136_v26  ;;  %v5894_v46 = vpop.f32.mrf.mxu1  ;;  %v2718_v26 = vld [vmem:[#allocation2 + $0xc0] sm:$0xff]  ;;  %v8993_v9 = vld [vmem:[#allocation66_spill] sm:$0xff] }
 0x1fd   : > { %v2478_v50 = vpop.f32.mrf.mxu0  ;;  %v2719_v20 = vld [vmem:[#allocation2 + $0xc8] sm:$0xff]  ;;  %v934_v53 = vadd.f32 %v8989_v15, %v725_v2  ;;  %v1813_v36 = vadd.f32 %v8991_v21, %v8990_v12  ;;  %v2340_v27 = vadd.f32 %v7630_v37, %v2134_v42  ;;  %v2137_v14 = vadd.f32 %v8992_v1, %v1810_v60  ;;  %v8995_v42 = vld [vmem:[#allocation33_spill] sm:$0xff]  ;;  %v9003_v12 = vld [vmem:[#allocation72_spill] sm:$0xff] }
 0x1fe   : > { %2689 = vst.msk [vmem:[#allocation2 + $0xf9] sm:$0xff] %vm355_vm1, %v2615_v6  ;;  %v2613_v16 = vmax.f32 %v2581_v24, 0.0  ;;  %v2586_v38 = vadd.f32 %v7513_v34, %v2547_v62  ;;  %v2545_v30 = vadd.f32 %v2478_v50, %v2339_v17  ;;  %v1811_v57 = vadd.f32 %v8993_v9, %v1599_v4  ;;  %v8997_v17 = vld [vmem:[#allocation67_spill] sm:$0xff]  ;;  %v8998_v24 = vld [vmem:[#allocation97_spill] sm:$0xff]  ;;  %v2304_v2 = vpop.f32.mrf.mxu1  ;;  %v8999_v44 = vld [vmem:[#allocation70_spill] sm:$0xff] }
 0x1ff   : > { %v5921_v58 = vpop.f32.mrf.mxu0  ;;  %v2717_v49 = vld [vmem:[#allocation2 + $0xb0] sm:$0xff]  ;;  %v2345_v56 = vadd.f32 %v7651_v47, %v2139_v43  ;;  %v7745_v18 = vpack.c.bf16 %v2719_v20, %v2718_v26  ;;  %v2140_v55 = vadd.f32 %v8994_v5, %v1813_v36  ;;  %v1375_v29 = vadd.f32 %v8995_v42, %v934_v53  ;;  %v8996_v47 = vld [vmem:[#allocation68_spill] sm:$0xff]  ;;  %v9000_v4 = vld [vmem:[#allocation69_spill] sm:$0xff] }
 0x200   : > { %2687 = vst.msk [vmem:[#allocation2 + $0xe1] sm:$0xff] %vm355_vm1, %v2613_v16  ;;  %v2618_v33 = vmax.f32 %v2586_v38, 0.0  ;;  %v2584_v45 = vadd.f32 %v7513_v34, %v2545_v30  ;;  %v2548_v31 = vadd.f32 %v5921_v58, %v2342_v28  ;;  %v7741_v0 = vpack.c.bf16 %v2717_v49, %v2716_v25  ;;  %v9001_v43 = vld [vmem:[#allocation73_spill] sm:$0xff]  ;;  %v9002_v28 = vld [vmem:[#allocation98_spill] sm:$0xff]  ;;  %v9004_v21 = vld [vmem:[#allocation71_spill] sm:$0xff]  ;;  %v5895_v49 = vpop.f32.mrf.mxu1 }
 0x201   : > { %v2481_v37 = vpop.f32.mrf.mxu0  ;;  %v1816_v6 = vadd.f32 %v8997_v17, %v8996_v47  ;;  %v2138_v62 = vadd.f32 %v8998_v24, %v1811_v57  ;;  %v2343_v40 = vadd.f32 %v7677_v32, %v2137_v14  ;;  %v1814_v41 = vadd.f32 %v9000_v4, %v8999_v44  ;;  %v2722_v26 = vld [vmem:[#allocation2 + $0xf0] sm:$0xff]  ;;  %v9005_v9 = vld [vmem:[#allocation74_spill] sm:$0xff] }
 0x202   : > { %2692 = vst.msk [vmem:[#allocation2 + $0x121] sm:$0xff] %vm355_vm1, %v2618_v33  ;;  %v2616_v23 = vmax.f32 %v2584_v45, 0.0  ;;  %v2587_v3 = vadd.f32 %v7513_v34, %v2548_v31  ;;  %v2546_v7 = vadd.f32 %v2481_v37, %v2340_v27  ;;  %5944 = vmatprep.mubr.msk.bf16.mxu1 %vm355_vm1, %v7741_v0  ;;  %5979 = vmatmul.mubr.msk.bf16.gmra.mxu0 %vm355_vm1, %v7741_v0 }
 0x203   : > { %v5924_v59 = vpop.f32.mrf.mxu0  ;;  %5945 = vmatmul.mubr.msk.bf16.gmra.mxu1 %vm355_vm1, %v7745_v18  ;;  %5982 = vmatprep.mubr.msk.bf16.mxu0 %vm355_vm1, %v7745_v18  ;;  %v1603_v50 = vadd.f32 %v9001_v43, %v1375_v29  ;;  %v2143_v16 = vadd.f32 %v9002_v28, %v1816_v6  ;;  %v2346_v30 = vadd.f32 %v7695_v52, %v2140_v55  ;;  %v2720_v58 = vld [vmem:[#allocation2 + $0xd8] sm:$0xff] }
 0x204   : > { %2690 = vst.msk [vmem:[#allocation2 + $0x109] sm:$0xff] %vm355_vm1, %v2616_v23  ;;  %v2619_v19 = vmax.f32 %v2587_v3, 0.0  ;;  %v2585_v51 = vadd.f32 %v7513_v34, %v2546_v7  ;;  %v2551_v60 = vadd.f32 %v5924_v59, %v2345_v56  ;;  %v1817_v36 = vadd.f32 %v9004_v21, %v9003_v12  ;;  %v2307_v7 = vpop.f32.mrf.mxu1 }
 0x205   : > { %v2494_v38 = vpop.f32.mrf.mxu0  ;;  %v2723_v53 = vld [vmem:[#allocation2 + $0xf8] sm:$0xff]  ;;  %v2344_v27 = vadd.f32 %v7721_v10, %v2138_v62  ;;  %v2141_v1 = vadd.f32 %v7493_v35, %v1814_v41  ;;  %v1815_v57 = vadd.f32 %v9005_v9, %v1603_v50  ;;  %v2349_v56 = vadd.f32 %v5894_v46, %v2143_v16  ;;  %v3342_v9 = vld [vmem:[#allocation2 + $0x21] sm:$0xff] }
 0x206   : > { %2693 = vst.msk [vmem:[#allocation2 + $0x129] sm:$0xff] %vm355_vm1, %v2619_v19  ;;  %v2617_v32 = vmax.f32 %v2585_v51, 0.0  ;;  %v2590_v20 = vadd.f32 %v7513_v34, %v2551_v60  ;;  %v2549_v15 = vadd.f32 %v2494_v38, %v2343_v40  ;;  %v7781_v10 = vpack.c.bf16 %v2723_v53, %v2722_v26 }
 0x207   : > { %v5925_v14 = vpop.f32.mrf.mxu0  ;;  %v2721_v25 = vld [vmem:[#allocation2 + $0xe0] sm:$0xff]  ;;  %v2144_v35 = vadd.f32 %v7497_v61, %v1817_v36  ;;  %v2142_v3 = vadd.f32 %v7504_v13, %v1815_v57  ;;  %v2347_v61 = vadd.f32 %v2304_v2, %v2141_v1 }
 0x208   : > { %2691 = vst.msk [vmem:[#allocation2 + $0x111] sm:$0xff] %vm355_vm1, %v2617_v32  ;;  %v2622_v52 = vmax.f32 %v2590_v20, 0.0  ;;  %v2588_v33 = vadd.f32 %v7513_v34, %v2549_v15  ;;  %v2552_v45 = vadd.f32 %v5925_v14, %v2346_v30  ;;  %v7778_v31 = vpack.c.bf16 %v2721_v25, %v2720_v58  ;;  %v3340_v14 = vld [vmem:[#allocation2 + $0x9] sm:$0xff]  ;;  %v3344_v57 = vld [vmem:[#allocation2 + $0x39] sm:$0xff] }
 0x209   : > { %v2497_v37 = vpop.f32.mrf.mxu0  ;;  %v2350_v6 = vadd.f32 %v5895_v49, %v2144_v35  ;;  %v2348_v40 = vadd.f32 %v2307_v7, %v2142_v3  ;;  %v2726_v43 = vld [vmem:[#allocation2 + $0x120] sm:$0xff]  ;;  %v3343_v35 = vld [vmem:[#allocation2 + $0x31] sm:$0xff]  ;;  %v3348_v3 = vld [vmem:[#allocation2 + $0x69] sm:$0xff] }
 0x20a   : > { %2696 = vst.msk [vmem:[#allocation2 + $0x151] sm:$0xff] %vm355_vm1, %v2622_v52  ;;  %v2620_v5 = vmax.f32 %v2588_v33, 0.0  ;;  %v2591_v55 = vadd.f32 %v7513_v34, %v2552_v45  ;;  %v2550_v23 = vadd.f32 %v2497_v37, %v2344_v27  ;;  %5948 = vmatprep.mubr.msk.bf16.mxu1 %vm355_vm1, %v7778_v31  ;;  %5983 = vmatmul.mubr.msk.bf16.gmra.mxu0 %vm355_vm1, %v7778_v31 }
 0x20b   : > { %v5928_v46 = vpop.f32.mrf.mxu0  ;;  %5949 = vmatmul.mubr.msk.bf16.gmra.mxu1 %vm355_vm1, %v7781_v10  ;;  %5986 = vmatprep.mubr.msk.bf16.mxu0 %vm355_vm1, %v7781_v10  ;;  %v2724_v51 = vld [vmem:[#allocation2 + $0x108] sm:$0xff] }
 0x20c   : > { %2694 = vst.msk [vmem:[#allocation2 + $0x139] sm:$0xff] %vm355_vm1, %v2620_v5  ;;  %v2623_v42 = vmax.f32 %v2591_v55, 0.0  ;;  %v2589_v29 = vadd.f32 %v7513_v34, %v2550_v23  ;;  %v2555_v47 = vadd.f32 %v5928_v46, %v2349_v56  ;;  %v3341_v56 = vld [vmem:[#allocation2 + $0x19] sm:$0xff]  ;;  %v7846_v5 = vpack.c.bf16 %v3344_v57, %v3343_v35 }
 0x20d   : > { %v2510_v17 = vpop.f32.mrf.mxu0  ;;  %v2727_v59 = vld [vmem:[#allocation2 + $0x128] sm:$0xff]  ;;  %v7844_v37 = vpack.c.bf16 %v3342_v9, %v3341_v56  ;;  %v3645_v55 = vsel %vm404_vm0, %v7614_v11, 0  ;;  %v3846_v23 = vsel %vm404_vm0, %v7619_v48, 0  ;;  %v7866_v11 = vld [vmem:[%s8790_s3 + $0x14] sm:$0xf]  ;;  %v4046_v35 = vld [vmem:[#allocation2 + $0x3a] sm:$0xff] }
 0x20e   : > { %2697 = vst.msk [vmem:[#allocation2 + $0x159] sm:$0xff] %vm355_vm1, %v2623_v42  ;;  %v2621_v13 = vmax.f32 %v2589_v29, 0.0  ;;  %v2594_v24 = vadd.f32 %v7513_v34, %v2555_v47  ;;  %v2553_v62 = vadd.f32 %v2510_v17, %v2347_v61  ;;  %v7803_v28 = vpack.c.bf16 %v2727_v59, %v2726_v43  ;;  %v3346_v48 = vld [vmem:[#allocation2 + $0x51] sm:$0xff]  ;;  %v3347_v61 = vld [vmem:[#allocation2 + $0x61] sm:$0xff]  ;;  %v3352_v42 = vld [vmem:[#allocation2 + $0x99] sm:$0xff] }
 0x20f   : > { %v5929_v19 = vpop.f32.mrf.mxu0  ;;  %v2725_v2 = vld [vmem:[#allocation2 + $0x110] sm:$0xff]  ;;  %v7876_v7 = vpack.c.bf16 %v3348_v3, %v3347_v61  ;;  %v3349_v29 = vld [vmem:[#allocation2 + $0x79] sm:$0xff]  ;;  %v4044_v9 = vld [vmem:[#allocation2 + $0x22] sm:$0xff] }
 0x210   : > { %2695 = vst.msk [vmem:[#allocation2 + $0x141] sm:$0xff] %vm355_vm1, %v2621_v13  ;;  %v2626_v60 = vmax.f32 %v2594_v24, 0.0  ;;  %v2592_v44 = vadd.f32 %v7513_v34, %v2553_v62  ;;  %v2556_v4 = vadd.f32 %v5929_v19, %v2350_v6  ;;  %v7801_v41 = vpack.c.bf16 %v2725_v2, %v2724_v51  ;;  %v3351_v17 = vld [vmem:[#allocation2 + $0x91] sm:$0xff]  ;;  %v3353_v13 = vld [vmem:[#allocation2 + $0xa9] sm:$0xff]  ;;  %v3355_v62 = vld [vmem:[#allocation2 + $0xc1] sm:$0xff] }
 0x211   : > { %v2513_v50 = vpop.f32.mrf.mxu0  ;;  %v2730_v27 = vld [vmem:[#allocation2 + $0x150] sm:$0xff]  ;;  %v7888_v6 = vpack.c.bf16 %v3352_v42, %v3351_v17  ;;  %v4052_v17 = vld [vmem:[#allocation2 + $0x82] sm:$0xff] }
 0x212   : > { %2700 = vst.msk [vmem:[#allocation2 + $0x181] sm:$0xff] %vm355_vm1, %v2626_v60  ;;  %v2624_v16 = vmax.f32 %v2592_v44, 0.0  ;;  %v2595_v38 = vadd.f32 %v7513_v34, %v2556_v4  ;;  %v2554_v30 = vadd.f32 %v2513_v50, %v2348_v40  ;;  %5952 = vmatprep.mubr.msk.bf16.mxu1 %vm355_vm1, %v7801_v41  ;;  %5987 = vmatmul.mubr.msk.bf16.gmra.mxu0 %vm355_vm1, %v7801_v41  ;;  %v3357_v40 = vld [vmem:[#allocation2 + $0xd9] sm:$0xff]  ;;  %v3359_v51 = vld [vmem:[#allocation2 + $0xf1] sm:$0xff]  ;;  %v3364_v60 = vld [vmem:[#allocation2 + $0x129] sm:$0xff] }
 0x213   : > { %5953 = vmatmul.mubr.msk.bf16.gmra.mxu1 %vm355_vm1, %v7803_v28  ;;  %5990 = vmatprep.mubr.msk.bf16.mxu0 %vm355_vm1, %v7803_v28  ;;  %v2728_v12 = vld [vmem:[#allocation2 + $0x138] sm:$0xff]  ;;  %v3361_v44 = vld [vmem:[#allocation2 + $0x109] sm:$0xff]  ;;  %v3363_v4 = vld [vmem:[#allocation2 + $0x121] sm:$0xff] }
 0x214   : > { %2698 = vst.msk [vmem:[#allocation2 + $0x169] sm:$0xff] %vm355_vm1, %v2624_v16  ;;  %v2627_v32 = vmax.f32 %v2595_v38, 0.0  ;;  %v2593_v20 = vadd.f32 %v7513_v34, %v2554_v30  ;;  %v3339_v34 = vld [vmem:[#allocation2 + $0x1] sm:$0xff]  ;;  %v3387_v43 = vpack.c.bf16 %v3364_v60, %v3363_v4  ;;  %v3365_v16 = vld [vmem:[#allocation2 + $0x139] sm:$0xff]  ;;  %v3367_v38 = vld [vmem:[#allocation2 + $0x151] sm:$0xff] }
 0x215   : > { %v2731_v53 = vld [vmem:[#allocation2 + $0x158] sm:$0xff]  ;;  %v3375_v52 = vpack.c.bf16 %v3340_v14, %v3339_v34 }
 0x216   : > { %2701 = vst.msk [vmem:[#allocation2 + $0x189] sm:$0xff] %vm355_vm1, %v2627_v32  ;;  %v2625_v15 = vmax.f32 %v2593_v20, 0.0  ;;  %v7821_v1 = vpack.c.bf16 %v2731_v53, %v2730_v27  ;;  %v3368_v50 = vld [vmem:[#allocation2 + $0x159] sm:$0xff]  ;;  %v4347_v27 = vsel %vm404_vm0, %v7866_v11, 0 }
 0x217   : > { %v2729_v21 = vld [vmem:[#allocation2 + $0x140] sm:$0xff]  ;;  %v3389_v30 = vpack.c.bf16 %v3368_v50, %v3367_v38  ;;  %v2736_v32 = vld [vmem:[#allocation2 + $0x198] sm:$0xff] }
 0x218   : > { %2699 = vst.msk [vmem:[#allocation2 + $0x171] sm:$0xff] %vm355_vm1, %v2625_v15  ;;  %v7819_v36 = vpack.c.bf16 %v2729_v21, %v2728_v12  ;;  %v2737_v20 = vld [vmem:[#allocation2 + $0x1a0] sm:$0xff]  ;;  %v4056_v4 = vld [vmem:[#allocation2 + $0xb2] sm:$0xff] }
 0x219   : > { %v2734_v45 = vld [vmem:[#allocation2 + $0x180] sm:$0xff]  ;;  %v2755_v12 = vpack.c.bf16 %v2737_v20, %v2736_v32 }
 0x21a   : > { %5956 = vmatprep.mubr.msk.bf16.mxu1 %vm355_vm1, %v7819_v36  ;;  %5991 = vmatmul.mubr.msk.bf16.gmra.mxu0 %vm355_vm1, %v7819_v36  ;;  %v3371_v14 = vld [vmem:[#allocation2 + $0x181] sm:$0xff] }
 0x21b   : > { %5957 = vmatmul.mubr.msk.bf16.gmra.mxu1 %vm355_vm1, %v7821_v1  ;;  %5994 = vmatprep.mubr.msk.bf16.mxu0 %vm355_vm1, %v7821_v1  ;;  %v2732_v25 = vld [vmem:[#allocation2 + $0x168] sm:$0xff] }
 0x21c   : > { %v3369_v53 = vld [vmem:[#allocation2 + $0x169] sm:$0xff] }
 0x21d   : > { %v2735_v58 = vld [vmem:[#allocation2 + $0x188] sm:$0xff] }
 0x21e   : > { %v7833_v26 = vpack.c.bf16 %v2735_v58, %v2734_v45  ;;  %v3372_v34 = vld [vmem:[#allocation2 + $0x189] sm:$0xff] }
 0x21f   : > { %v2733_v49 = vld [vmem:[#allocation2 + $0x170] sm:$0xff]  ;;  %v3391_v58 = vpack.c.bf16 %v3372_v34, %v3371_v14  ;;  %v4059_v34 = vld [vmem:[#allocation2 + $0xda] sm:$0xff]  ;;  %v4060_v14 = vld [vmem:[#allocation2 + $0xe2] sm:$0xff] }
 0x220   : > { %v7831_v33 = vpack.c.bf16 %v2733_v49, %v2732_v25  ;;  %v3370_v15 = vld [vmem:[#allocation2 + $0x171] sm:$0xff]  ;;  %v3373_v25 = vld [vmem:[#allocation2 + $0x199] sm:$0xff]  ;;  %v3374_v49 = vld [vmem:[#allocation2 + $0x1a1] sm:$0xff] }
 0x221   : > { %v3390_v21 = vpack.c.bf16 %v3370_v15, %v3369_v53  ;;  %v3392_v45 = vpack.c.bf16 %v3374_v49, %v3373_v25 }
 0x222   : > { %5960 = vmatprep.mubr.msk.bf16.mxu1 %vm355_vm1, %v7831_v33  ;;  %5995 = vmatmul.mubr.msk.bf16.gmra.mxu0 %vm355_vm1, %v7831_v33 }
 0x223   : > { %5961 = vmatmul.mubr.msk.bf16.gmra.mxu1 %vm355_vm1, %v7833_v26  ;;  %6034 = vmatprep.mubr.msk.bf16.mxu0 %vm355_vm1, %v3375_v52  ;;  %v4041_v52 = vld [vmem:[#allocation2 + $0x2] sm:$0xff] }
 0x224   : > { %6000 = vmatprep.mubr.msk.bf16.mxu1 %vm355_vm1, %v7602_v63  ;;  %v7857_v63 = vld [vmem:[%s8790_s3 + $0x8] sm:$0xf] }
 0x22a   : > { %6035 = vmatmul.mubr.msk.bf16.vlgmr.msra.gmra.mxu0 %vm355_vm1, %v7844_v37 }
 0x22b   : > { %6001 = vmatmul.mubr.msk.bf16.vlgmr.msra.gmra.mxu1 %vm355_vm1, %v7655_v22  ;;  %6038 = vmatprep.mubr.msk.bf16.mxu0 %vm355_vm1, %v7846_v5  ;;  %v3345_v22 = vld [vmem:[#allocation2 + $0x49] sm:$0xff] }
 0x22c   : > { %6067 = vmatpush3.bf16.msra.mxu1 %v3645_v55  ;;  %6004 = vmatprep.mubr.msk.bf16.mxu1 %vm355_vm1, %v7659_v39  ;;  %v7874_v46 = vpack.c.bf16 %v3346_v48, %v3345_v22  ;;  %v3350_v39 = vld [vmem:[#allocation2 + $0x81] sm:$0xff]  ;;  %v4048_v55 = vld [vmem:[#allocation2 + $0x52] sm:$0xff] }
 0x22d   : > { %6101 = vmatpush3.bf16.msra.mxu0 %v3846_v23  ;;  %6251 = vmatprep.subr.msk.bf16.mxu1 %vm404_vm0, %v7857_v63  ;;  %v7886_v47 = vpack.c.bf16 %v3350_v39, %v3349_v29  ;;  %v4050_v39 = vld [vmem:[#allocation2 + $0x6a] sm:$0xff] }
 0x22e   : > { %6252 = vmatprep.subr.msk.bf16.mxu0 %vm404_vm0, %v7866_v11 }
 0x232   : > { %6039 = vmatmul.mubr.msk.bf16.gmra.mxu0 %vm355_vm1, %v7874_v46 }
 0x233   : > { %6005 = vmatmul.mubr.msk.bf16.gmra.mxu1 %vm355_vm1, %v7699_v8  ;;  %6042 = vmatprep.mubr.msk.bf16.mxu0 %vm355_vm1, %v7876_v7  ;;  %v3354_v8 = vld [vmem:[#allocation2 + $0xb1] sm:$0xff] }
 0x234   : > { %6008 = vmatprep.mubr.msk.bf16.mxu1 %vm355_vm1, %v7703_v54  ;;  %v3356_v54 = vld [vmem:[#allocation2 + $0xc9] sm:$0xff]  ;;  %v7898_v24 = vpack.c.bf16 %v3354_v8, %v3353_v13 }
 0x235   : > { %v7900_v59 = vpack.c.bf16 %v3356_v54, %v3355_v62 }
 0x23a   : > { %6043 = vmatmul.mubr.msk.bf16.gmra.mxu0 %vm355_vm1, %v7886_v47 }
 0x23b   : > { %6009 = vmatmul.mubr.msk.bf16.gmra.mxu1 %vm355_vm1, %v7741_v0  ;;  %6046 = vmatprep.mubr.msk.bf16.mxu0 %vm355_vm1, %v7888_v6  ;;  %v3358_v0 = vld [vmem:[#allocation2 + $0xe1] sm:$0xff] }
 0x23c   : > { %6012 = vmatprep.mubr.msk.bf16.mxu1 %vm355_vm1, %v7745_v18  ;;  %v3360_v18 = vld [vmem:[#allocation2 + $0xf9] sm:$0xff]  ;;  %v3384_v19 = vpack.c.bf16 %v3358_v0, %v3357_v40 }
 0x23d   : > { %v3385_v2 = vpack.c.bf16 %v3360_v18, %v3359_v51 }
 0x242   : > { %6047 = vmatmul.mubr.msk.bf16.gmra.mxu0 %vm355_vm1, %v7898_v24 }
 0x243   : > { %6013 = vmatmul.mubr.msk.bf16.gmra.mxu1 %vm355_vm1, %v7778_v31  ;;  %6050 = vmatprep.mubr.msk.bf16.mxu0 %vm355_vm1, %v7900_v59  ;;  %v3362_v31 = vld [vmem:[#allocation2 + $0x111] sm:$0xff] }
 0x244   : > { %6016 = vmatprep.mubr.msk.bf16.mxu1 %vm355_vm1, %v7781_v10  ;;  %v3386_v10 = vpack.c.bf16 %v3362_v31, %v3361_v44  ;;  %v4054_v31 = vld [vmem:[#allocation2 + $0x9a] sm:$0xff] }
 0x24a   : > { %6051 = vmatmul.mubr.msk.bf16.gmra.mxu0 %vm355_vm1, %v3384_v19 }
 0x24b   : > { %6017 = vmatmul.mubr.msk.bf16.gmra.mxu1 %vm355_vm1, %v7801_v41  ;;  %6054 = vmatprep.mubr.msk.bf16.mxu0 %vm355_vm1, %v3385_v2  ;;  %v3366_v41 = vld [vmem:[#allocation2 + $0x141] sm:$0xff] }
 0x24c   : > { %6020 = vmatprep.mubr.msk.bf16.mxu1 %vm355_vm1, %v7803_v28  ;;  %v3388_v28 = vpack.c.bf16 %v3366_v41, %v3365_v16 }
 0x252   : > { %6055 = vmatmul.mubr.msk.bf16.gmra.mxu0 %vm355_vm1, %v3386_v10 }
 0x253   : > { %6021 = vmatmul.mubr.msk.bf16.gmra.mxu1 %vm355_vm1, %v7819_v36  ;;  %6058 = vmatprep.mubr.msk.bf16.mxu0 %vm355_vm1, %v3387_v43  ;;  %v4146_v36 = vsel %vm404_vm0, %v7857_v63, 0 }
 0x254   : > { %6024 = vmatprep.mubr.msk.bf16.mxu1 %vm355_vm1, %v7821_v1  ;;  %v5297_v1 = vld [vmem:[%s8790_s3 + $0x20] sm:$0xf] }
 0x255   : > { %v4548_v11 = vsel %vm404_vm0, %v5297_v1, 0 }
 0x25a   : > { %6059 = vmatmul.mubr.msk.bf16.gmra.mxu0 %vm355_vm1, %v3388_v28 }
 0x25b   : > { %6025 = vmatmul.mubr.msk.bf16.gmra.mxu1 %vm355_vm1, %v7831_v33  ;;  %6062 = vmatprep.mubr.msk.bf16.mxu0 %vm355_vm1, %v3389_v30  ;;  %v4042_v33 = vld [vmem:[#allocation2 + $0xa] sm:$0xff] }
 0x25c   : > { %6028 = vmatprep.mubr.msk.bf16.mxu1 %vm355_vm1, %v7833_v26  ;;  %v4043_v26 = vld [vmem:[#allocation2 + $0x1a] sm:$0xff]  ;;  %v4077_v57 = vpack.c.bf16 %v4042_v33, %v4041_v52 }
 0x25d   : > { %v4078_v56 = vpack.c.bf16 %v4044_v9, %v4043_v26 }
 0x262   : > { %6063 = vmatmul.mubr.msk.bf16.gmra.mxu0 %vm355_vm1, %v3390_v21 }
 0x263   : > { %6029 = vmatmul.mubr.msk.bf16.gmra.mxu1 %vm355_vm1, %v2755_v12  ;;  %6102 = vmatprep.mubr.msk.bf16.mxu0 %vm355_vm1, %v7846_v5 }
 0x264   : > { %6068 = vmatprep.mubr.msk.bf16.mxu1 %vm355_vm1, %v7844_v37  ;;  %v4045_v37 = vld [vmem:[#allocation2 + $0x32] sm:$0xff] }
 0x265   : > { %v7987_v23 = vpack.c.bf16 %v4046_v35, %v4045_v37 }
 0x26a   : > { %6103 = vmatmul.mubr.msk.bf16.vlgmr.msra.gmra.mxu0 %vm355_vm1, %v7874_v46 }
 0x26b   : > { %6069 = vmatmul.mubr.msk.bf16.vlgmr.msra.gmra.mxu1 %vm355_vm1, %v7846_v5  ;;  %6106 = vmatprep.mubr.msk.bf16.mxu0 %vm355_vm1, %v7876_v7  ;;  %v4047_v5 = vld [vmem:[#allocation2 + $0x4a] sm:$0xff] }
 0x26c   : > { %6135 = vmatpush3.bf16.msra.mxu1 %v4146_v36  ;;  %6072 = vmatprep.mubr.msk.bf16.mxu1 %vm355_vm1, %v7874_v46  ;;  %v7989_v63 = vpack.c.bf16 %v4048_v55, %v4047_v5  ;;  %v4058_v36 = vld [vmem:[#allocation2 + $0xca] sm:$0xff]  ;;  %v4061_v5 = vld [vmem:[#allocation2 + $0xf2] sm:$0xff]  ;;  %v4062_v55 = vld [vmem:[#allocation2 + $0xfa] sm:$0xff] }
 0x26d   : > { %6169 = vmatpush3.bf16.msra.mxu0 %v4347_v27  ;;  %6253 = vmatprep.subr.msk.bf16.mxu1 %vm404_vm0, %v5297_v1 }
 0x272   : > { %6107 = vmatmul.mubr.msk.bf16.gmra.mxu0 %vm355_vm1, %v7886_v47 }
 0x273   : > { %6073 = vmatmul.mubr.msk.bf16.gmra.mxu1 %vm355_vm1, %v7876_v7  ;;  %6110 = vmatprep.mubr.msk.bf16.mxu0 %vm355_vm1, %v7888_v6  ;;  %v4049_v7 = vld [vmem:[#allocation2 + $0x62] sm:$0xff] }
 0x274   : > { %6076 = vmatprep.mubr.msk.bf16.mxu1 %vm355_vm1, %v7886_v47  ;;  %v4051_v47 = vld [vmem:[#allocation2 + $0x7a] sm:$0xff]  ;;  %v8005_v13 = vpack.c.bf16 %v4050_v39, %v4049_v7 }
 0x275   : > { %v8007_v62 = vpack.c.bf16 %v4052_v17, %v4051_v47 }
 0x27a   : > { %6111 = vmatmul.mubr.msk.bf16.gmra.mxu0 %vm355_vm1, %v7898_v24 }
 0x27b   : > { %6077 = vmatmul.mubr.msk.bf16.gmra.mxu1 %vm355_vm1, %v7888_v6  ;;  %6114 = vmatprep.mubr.msk.bf16.mxu0 %vm355_vm1, %v7900_v59 }
 0x27c   : > { %6080 = vmatprep.mubr.msk.bf16.mxu1 %vm355_vm1, %v7898_v24 }
 0x282   : > { %6115 = vmatmul.mubr.msk.bf16.gmra.mxu0 %vm355_vm1, %v3384_v19 }
 0x283   : > { %6081 = vmatmul.mubr.msk.bf16.gmra.mxu1 %vm355_vm1, %v7900_v59  ;;  %6118 = vmatprep.mubr.msk.bf16.mxu0 %vm355_vm1, %v3385_v2 }
 0x284   : > { %6084 = vmatprep.mubr.msk.bf16.mxu1 %vm355_vm1, %v3384_v19 }
 0x28a   : > { %6119 = vmatmul.mubr.msk.bf16.gmra.mxu0 %vm355_vm1, %v3386_v10 }
 0x28b   : > { %6085 = vmatmul.mubr.msk.bf16.gmra.mxu1 %vm355_vm1, %v3385_v2  ;;  %6122 = vmatprep.mubr.msk.bf16.mxu0 %vm355_vm1, %v3387_v43  ;;  %v4053_v2 = vld [vmem:[#allocation2 + $0x92] sm:$0xff] }
 0x28c   : > { %6088 = vmatprep.mubr.msk.bf16.mxu1 %vm355_vm1, %v3386_v10  ;;  %v4055_v10 = vld [vmem:[#allocation2 + $0xaa] sm:$0xff]  ;;  %v8025_v16 = vpack.c.bf16 %v4054_v31, %v4053_v2 }
 0x28d   : > { %v8027_v38 = vpack.c.bf16 %v4056_v4, %v4055_v10  ;;  %v4066_v2 = vld [vmem:[#allocation2 + $0x12a] sm:$0xff]  ;;  %v4067_v10 = vld [vmem:[#allocation2 + $0x13a] sm:$0xff]  ;;  %v4068_v4 = vld [vmem:[#allocation2 + $0x142] sm:$0xff] }
 0x292   : > { %6123 = vmatmul.mubr.msk.bf16.gmra.mxu0 %vm355_vm1, %v3388_v28 }
 0x293   : > { %6089 = vmatmul.mubr.msk.bf16.gmra.mxu1 %vm355_vm1, %v3387_v43  ;;  %6126 = vmatprep.mubr.msk.bf16.mxu0 %vm355_vm1, %v3389_v30 }
 0x294   : > { %6092 = vmatprep.mubr.msk.bf16.mxu1 %vm355_vm1, %v3388_v28 }
 0x29a   : > { %6127 = vmatmul.mubr.msk.bf16.gmra.mxu0 %vm355_vm1, %v3390_v21 }
 0x29b   : > { %6093 = vmatmul.mubr.msk.bf16.gmra.mxu1 %vm355_vm1, %v3389_v30  ;;  %6130 = vmatprep.mubr.msk.bf16.mxu0 %vm355_vm1, %v3391_v58 }
 0x29c   : > { %6096 = vmatprep.mubr.msk.bf16.mxu1 %vm355_vm1, %v3390_v21  ;;  %v4057_v21 = vld [vmem:[#allocation2 + $0xc2] sm:$0xff] }
 0x29d   : > { %v8045_v52 = vpack.c.bf16 %v4058_v36, %v4057_v21 }
 0x2a2   : > { %6131 = vmatmul.mubr.msk.bf16.gmra.mxu0 %vm355_vm1, %v3392_v45  ;;  %v8047_v45 = vpack.c.bf16 %v4060_v14, %v4059_v34 }
 0x2a3   : > { %6097 = vmatmul.mubr.msk.bf16.gmra.mxu1 %vm355_vm1, %v3391_v58  ;;  %6170 = vmatprep.mubr.msk.bf16.mxu0 %vm355_vm1, %v4078_v56 }
 0x2a4   : > { %6136 = vmatprep.mubr.msk.bf16.mxu1 %vm355_vm1, %v4077_v57 }
 0x2aa   : > { %v5968_v48 = vpop.f32.mrf.mxu0  ;;  %6171 = vmatmul.mubr.msk.bf16.vlgmr.msra.gmra.mxu0 %vm355_vm1, %v7987_v23 }
 0x2ab   : > { %v5934_v3 = vpop.f32.mrf.mxu1  ;;  %6137 = vmatmul.mubr.msk.bf16.vlgmr.msra.gmra.mxu1 %vm355_vm1, %v4078_v56  ;;  %6174 = vmatprep.mubr.msk.bf16.mxu0 %vm355_vm1, %v7989_v63 }
 0x2ac   : > { %v7997_v22 = vadd.f32 %v5968_v48, %v5934_v3  ;;  %6203 = vmatpush3.bf16.msra.mxu1 %v4548_v11  ;;  %v3011_v46 = vpop.f32.mrf.mxu0  ;;  %6140 = vmatprep.mubr.msk.bf16.mxu1 %vm355_vm1, %v7987_v23  ;;  %v4063_v3 = vld [vmem:[#allocation2 + $0x10a] sm:$0xff] }
 0x2ad   : > { %v2844_v61 = vpop.f32.mrf.mxu1 }
 0x2ae   : > { %v8001_v42 = vadd.f32 %v3011_v46, %v2844_v61  ;;  %v5969_v29 = vpop.f32.mrf.mxu0  ;;  %v4064_v46 = vld [vmem:[#allocation2 + $0x112] sm:$0xff] }
 0x2af   : > { %v5935_v6 = vpop.f32.mrf.mxu1  ;;  %v8067_v17 = vpack.c.bf16 %v4064_v46, %v4063_v3 }
 0x2b0   : > { %v8003_v8 = vadd.f32 %v5969_v29, %v5935_v6  ;;  %v3014_v54 = vpop.f32.mrf.mxu0  ;;  %v8065_v29 = vpack.c.bf16 %v4062_v55, %v4061_v5 }
 0x2b1   : > { %v2847_v24 = vpop.f32.mrf.mxu1 }
 0x2b2   : > { %v8009_v59 = vadd.f32 %v3014_v54, %v2847_v24  ;;  %v5972_v0 = vpop.f32.mrf.mxu0  ;;  %6175 = vmatmul.mubr.msk.bf16.gmra.mxu0 %vm355_vm1, %v8005_v13 }
 0x2b3   : > { %v5938_v18 = vpop.f32.mrf.mxu1  ;;  %6141 = vmatmul.mubr.msk.bf16.gmra.mxu1 %vm355_vm1, %v7989_v63  ;;  %6178 = vmatprep.mubr.msk.bf16.mxu0 %vm355_vm1, %v8007_v62 }
 0x2b4   : > { %v8017_v40 = vadd.f32 %v5972_v0, %v5938_v18  ;;  %v3027_v19 = vpop.f32.mrf.mxu0  ;;  %6144 = vmatprep.mubr.msk.bf16.mxu1 %vm355_vm1, %v8005_v13 }
 0x2b5   : > { %v2860_v51 = vpop.f32.mrf.mxu1 }
 0x2b6   : > { %v8021_v60 = vadd.f32 %v3027_v19, %v2860_v51  ;;  %v5973_v44 = vpop.f32.mrf.mxu0  ;;  %v4065_v51 = vld [vmem:[#allocation2 + $0x122] sm:$0xff] }
 0x2b7   : > { %v5939_v43 = vpop.f32.mrf.mxu1 }
 0x2b8   : > { %v8023_v41 = vadd.f32 %v5973_v44, %v5939_v43  ;;  %v3030_v50 = vpop.f32.mrf.mxu0 }
 0x2b9   : > { %v2863_v28 = vpop.f32.mrf.mxu1 }
 0x2ba   : > { %v8029_v30 = vadd.f32 %v3030_v50, %v2863_v28  ;;  %v5976_v32 = vpop.f32.mrf.mxu0  ;;  %6179 = vmatmul.mubr.msk.bf16.gmra.mxu0 %vm355_vm1, %v8025_v16 }
 0x2bb   : > { %v5942_v20 = vpop.f32.mrf.mxu1  ;;  %6145 = vmatmul.mubr.msk.bf16.gmra.mxu1 %vm355_vm1, %v8007_v62  ;;  %6182 = vmatprep.mubr.msk.bf16.mxu0 %vm355_vm1, %v8027_v38 }
 0x2bc   : > { %v8037_v15 = vadd.f32 %v5976_v32, %v5942_v20  ;;  %v3043_v53 = vpop.f32.mrf.mxu0  ;;  %6148 = vmatprep.mubr.msk.bf16.mxu1 %vm355_vm1, %v8025_v16  ;;  %v8085_v32 = vpack.c.bf16 %v4066_v2, %v4065_v51  ;;  %v4074_v51 = vld [vmem:[#allocation2 + $0x18a] sm:$0xff] }
 0x2bd   : > { %v2876_v12 = vpop.f32.mrf.mxu1 }
 0x2be   : > { %v8041_v27 = vadd.f32 %v3043_v53, %v2876_v12  ;;  %v5977_v1 = vpop.f32.mrf.mxu0  ;;  %v8087_v53 = vpack.c.bf16 %v4068_v4, %v4067_v10 }
 0x2bf   : > { %v5943_v58 = vpop.f32.mrf.mxu1 }
 0x2c0   : > { %v8043_v25 = vadd.f32 %v5977_v1, %v5943_v58  ;;  %v3046_v49 = vpop.f32.mrf.mxu0  ;;  %v4069_v58 = vld [vmem:[#allocation2 + $0x152] sm:$0xff] }
 0x2c1   : > { %v2879_v33 = vpop.f32.mrf.mxu1 }
 0x2c2   : > { %v8049_v26 = vadd.f32 %v3046_v49, %v2879_v33  ;;  %v5980_v9 = vpop.f32.mrf.mxu0  ;;  %6183 = vmatmul.mubr.msk.bf16.gmra.mxu0 %vm355_vm1, %v8045_v52  ;;  %v4070_v49 = vld [vmem:[#allocation2 + $0x15a] sm:$0xff] }
 0x2c3   : > { %v5946_v57 = vpop.f32.mrf.mxu1  ;;  %6149 = vmatmul.mubr.msk.bf16.gmra.mxu1 %vm355_vm1, %v8027_v38  ;;  %6186 = vmatprep.mubr.msk.bf16.mxu0 %vm355_vm1, %v8047_v45 }
 0x2c4   : > { %v8057_v56 = vadd.f32 %v5980_v9, %v5946_v57  ;;  %v3059_v37 = vpop.f32.mrf.mxu0  ;;  %6152 = vmatprep.mubr.msk.bf16.mxu1 %vm355_vm1, %v8045_v52  ;;  %v4071_v57 = vld [vmem:[#allocation2 + $0x16a] sm:$0xff] }
 0x2c5   : > { %v2892_v35 = vpop.f32.mrf.mxu1 }
 0x2c6   : > { %v8061_v11 = vadd.f32 %v3059_v37, %v2892_v35  ;;  %v5981_v48 = vpop.f32.mrf.mxu0  ;;  %v4072_v37 = vld [vmem:[#allocation2 + $0x172] sm:$0xff] }
 0x2c7   : > { %v5947_v61 = vpop.f32.mrf.mxu1  ;;  %v8107_v46 = vpack.c.bf16 %v4072_v37, %v4071_v57 }
 0x2c8   : > { %v8063_v7 = vadd.f32 %v5981_v48, %v5947_v61  ;;  %v3062_v39 = vpop.f32.mrf.mxu0  ;;  %v8105_v48 = vpack.c.bf16 %v4070_v49, %v4069_v58 }
 0x2c9   : > { %v2895_v47 = vpop.f32.mrf.mxu1 }
 0x2ca   : > { %v8069_v6 = vadd.f32 %v3062_v39, %v2895_v47  ;;  %v5984_v54 = vpop.f32.mrf.mxu0  ;;  %6187 = vmatmul.mubr.msk.bf16.gmra.mxu0 %vm355_vm1, %v8065_v29 }
 0x2cb   : > { %v5950_v24 = vpop.f32.mrf.mxu1  ;;  %6153 = vmatmul.mubr.msk.bf16.gmra.mxu1 %vm355_vm1, %v8047_v45  ;;  %6190 = vmatprep.mubr.msk.bf16.mxu0 %vm355_vm1, %v8067_v17 }
 0x2cc   : > { %v8077_v0 = vadd.f32 %v5984_v54, %v5950_v24  ;;  %v3075_v18 = vpop.f32.mrf.mxu0  ;;  %6156 = vmatprep.mubr.msk.bf16.mxu1 %vm355_vm1, %v8065_v29 }
 0x2cd   : > { %v2908_v19 = vpop.f32.mrf.mxu1 }
 0x2ce   : > { %v8081_v31 = vadd.f32 %v3075_v18, %v2908_v19  ;;  %v5985_v44 = vpop.f32.mrf.mxu0  ;;  %v4073_v19 = vld [vmem:[#allocation2 + $0x182] sm:$0xff] }
 0x2cf   : > { %v5951_v43 = vpop.f32.mrf.mxu1 }
 0x2d0   : > { %v8083_v50 = vadd.f32 %v5985_v44, %v5951_v43  ;;  %v3078_v28 = vpop.f32.mrf.mxu0 }
 0x2d1   : > { %v2911_v20 = vpop.f32.mrf.mxu1 }
 0x2d2   : > { %v8089_v12 = vadd.f32 %v3078_v28, %v2911_v20  ;;  %v5988_v21 = vpop.f32.mrf.mxu0  ;;  %6191 = vmatmul.mubr.msk.bf16.gmra.mxu0 %vm355_vm1, %v8085_v32  ;;  %v8125_v28 = vpack.c.bf16 %v4074_v51, %v4073_v19 }
 0x2d3   : > { %v5954_v36 = vpop.f32.mrf.mxu1  ;;  %6157 = vmatmul.mubr.msk.bf16.gmra.mxu1 %vm355_vm1, %v8067_v17  ;;  %6194 = vmatprep.mubr.msk.bf16.mxu0 %vm355_vm1, %v8087_v53 }
 0x2d4   : > { %v8097_v1 = vadd.f32 %v5988_v21, %v5954_v36  ;;  %v3091_v34 = vpop.f32.mrf.mxu0  ;;  %6160 = vmatprep.mubr.msk.bf16.mxu1 %vm355_vm1, %v8085_v32 }
 0x2d5   : > { %v2924_v14 = vpop.f32.mrf.mxu1 }
 0x2d6   : > { %v8101_v33 = vadd.f32 %v3091_v34, %v2924_v14  ;;  %v5989_v9 = vpop.f32.mrf.mxu0 }
 0x2d7   : > { %v5955_v35 = vpop.f32.mrf.mxu1 }
 0x2d8   : > { %v8103_v5 = vadd.f32 %v5989_v9, %v5955_v35  ;;  %v3094_v55 = vpop.f32.mrf.mxu0 }
 0x2d9   : > { %v2927_v3 = vpop.f32.mrf.mxu1 }
 0x2da   : > { %v8109_v61 = vadd.f32 %v3094_v55, %v2927_v3  ;;  %v5992_v39 = vpop.f32.mrf.mxu0  ;;  %6195 = vmatmul.mubr.msk.bf16.gmra.mxu0 %vm355_vm1, %v8105_v48 }
 0x2db   : > { %v5958_v47 = vpop.f32.mrf.mxu1  ;;  %6161 = vmatmul.mubr.msk.bf16.gmra.mxu1 %vm355_vm1, %v8087_v53  ;;  %6198 = vmatprep.mubr.msk.bf16.mxu0 %vm355_vm1, %v8107_v46 }
 0x2dc   : > { %v8117_v54 = vadd.f32 %v5992_v39, %v5958_v47  ;;  %v3107_v24 = vpop.f32.mrf.mxu0  ;;  %6164 = vmatprep.mubr.msk.bf16.mxu1 %vm355_vm1, %v8105_v48 }
 0x2dd   : > { %v2940_v18 = vpop.f32.mrf.mxu1 }
 0x2de   : > { %v8121_v2 = vadd.f32 %v3107_v24, %v2940_v18  ;;  %v5993_v44 = vpop.f32.mrf.mxu0 }
 0x2df   : > { %v5959_v10 = vpop.f32.mrf.mxu1 }
 0x2e0   : > { %v8123_v4 = vadd.f32 %v5993_v44, %v5959_v10  ;;  %v3110_v43 = vpop.f32.mrf.mxu0 }
 0x2e1   : > { %v2943_v20 = vpop.f32.mrf.mxu1 }
 0x2e2   : > { %v8127_v21 = vadd.f32 %v3110_v43, %v2943_v20  ;;  %v5996_v36 = vpop.f32.mrf.mxu0  ;;  %6199 = vmatmul.mubr.msk.bf16.gmra.mxu0 %vm355_vm1, %v8125_v28 }
 0x2e3   : > { %v5962_v34 = vpop.f32.mrf.mxu1  ;;  %6165 = vmatmul.mubr.msk.bf16.gmra.mxu1 %vm355_vm1, %v8107_v46 }
 0x2e4   : > { %v8133_v14 = vadd.f32 %v5996_v36, %v5962_v34  ;;  %v3123_v58 = vpop.f32.mrf.mxu0  ;;  %6204 = vmatprep.mubr.msk.bf16.mxu1 %vm355_vm1, %v7987_v23 }
 0x2e5   : > { %v2956_v49 = vpop.f32.mrf.mxu1 }
 0x2e6   : > { %v8137_v9 = vadd.f32 %v3123_v58, %v2956_v49  ;;  %v5997_v57 = vpop.f32.mrf.mxu0 }
 0x2e7   : > { %v5963_v37 = vpop.f32.mrf.mxu1 }
 0x2e8   : > { %v8139_v35 = vadd.f32 %v5997_v57, %v5963_v37  ;;  %v3126_v55 = vpop.f32.mrf.mxu0 }
 0x2e9   : > { %v2959_v3 = vpop.f32.mrf.mxu1 }
 0x2ea   : > { %v8141_v39 = vadd.f32 %v3126_v55, %v2959_v3  ;;  %v6036_v47 = vpop.f32.mrf.mxu0 }
 0x2eb   : > { %v6002_v24 = vpop.f32.mrf.mxu1  ;;  %6205 = vmatmul.mubr.msk.bf16.vlgmr.msra.gmra.mxu1 %vm355_vm1, %v7989_v63 }
 0x2ec   : > { %v3309_v18 = vadd.f32 %v6002_v24, %v7997_v22  ;;  %v3480_v19 = vpop.f32.mrf.mxu0  ;;  %6208 = vmatprep.mubr.msk.bf16.mxu1 %vm355_vm1, %v8005_v13 }
 0x2ed   : > { %v3180_v23 = vpop.f32.mrf.mxu1 }
 0x2ee   : > { %v3307_v51 = vadd.f32 %v3180_v23, %v8001_v42  ;;  %v6037_v44 = vpop.f32.mrf.mxu0  ;;  %v8149_v10 = vadd.f32 %v6036_v47, %v3309_v18 }
 0x2ef   : > { %v6003_v43 = vpop.f32.mrf.mxu1 }
 0x2f0   : > { %v3310_v20 = vadd.f32 %v6003_v43, %v8003_v8  ;;  %v3483_v36 = vpop.f32.mrf.mxu0  ;;  %v8152_v34 = vadd.f32 %v3480_v19, %v3307_v51 }
 0x2f1   : > { %v3183_v58 = vpop.f32.mrf.mxu1 }
 0x2f2   : > { %v3308_v63 = vadd.f32 %v3183_v58, %v8009_v59  ;;  %v6040_v22 = vpop.f32.mrf.mxu0  ;;  %v8155_v49 = vadd.f32 %v6037_v44, %v3310_v20 }
 0x2f3   : > { %v6006_v57 = vpop.f32.mrf.mxu1  ;;  %6209 = vmatmul.mubr.msk.bf16.gmra.mxu1 %vm355_vm1, %v8007_v62 }
 0x2f4   : > { %v3313_v42 = vadd.f32 %v6006_v57, %v8017_v40  ;;  %v3496_v13 = vpop.f32.mrf.mxu0  ;;  %6212 = vmatprep.mubr.msk.bf16.mxu1 %vm355_vm1, %v8025_v16  ;;  %v8162_v8 = vadd.f32 %v3483_v36, %v3308_v63 }
 0x2f5   : > { %v3196_v37 = vpop.f32.mrf.mxu1 }
 0x2f6   : > { %v3311_v55 = vadd.f32 %v3196_v37, %v8021_v60  ;;  %v6041_v3 = vpop.f32.mrf.mxu0  ;;  %v8165_v59 = vadd.f32 %v6040_v22, %v3313_v42 }
 0x2f7   : > { %v6007_v47 = vpop.f32.mrf.mxu1 }
 0x2f8   : > { %v3314_v24 = vadd.f32 %v6007_v47, %v8023_v41  ;;  %v3499_v18 = vpop.f32.mrf.mxu0  ;;  %v8168_v19 = vadd.f32 %v3496_v13, %v3311_v55 }
 0x2f9   : > { %v3199_v62 = vpop.f32.mrf.mxu1 }
 0x2fa   : > { %v3312_v40 = vadd.f32 %v3199_v62, %v8029_v30  ;;  %v6044_v23 = vpop.f32.mrf.mxu0  ;;  %v8171_v51 = vadd.f32 %v6041_v3, %v3314_v24 }
 0x2fb   : > { %v6010_v16 = vpop.f32.mrf.mxu1  ;;  %6213 = vmatmul.mubr.msk.bf16.gmra.mxu1 %vm355_vm1, %v8027_v38 }
 0x2fc   : > { %v3317_v60 = vadd.f32 %v6010_v16, %v8037_v15  ;;  %v3512_v44 = vpop.f32.mrf.mxu0  ;;  %6216 = vmatprep.mubr.msk.bf16.mxu1 %vm355_vm1, %v8045_v52  ;;  %v8178_v41 = vadd.f32 %v3499_v18, %v3312_v40 }
 0x2fd   : > { %v3212_v43 = vpop.f32.mrf.mxu1 }
 0x2fe   : > { %v3315_v20 = vadd.f32 %v3212_v43, %v8041_v27  ;;  %v6045_v36 = vpop.f32.mrf.mxu0  ;;  %v8181_v30 = vadd.f32 %v6044_v23, %v3317_v60 }
 0x2ff   : > { %v6011_v58 = vpop.f32.mrf.mxu1 }
 0x300   : > { %v3318_v63 = vadd.f32 %v6011_v58, %v8043_v25  ;;  %v3515_v22 = vpop.f32.mrf.mxu0  ;;  %v8184_v57 = vadd.f32 %v3512_v44, %v3315_v20 }
 0x301   : > { %v3215_v38 = vpop.f32.mrf.mxu1 }
 0x302   : > { %v3316_v15 = vadd.f32 %v3215_v38, %v8049_v26  ;;  %v6048_v42 = vpop.f32.mrf.mxu0  ;;  %v8187_v13 = vadd.f32 %v6045_v36, %v3318_v63 }
 0x303   : > { %v6014_v52 = vpop.f32.mrf.mxu1  ;;  %6217 = vmatmul.mubr.msk.bf16.gmra.mxu1 %vm355_vm1, %v8047_v45 }
 0x304   : > { %v3321_v27 = vadd.f32 %v6014_v52, %v8057_v56  ;;  %v3528_v37 = vpop.f32.mrf.mxu0  ;;  %6220 = vmatprep.mubr.msk.bf16.mxu1 %vm355_vm1, %v8065_v29  ;;  %v8194_v25 = vadd.f32 %v3515_v22, %v3316_v15 }
 0x305   : > { %v3228_v55 = vpop.f32.mrf.mxu1 }
 0x306   : > { %v3319_v3 = vadd.f32 %v3228_v55, %v8061_v11  ;;  %v6049_v47 = vpop.f32.mrf.mxu0  ;;  %v8197_v26 = vadd.f32 %v6048_v42, %v3321_v27 }
 0x307   : > { %v6015_v24 = vpop.f32.mrf.mxu1 }
 0x308   : > { %v3322_v18 = vadd.f32 %v6015_v24, %v8063_v7  ;;  %v3531_v62 = vpop.f32.mrf.mxu0  ;;  %v8200_v40 = vadd.f32 %v3528_v37, %v3319_v3 }
 0x309   : > { %v3231_v45 = vpop.f32.mrf.mxu1 }
 0x30a   : > { %v3320_v56 = vadd.f32 %v3231_v45, %v8069_v6  ;;  %v6052_v23 = vpop.f32.mrf.mxu0  ;;  %v8203_v16 = vadd.f32 %v6049_v47, %v3322_v18 }
 0x30b   : > { %v6018_v29 = vpop.f32.mrf.mxu1  ;;  %6221 = vmatmul.mubr.msk.bf16.gmra.mxu1 %vm355_vm1, %v8067_v17 }
 0x30c   : > { %v3325_v11 = vadd.f32 %v6018_v29, %v8077_v0  ;;  %v3544_v60 = vpop.f32.mrf.mxu0  ;;  %6224 = vmatprep.mubr.msk.bf16.mxu1 %vm355_vm1, %v8085_v32  ;;  %v8210_v7 = vadd.f32 %v3531_v62, %v3320_v56  ;;  %v4076_v56 = vld [vmem:[#allocation2 + $0x1a2] sm:$0xff] }
 0x30d   : > { %v3244_v44 = vpop.f32.mrf.mxu1 }
 0x30e   : > { %v3323_v43 = vadd.f32 %v3244_v44, %v8081_v31  ;;  %v6053_v20 = vpop.f32.mrf.mxu0  ;;  %v8213_v6 = vadd.f32 %v6052_v23, %v3325_v11 }
 0x30f   : > { %v6019_v36 = vpop.f32.mrf.mxu1 }
 0x310   : > { %v3326_v58 = vadd.f32 %v6019_v36, %v8083_v50  ;;  %v3547_v63 = vpop.f32.mrf.mxu0  ;;  %v8216_v22 = vadd.f32 %v3544_v60, %v3323_v43 }
 0x311   : > { %v3247_v17 = vpop.f32.mrf.mxu1 }
 0x312   : > { %v3324_v0 = vadd.f32 %v3247_v17, %v8089_v12  ;;  %v6056_v38 = vpop.f32.mrf.mxu0  ;;  %v8219_v15 = vadd.f32 %v6053_v20, %v3326_v58 }
 0x313   : > { %v6022_v32 = vpop.f32.mrf.mxu1  ;;  %6225 = vmatmul.mubr.msk.bf16.gmra.mxu1 %vm355_vm1, %v8087_v53 }
 0x314   : > { %v3329_v31 = vadd.f32 %v6022_v32, %v8097_v1  ;;  %v3560_v42 = vpop.f32.mrf.mxu0  ;;  %6228 = vmatprep.mubr.msk.bf16.mxu1 %vm355_vm1, %v8105_v48  ;;  %v8226_v50 = vadd.f32 %v3547_v63, %v3324_v0 }
 0x315   : > { %v3260_v52 = vpop.f32.mrf.mxu1 }
 0x316   : > { %v3327_v27 = vadd.f32 %v3260_v52, %v8101_v33  ;;  %v6057_v37 = vpop.f32.mrf.mxu0  ;;  %v8229_v12 = vadd.f32 %v6056_v38, %v3329_v31 }
 0x317   : > { %v6023_v55 = vpop.f32.mrf.mxu1 }
 0x318   : > { %v3330_v3 = vadd.f32 %v6023_v55, %v8103_v5  ;;  %v3563_v47 = vpop.f32.mrf.mxu0  ;;  %v8232_v24 = vadd.f32 %v3560_v42, %v3327_v27  ;;  %v4075_v5 = vld [vmem:[#allocation2 + $0x19a] sm:$0xff] }
 0x319   : > { %v3263_v53 = vpop.f32.mrf.mxu1  ;;  %v4094_v43 = vpack.c.bf16 %v4076_v56, %v4075_v5 }
 0x31a   : > { %v3328_v1 = vadd.f32 %v3263_v53, %v8109_v61  ;;  %v6060_v18 = vpop.f32.mrf.mxu0  ;;  %v8235_v62 = vadd.f32 %v6057_v37, %v3330_v3 }
 0x31b   : > { %v6026_v48 = vpop.f32.mrf.mxu1  ;;  %6229 = vmatmul.mubr.msk.bf16.gmra.mxu1 %vm355_vm1, %v8107_v46 }
 0x31c   : > { %v3333_v33 = vadd.f32 %v6026_v48, %v8117_v54  ;;  %v3576_v45 = vpop.f32.mrf.mxu0  ;;  %6232 = vmatprep.mubr.msk.bf16.mxu1 %vm355_vm1, %v8125_v28  ;;  %v8242_v23 = vadd.f32 %v3563_v47, %v3328_v1 }
 0x31d   : > { %v3276_v29 = vpop.f32.mrf.mxu1 }
 0x31e   : > { %v3331_v61 = vadd.f32 %v3276_v29, %v8121_v2  ;;  %v6061_v11 = vpop.f32.mrf.mxu0  ;;  %v8245_v60 = vadd.f32 %v6060_v18, %v3333_v33 }
 0x31f   : > { %v6027_v44 = vpop.f32.mrf.mxu1 }
 0x320   : > { %v3334_v46 = vadd.f32 %v6027_v44, %v8123_v4  ;;  %v3579_v20 = vpop.f32.mrf.mxu0  ;;  %v8248_v54 = vadd.f32 %v3576_v45, %v3331_v61 }
 0x321   : > { %v3279_v36 = vpop.f32.mrf.mxu1 }
 0x322   : > { %v3332_v28 = vadd.f32 %v3279_v36, %v8127_v21  ;;  %v6064_v58 = vpop.f32.mrf.mxu0  ;;  %v8251_v63 = vadd.f32 %v6061_v11, %v3334_v46 }
 0x323   : > { %v6030_v17 = vpop.f32.mrf.mxu1  ;;  %6233 = vmatmul.mubr.msk.bf16.gmra.mxu1 %vm355_vm1, %v4094_v43 }
 0x324   : > { %v3337_v2 = vadd.f32 %v6030_v17, %v8133_v14  ;;  %v3592_v0 = vpop.f32.mrf.mxu0  ;;  %v8255_v38 = vadd.f32 %v3579_v20, %v3332_v28 }
 0x325   : > { %v3292_v32 = vpop.f32.mrf.mxu1 }
 0x326   : > { %v3335_v4 = vadd.f32 %v3292_v32, %v8137_v9  ;;  %v6065_v31 = vpop.f32.mrf.mxu0  ;;  %v8258_v42 = vadd.f32 %v6064_v58, %v3337_v2 }
 0x327   : > { %v6031_v52 = vpop.f32.mrf.mxu1 }
 0x328   : > { %v3338_v21 = vadd.f32 %v6031_v52, %v8139_v35  ;;  %v3595_v27 = vpop.f32.mrf.mxu0  ;;  %v8261_v37 = vadd.f32 %v3592_v0, %v3335_v4 }
 0x329   : > { %v3295_v55 = vpop.f32.mrf.mxu1 }
 0x32a   : > { %v3336_v3 = vadd.f32 %v3295_v55, %v8141_v39  ;;  %v8264_v47 = vpop.f32.mrf.mxu0  ;;  %v8266_v14 = vadd.f32 %v6065_v31, %v3338_v21 }
 0x32b   : > { %v6070_v53 = vpop.f32.mrf.mxu1 }
 0x32c   : > { %v8269_v1 = vadd.f32 %v6070_v53, %v8149_v10  ;;  %v8271_v9 = vpop.f32.mrf.mxu0  ;;  %v8273_v18 = vadd.f32 %v3595_v27, %v3336_v3 }
 0x32d   : > { %v3681_v48 = vpop.f32.mrf.mxu1 }
 0x32e   : > { %v8276_v35 = vadd.f32 %v3681_v48, %v8152_v34  ;;  %v8278_v33 = vpop.f32.mrf.mxu0 }
 0x32f   : > { %v6071_v45 = vpop.f32.mrf.mxu1 }
 0x330   : > { %v8281_v39 = vadd.f32 %v6071_v45, %v8155_v49  ;;  %v8283_v5 = vpop.f32.mrf.mxu0 }
 0x331   : > { %v3684_v56 = vpop.f32.mrf.mxu1 }
 0x332   : > { %v8286_v10 = vadd.f32 %v3684_v56, %v8162_v8  ;;  %v8288_v29 = vpop.f32.mrf.mxu0 }
 0x333   : > { %v6074_v61 = vpop.f32.mrf.mxu1 }
 0x334   : > { %v8291_v11 = vadd.f32 %v6074_v61, %v8165_v59  ;;  %v8293_v34 = vpop.f32.mrf.mxu0 }
 0x335   : > { %v3697_v44 = vpop.f32.mrf.mxu1 }
 0x336   : > { %v8296_v43 = vadd.f32 %v3697_v44, %v8168_v19  ;;  %v8298_v49 = vpop.f32.mrf.mxu0 }
 0x337   : > { %v6075_v46 = vpop.f32.mrf.mxu1 }
 0x338   : > { %v8301_v20 = vadd.f32 %v6075_v46, %v8171_v51  ;;  %v8303_v8 = vpop.f32.mrf.mxu0 }
 0x339   : > { %v3700_v36 = vpop.f32.mrf.mxu1 }
 0x33a   : > { %v8306_v28 = vadd.f32 %v3700_v36, %v8178_v41  ;;  %v8308_v59 = vpop.f32.mrf.mxu0 }
 0x33b   : > { %v6078_v58 = vpop.f32.mrf.mxu1 }
 0x33c   : > { %v8311_v17 = vadd.f32 %v6078_v58, %v8181_v30  ;;  %v8313_v19 = vpop.f32.mrf.mxu0 }
 0x33d   : > { %v3713_v2 = vpop.f32.mrf.mxu1 }
 0x33e   : > { %v8316_v0 = vadd.f32 %v3713_v2, %v8184_v57  ;;  %v8318_v51 = vpop.f32.mrf.mxu0 }
 0x33f   : > { %v6079_v32 = vpop.f32.mrf.mxu1 }
 0x340   : > { %v8321_v4 = vadd.f32 %v6079_v32, %v8187_v13  ;;  %v8323_v41 = vpop.f32.mrf.mxu0 }
 0x341   : > { %v3716_v31 = vpop.f32.mrf.mxu1 }
 0x342   : > { %v8326_v52 = vadd.f32 %v3716_v31, %v8194_v25  ;;  %v8328_v30 = vpop.f32.mrf.mxu0 }
 0x343   : > { %v6082_v21 = vpop.f32.mrf.mxu1 }
 0x344   : > { %v8331_v27 = vadd.f32 %v6082_v21, %v8197_v26  ;;  %v8333_v57 = vpop.f32.mrf.mxu0 }
 0x345   : > { %v3729_v55 = vpop.f32.mrf.mxu1 }
 0x346   : > { %v8336_v3 = vadd.f32 %v3729_v55, %v8200_v40  ;;  %v8338_v13 = vpop.f32.mrf.mxu0 }
 0x347   : > { %9006 = vst [vmem:[#allocation19_spill] sm:$0xff] %v8338_v13  ;;  %v6083_v53 = vpop.f32.mrf.mxu1 }
 0x348   : > { %v8341_v48 = vadd.f32 %v6083_v53, %v8203_v16  ;;  %v8343_v25 = vpop.f32.mrf.mxu0 }
 0x349   : > { %9008 = vst [vmem:[#allocation24_spill] sm:$0xff] %v8343_v25  ;;  %v3732_v45 = vpop.f32.mrf.mxu1 }
 0x34a   : > { %9007 = vst [vmem:[#allocation25_spill] sm:$0xff] %v8341_v48  ;;  %v8346_v56 = vadd.f32 %v3732_v45, %v8210_v7  ;;  %v8348_v26 = vpop.f32.mrf.mxu0 }
 0x34b   : > { %9010 = vst [vmem:[#allocation34_spill] sm:$0xff] %v8348_v26  ;;  %v6086_v61 = vpop.f32.mrf.mxu1 }
 0x34c   : > { %9009 = vst [vmem:[#allocation35_spill] sm:$0xff] %v8346_v56  ;;  %v8351_v44 = vadd.f32 %v6086_v61, %v8213_v6  ;;  %v8353_v40 = vpop.f32.mrf.mxu0 }
 0x34d   : > { %9012 = vst [vmem:[#allocation82_spill] sm:$0xff] %v8353_v40  ;;  %v3745_v46 = vpop.f32.mrf.mxu1 }
 0x34e   : > { %9011 = vst [vmem:[#allocation76_spill] sm:$0xff] %v8351_v44  ;;  %v8356_v36 = vadd.f32 %v3745_v46, %v8216_v22  ;;  %v8358_v16 = vpop.f32.mrf.mxu0 }
 0x34f   : > { %9014 = vst [vmem:[#allocation37_spill] sm:$0xff] %v8358_v16  ;;  %v6087_v58 = vpop.f32.mrf.mxu1 }
 0x350   : > { %9013 = vst [vmem:[#allocation26_spill] sm:$0xff] %v8356_v36  ;;  %v8361_v2 = vadd.f32 %v6087_v58, %v8219_v15  ;;  %v8363_v7 = vpop.f32.mrf.mxu0 }
 0x351   : > { %9016 = vst [vmem:[#allocation41_spill] sm:$0xff] %v8363_v7  ;;  %v3748_v32 = vpop.f32.mrf.mxu1 }
 0x352   : > { %9015 = vst [vmem:[#allocation36_spill] sm:$0xff] %v8361_v2  ;;  %v8366_v31 = vadd.f32 %v3748_v32, %v8226_v50  ;;  %v8368_v6 = vpop.f32.mrf.mxu0 }
 0x353   : > { %9018 = vst [vmem:[#allocation85_spill] sm:$0xff] %v8368_v6  ;;  %v6090_v21 = vpop.f32.mrf.mxu1 }
 0x354   : > { %9017 = vst [vmem:[#allocation77_spill] sm:$0xff] %v8366_v31  ;;  %v8371_v55 = vadd.f32 %v6090_v21, %v8229_v12  ;;  %v8373_v22 = vpop.f32.mrf.mxu0 }
 0x355   : > { %9020 = vst [vmem:[#allocation38_spill] sm:$0xff] %v8373_v22  ;;  %v3761_v53 = vpop.f32.mrf.mxu1 }
 0x356   : > { %9019 = vst [vmem:[#allocation39_spill] sm:$0xff] %v8371_v55  ;;  %v8376_v45 = vadd.f32 %v3761_v53, %v8232_v24  ;;  %v8378_v15 = vpop.f32.mrf.mxu0 }
 0x357   : > { %9022 = vst [vmem:[#allocation40_spill] sm:$0xff] %v8378_v15  ;;  %v6091_v61 = vpop.f32.mrf.mxu1 }
 0x358   : > { %9021 = vst [vmem:[#allocation78_spill] sm:$0xff] %v8376_v45  ;;  %v8381_v46 = vadd.f32 %v6091_v61, %v8235_v62  ;;  %v8383_v50 = vpop.f32.mrf.mxu0 }
 0x359   : > { %9024 = vst [vmem:[#allocation90_spill] sm:$0xff] %v8383_v50  ;;  %v3764_v58 = vpop.f32.mrf.mxu1 }
 0x35a   : > { %9023 = vst [vmem:[#allocation42_spill] sm:$0xff] %v8381_v46  ;;  %v8386_v32 = vadd.f32 %v3764_v58, %v8242_v23  ;;  %v8388_v12 = vpop.f32.mrf.mxu0 }
 0x35b   : > { %9026 = vst [vmem:[#allocation79_spill] sm:$0xff] %v8388_v12  ;;  %v6094_v21 = vpop.f32.mrf.mxu1 }
 0x35c   : > { %9025 = vst [vmem:[#allocation75_spill] sm:$0xff] %v8386_v32  ;;  %v8391_v22 = vadd.f32 %v6094_v21, %v8245_v60  ;;  %v8393_v24 = vpop.f32.mrf.mxu0 }
 0x35d   : > { %9028 = vst [vmem:[#allocation44_spill] sm:$0xff] %v8393_v24  ;;  %v3777_v53 = vpop.f32.mrf.mxu1 }
 0x35e   : > { %9027 = vst [vmem:[#allocation27_spill] sm:$0xff] %v8391_v22  ;;  %v8396_v15 = vadd.f32 %v3777_v53, %v8248_v54  ;;  %v8398_v62 = vpop.f32.mrf.mxu0 }
 0x35f   : > { %9030 = vst [vmem:[#allocation80_spill] sm:$0xff] %v8398_v62  ;;  %v6095_v61 = vpop.f32.mrf.mxu1 }
 0x360   : > { %9029 = vst [vmem:[#allocation43_spill] sm:$0xff] %v8396_v15  ;;  %v8401_v50 = vadd.f32 %v6095_v61, %v8251_v63  ;;  %v8403_v23 = vpop.f32.mrf.mxu0 }
 0x361   : > { %9032 = vst [vmem:[#allocation46_spill] sm:$0xff] %v8403_v23  ;;  %v3780_v58 = vpop.f32.mrf.mxu1 }
 0x362   : > { %9031 = vst [vmem:[#allocation93_spill] sm:$0xff] %v8401_v50  ;;  %v8406_v12 = vadd.f32 %v3780_v58, %v8255_v38  ;;  %v8408_v60 = vpop.f32.mrf.mxu0 }
 0x363   : > { %9034 = vst [vmem:[#allocation49_spill] sm:$0xff] %v8408_v60  ;;  %v6098_v21 = vpop.f32.mrf.mxu1 }
 0x364   : > { %9033 = vst [vmem:[#allocation45_spill] sm:$0xff] %v8406_v12  ;;  %v8411_v24 = vadd.f32 %v6098_v21, %v8258_v42  ;;  %v8413_v54 = vpop.f32.mrf.mxu0 }
 0x365   : > { %9036 = vst [vmem:[#allocation96_spill] sm:$0xff] %v8413_v54  ;;  %v3793_v53 = vpop.f32.mrf.mxu1 }
 0x366   : > { %9035 = vst [vmem:[#allocation81_spill] sm:$0xff] %v8411_v24  ;;  %v8416_v62 = vadd.f32 %v3793_v53, %v8261_v37  ;;  %v8418_v63 = vpop.f32.mrf.mxu0 }
 0x367   : > { %9038 = vst [vmem:[#allocation48_spill] sm:$0xff] %v8418_v63  ;;  %v6099_v61 = vpop.f32.mrf.mxu1 }
 0x368   : > { %9037 = vst [vmem:[#allocation28_spill] sm:$0xff] %v8416_v62  ;;  %v8421_v23 = vadd.f32 %v6099_v61, %v8266_v14  ;;  %v8423_v38 = vpop.f32.mrf.mxu0 }
 0x369   : > { %9040 = vst [vmem:[#allocation83_spill] sm:$0xff] %v8423_v38  ;;  %v3796_v58 = vpop.f32.mrf.mxu1 }
 0x36a   : > { %9039 = vst [vmem:[#allocation47_spill] sm:$0xff] %v8421_v23  ;;  %v8426_v60 = vadd.f32 %v3796_v58, %v8273_v18  ;;  %v6172_v42 = vpop.f32.mrf.mxu0 }
 0x36b   : > { %v6138_v21 = vpop.f32.mrf.mxu1 }
 0x36c   : > { %9041 = vst [vmem:[#allocation50_spill] sm:$0xff] %v8426_v60  ;;  %v4383_v54 = vpop.f32.mrf.mxu0 }
 0x36d   : > { %v4182_v24 = vpop.f32.mrf.mxu1 }
 0x36e   : > { %v8428_v37 = vpop.f32.mrf.mxu0 }
 0x36f   : > { %v6139_v12 = vpop.f32.mrf.mxu1 }
 0x370   : > { %v8432_v62 = vpop.f32.mrf.mxu0 }
 0x371   : > { %v4185_v50 = vpop.f32.mrf.mxu1 }
 0x372   : > { %v8438_v38 = vpop.f32.mrf.mxu0 }
 0x373   : > { %v6142_v53 = vpop.f32.mrf.mxu1 }
 0x374   : > { %v8444_v60 = vpop.f32.mrf.mxu0 }
 0x375   : > { %v8430_v63 = vpop.f32.mrf.mxu1 }
 0x376   : > { %v8450_v22 = vpop.f32.mrf.mxu0 }
 0x377   : > { %v8434_v14 = vpop.f32.mrf.mxu1 }
 0x378   : > { %v8456_v45 = vpop.f32.mrf.mxu0 }
 0x379   : > { %v8436_v61 = vpop.f32.mrf.mxu1 }
 0x37a   : > { %v8462_v7 = vpop.f32.mrf.mxu0 }
 0x37b   : > { %v8440_v18 = vpop.f32.mrf.mxu1 }
 0x37c   : > { %v8468_v2 = vpop.f32.mrf.mxu0 }
 0x37d   : > { %v8442_v58 = vpop.f32.mrf.mxu1 }
 0x37e   : > { %v8474_v26 = vpop.f32.mrf.mxu0 }
 0x37f   : > { %v8446_v23 = vpop.f32.mrf.mxu1 }
 0x380   : > { %v8480_v56 = vpop.f32.mrf.mxu0 }
 0x381   : > { %v8448_v15 = vpop.f32.mrf.mxu1 }
 0x383   : > { %v8452_v32 = vpop.f32.mrf.mxu1 }
 0x385   : > { %v8454_v46 = vpop.f32.mrf.mxu1 }
 0x387   : > { %v8458_v6 = vpop.f32.mrf.mxu1 }
 0x388   : > { %9042 = vst [vmem:[#allocation84_spill] sm:$0xff] %v8458_v6 }
 0x389   : > { %v8460_v55 = vpop.f32.mrf.mxu1 }
 0x38a   : > { %9043 = vst [vmem:[#allocation29_spill] sm:$0xff] %v8460_v55 }
 0x38b   : > { %v8464_v31 = vpop.f32.mrf.mxu1 }
 0x38c   : > { %9044 = vst [vmem:[#allocation52_spill] sm:$0xff] %v8464_v31  ;;  %v8486_v31 = vpop.f32.mrf.mxu0 }
 0x38d   : > { %v8466_v16 = vpop.f32.mrf.mxu1  ;;  %9052 = vst [vmem:[#allocation87_spill] sm:$0xff] %v8486_v31 }
 0x38e   : > { %9045 = vst [vmem:[#allocation51_spill] sm:$0xff] %v8466_v16 }
 0x38f   : > { %v8470_v40 = vpop.f32.mrf.mxu1 }
 0x390   : > { %9046 = vst [vmem:[#allocation86_spill] sm:$0xff] %v8470_v40  ;;  %v8492_v40 = vpop.f32.mrf.mxu0 }
 0x391   : > { %v8472_v36 = vpop.f32.mrf.mxu1  ;;  %9055 = vst [vmem:[#allocation55_spill] sm:$0xff] %v8492_v40 }
 0x392   : > { %9047 = vst [vmem:[#allocation20_spill] sm:$0xff] %v8472_v36 }
 0x393   : > { %v8476_v44 = vpop.f32.mrf.mxu1 }
 0x394   : > { %9048 = vst [vmem:[#allocation21_spill] sm:$0xff] %v8476_v44  ;;  %v8498_v44 = vpop.f32.mrf.mxu0 }
 0x395   : > { %v8478_v25 = vpop.f32.mrf.mxu1  ;;  %9058 = vst [vmem:[#allocation89_spill] sm:$0xff] %v8498_v44 }
 0x396   : > { %9049 = vst [vmem:[#allocation54_spill] sm:$0xff] %v8478_v25 }
 0x397   : > { %v8482_v55 = vpop.f32.mrf.mxu1 }
 0x398   : > { %9050 = vst [vmem:[#allocation53_spill] sm:$0xff] %v8482_v55  ;;  %v4011_v55 = vadd.f32 %v8264_v47, %v8269_v1  ;;  %v4010_v47 = vadd.f32 %v8283_v5, %v8286_v10  ;;  %v4013_v5 = vadd.f32 %v8293_v34, %v8296_v43 }
 0x399   : > { %v8484_v6 = vpop.f32.mrf.mxu1 }
 0x39a   : > { %9051 = vst [vmem:[#allocation57_spill] sm:$0xff] %v8484_v6  ;;  %v4311_v31 = vadd.f32 %v6138_v21, %v4011_v55 }
 0x39b   : > { %v8488_v16 = vpop.f32.mrf.mxu1 }
 0x39c   : > { %9053 = vst [vmem:[#allocation30_spill] sm:$0xff] %v8488_v16  ;;  %v4009_v16 = vadd.f32 %v8271_v9, %v8276_v35  ;;  %v4512_v55 = vadd.f32 %v6172_v42, %v4311_v31  ;;  %v4015_v9 = vadd.f32 %v8288_v29, %v8291_v11  ;;  %v9063_v42 = vld [vmem:[#allocation3_spill] sm:$0xff] }
 0x39d   : > { %v8490_v13 = vpop.f32.mrf.mxu1 }
 0x39e   : > { %9054 = vst [vmem:[#allocation56_spill] sm:$0xff] %v8490_v13  ;;  %v8508_v13 = vpop.f32.mrf.mxu0 }
 0x39f   : > { %v8494_v36 = vpop.f32.mrf.mxu1 }
 0x3a0   : > { %9056 = vst [vmem:[#allocation88_spill] sm:$0xff] %v8494_v36  ;;  %v4309_v36 = vadd.f32 %v4182_v24, %v4009_v16  ;;  %v8518_v1 = vpop.f32.mrf.mxu0  ;;  %v8525_v16 = vld [vmem:[%s8791_s4] ss:$0 sm:$0xff]  ;;  %v9062_v24 = vld [vmem:[#allocation4_spill] sm:$0xff] }
 0x3a1   : > { %v8496_v48 = vpop.f32.mrf.mxu1  ;;  %v4784_v21 = vunpack.c.l.bf16 %v9062_v24 }
 0x3a2   : > { %9057 = vst [vmem:[#allocation58_spill] sm:$0xff] %v8496_v48  ;;  %v4012_v48 = vadd.f32 %v8278_v33, %v8281_v39  ;;  %v4310_v33 = vadd.f32 %v4185_v50, %v4010_v47  ;;  %v8530_v31 = vpop.f32.mrf.mxu0  ;;  %v4313_v50 = vadd.f32 %v8430_v63, %v4013_v5 }
 0x3a3   : > { %v8500_v25 = vpop.f32.mrf.mxu1 }
 0x3a4   : > { %9059 = vst [vmem:[#allocation31_spill] sm:$0xff] %v8500_v25  ;;  %v4312_v25 = vadd.f32 %v6139_v12, %v4012_v48  ;;  %v4510_v48 = vadd.f32 %v4383_v54, %v4309_v36  ;;  %v4315_v12 = vadd.f32 %v6142_v53, %v4015_v9  ;;  %v4016_v36 = vadd.f32 %v8298_v49, %v8301_v20  ;;  %v8552_v63 = vpop.f32.mrf.mxu0 }
 0x3a5   : > { %v8504_v6 = vpop.f32.mrf.mxu1  ;;  %v4785_v53 = vunpack.c.h.bf16 %v9062_v24  ;;  %v4783_v20 = vunpack.c.h.bf16 %v9063_v42 }
 0x3a6   : > { %v4316_v9 = vadd.f32 %v8434_v14, %v4016_v36 }
 0x3a7   : > { %v8510_v40 = vpop.f32.mrf.mxu1 }
 0x3a8   : > { %9060 = vst [vmem:[#allocation60_spill] sm:$0xff] %v8510_v40  ;;  %v4513_v40 = vadd.f32 %v8428_v37, %v4312_v25  ;;  %v4516_v25 = vadd.f32 %v8438_v38, %v4315_v12 }
 0x3a9   : > { %v8514_v44 = vpop.f32.mrf.mxu1 }
 0x3aa   : > { %9061 = vst [vmem:[#allocation59_spill] sm:$0xff] %v8514_v44  ;;  %v4782_v44 = vunpack.c.l.bf16 %v9063_v42 }
 0x3ab   : > { %v6206_v35 = vpop.f32.mrf.mxu1 }
 0x3ac   : > { %v4713_v39 = vadd.f32 %v6206_v35, %v4512_v55  ;;  %v4511_v55 = vadd.f32 %v8432_v62, %v4310_v33  ;;  %v4014_v35 = vadd.f32 %v8303_v8, %v8306_v28  ;;  %v4019_v28 = vadd.f32 %v8308_v59, %v8311_v17  ;;  %v9065_v59 = vld [vmem:[#allocation5_spill] sm:$0xff] }
 0x3ad   : > { %v4584_v10 = vpop.f32.mrf.mxu1  ;;  %v4786_v17 = vunpack.c.l.bf16 %v9065_v59 }
 0x3ae   : > { %v4752_v29 = vadd.f32 %v8525_v16, %v4713_v39  ;;  %v4711_v11 = vadd.f32 %v4584_v10, %v4510_v48  ;;  %v4314_v8 = vadd.f32 %v8436_v61, %v4014_v35  ;;  %v9064_v39 = vld [vmem:[#allocation6_spill] sm:$0xff]  ;;  %v4319_v5 = vadd.f32 %v8440_v18, %v4019_v28 }
 0x3af   : > { %v6207_v54 = vpop.f32.mrf.mxu1  ;;  %v4788_v24 = vunpack.c.l.bf16 %v9064_v39  ;;  %v4017_v61 = vadd.f32 %v8313_v19, %v8316_v0  ;;  %v4020_v19 = vadd.f32 %v8318_v51, %v8321_v4  ;;  %v4787_v51 = vunpack.c.h.bf16 %v9065_v59 }
 0x3b0   : > { %v4816_v34 = vadd.f32 %v4784_v21, %v4752_v29  ;;  %v4750_v43 = vadd.f32 %v8525_v16, %v4711_v11  ;;  %v4714_v47 = vadd.f32 %v6207_v54, %v4513_v40  ;;  %v4514_v21 = vadd.f32 %v8444_v60, %v4313_v50  ;;  %v8568_v11 = vpop.f32.mrf.mxu0 }
 0x3b1   : > { %v4587_v49 = vpop.f32.mrf.mxu1  ;;  %v4517_v29 = vadd.f32 %v8450_v22, %v4316_v9  ;;  %v4317_v18 = vadd.f32 %v8442_v58, %v4017_v61  ;;  %v4789_v54 = vunpack.c.h.bf16 %v9064_v39  ;;  %v4515_v22 = vadd.f32 %v8456_v45, %v4314_v8 }
 0x3b2   : > { %v4848_v40 = vmax.f32 %v4816_v34, 0.0  ;;  %v4814_v62 = vadd.f32 %v4782_v44, %v4750_v43  ;;  %v4753_v37 = vadd.f32 %v8525_v16, %v4714_v47  ;;  %v4712_v14 = vadd.f32 %v4587_v49, %v4511_v55  ;;  %v8586_v35 = vpop.f32.mrf.mxu0 }
 0x3b3   : > { %v6210_v33 = vpop.f32.mrf.mxu1  ;;  %v4320_v55 = vadd.f32 %v8446_v23, %v4020_v19  ;;  %v4018_v58 = vadd.f32 %v8323_v41, %v8326_v52  ;;  %v4520_v4 = vadd.f32 %v8462_v7, %v4319_v5  ;;  %v4023_v41 = vadd.f32 %v8328_v30, %v8331_v27  ;;  %v9067_v30 = vld [vmem:[#allocation7_spill] sm:$0xff] }
 0x3b4   : > { %4880 = vst.msk [vmem:[%s8548_s20 + $0x10] sm:$0xff] %vm355_vm1, %v4848_v40  ;;  %v4846_v38 = vmax.f32 %v4814_v62, 0.0  ;;  %v4817_v48 = vadd.f32 %v4785_v53, %v4753_v37  ;;  %v4751_v44 = vadd.f32 %v8525_v16, %v4712_v14  ;;  %v4717_v12 = vadd.f32 %v6210_v33, %v4516_v25  ;;  %v9066_v40 = vld [vmem:[#allocation8_spill] sm:$0xff]  ;;  %v9069_v5 = vld [vmem:[#allocation19_spill] sm:$0xff] }
 0x3b5   : > { %v4600_v10 = vpop.f32.mrf.mxu1  ;;  %v4318_v23 = vadd.f32 %v8448_v15, %v4018_v58  ;;  %v4792_v62 = vunpack.c.l.bf16 %v9066_v40  ;;  %v4518_v7 = vadd.f32 %v8468_v2, %v4317_v18  ;;  %v4323_v33 = vadd.f32 %v8452_v32, %v4023_v41  ;;  %v9075_v58 = vld [vmem:[#allocation76_spill] sm:$0xff] }
 0x3b6   : > { %4878 = vst.msk [vmem:[%s8548_s20] sm:$0xff] %vm355_vm1, %v4846_v38  ;;  %v4849_v60 = vmax.f32 %v4817_v48, 0.0  ;;  %v4815_v42 = vadd.f32 %v4783_v20, %v4751_v44  ;;  %v4756_v50 = vadd.f32 %v8525_v16, %v4717_v12  ;;  %v4715_v36 = vadd.f32 %v4600_v10, %v4514_v21  ;;  %v8604_v21 = vpop.f32.mrf.mxu0  ;;  %v9068_v12 = vld [vmem:[#allocation25_spill] sm:$0xff] }
 0x3b7   : > { %v6211_v0 = vpop.f32.mrf.mxu1  ;;  %v4021_v15 = vadd.f32 %v8333_v57, %v8336_v3  ;;  %v4790_v27 = vunpack.c.l.bf16 %v9067_v30  ;;  %v4024_v57 = vadd.f32 %v9069_v5, %v9068_v12  ;;  %v4793_v61 = vunpack.c.h.bf16 %v9066_v40  ;;  %v9085_v12 = vld [vmem:[#allocation36_spill] sm:$0xff]  ;;  %v9086_v5 = vld [vmem:[#allocation37_spill] sm:$0xff] }
 0x3b8   : > { %4881 = vst.msk [vmem:[%s8548_s20 + $0x18] sm:$0xff] %vm355_vm1, %v4849_v60  ;;  %v4847_v53 = vmax.f32 %v4815_v42, 0.0  ;;  %v4820_v34 = vadd.f32 %v4788_v24, %v4756_v50  ;;  %v4754_v43 = vadd.f32 %v8525_v16, %v4715_v36  ;;  %v4718_v47 = vadd.f32 %v6211_v0, %v4517_v29  ;;  %v9070_v60 = vld [vmem:[#allocation84_spill] sm:$0xff]  ;;  %v9071_v50 = vld [vmem:[#allocation35_spill] sm:$0xff] }
 0x3b9   : > { %v4603_v9 = vpop.f32.mrf.mxu1  ;;  %v4521_v24 = vadd.f32 %v8474_v26, %v4320_v55  ;;  %v4321_v32 = vadd.f32 %v8454_v46, %v4021_v15  ;;  %v4519_v26 = vadd.f32 %v8480_v56, %v4318_v23  ;;  %v4324_v42 = vadd.f32 %v9070_v60, %v4024_v57  ;;  %v9072_v46 = vld [vmem:[#allocation24_spill] sm:$0xff]  ;;  %v9073_v0 = vld [vmem:[#allocation87_spill] sm:$0xff]  ;;  %v9087_v60 = vld [vmem:[#allocation86_spill] sm:$0xff] }
 0x3ba   : > { %4879 = vst.msk [vmem:[%s8548_s20 + $0x8] sm:$0xff] %vm355_vm1, %v4847_v53  ;;  %v4852_v45 = vmax.f32 %v4820_v34, 0.0  ;;  %v4818_v49 = vadd.f32 %v4786_v17, %v4754_v43  ;;  %v4757_v20 = vadd.f32 %v8525_v16, %v4718_v47  ;;  %v4716_v25 = vadd.f32 %v4603_v9, %v4515_v22  ;;  %v8622_v22 = vpop.f32.mrf.mxu0  ;;  %v9074_v47 = vld [vmem:[#allocation29_spill] sm:$0xff]  ;;  %v9076_v9 = vld [vmem:[#allocation34_spill] sm:$0xff] }
 0x3bb   : > { %v6214_v52 = vpop.f32.mrf.mxu1  ;;  %v4022_v36 = vadd.f32 %v9072_v46, %v9071_v50  ;;  %v4791_v19 = vunpack.c.h.bf16 %v9067_v30  ;;  %v4028_v57 = vadd.f32 %v9086_v5, %v9085_v12  ;;  %v9088_v50 = vld [vmem:[#allocation77_spill] sm:$0xff] }
 0x3bc   : > { %4884 = vst.msk [vmem:[%s8548_s20 + $0x30] sm:$0xff] %vm355_vm1, %v4852_v45  ;;  %v4850_v37 = vmax.f32 %v4818_v49, 0.0  ;;  %v4821_v14 = vadd.f32 %v4789_v54, %v4757_v20  ;;  %v4755_v8 = vadd.f32 %v8525_v16, %v4716_v25  ;;  %v4721_v28 = vadd.f32 %v6214_v52, %v4520_v4  ;;  %v9077_v45 = vld [vmem:[#allocation10_spill] sm:$0xff]  ;;  %v9078_v20 = vld [vmem:[#allocation55_spill] sm:$0xff]  ;;  %v9089_v46 = vld [vmem:[#allocation41_spill] sm:$0xff] }
 0x3bd   : > { %v4616_v39 = vpop.f32.mrf.mxu1  ;;  %v4524_v54 = vadd.f32 %v9073_v0, %v4323_v33  ;;  %v4322_v55 = vadd.f32 %v9074_v47, %v4022_v36  ;;  %v4796_v49 = vunpack.c.l.bf16 %v9077_v45  ;;  %v4522_v25 = vadd.f32 %v9078_v20, %v4321_v32  ;;  %v9082_v33 = vld [vmem:[#allocation9_spill] sm:$0xff] }
 0x3be   : > { %4882 = vst.msk [vmem:[%s8548_s20 + $0x20] sm:$0xff] %vm355_vm1, %v4850_v37  ;;  %v4853_v2 = vmax.f32 %v4821_v14, 0.0  ;;  %v4819_v38 = vadd.f32 %v4787_v51, %v4755_v8  ;;  %v4760_v48 = vadd.f32 %v8525_v16, %v4721_v28  ;;  %v4719_v44 = vadd.f32 %v4616_v39, %v4518_v7  ;;  %v9080_v37 = vld [vmem:[#allocation26_spill] sm:$0xff]  ;;  %v9083_v39 = vld [vmem:[#allocation89_spill] sm:$0xff] }
 0x3bf   : > { %v6215_v3 = vpop.f32.mrf.mxu1  ;;  %v4027_v51 = vadd.f32 %v9076_v9, %v9075_v58  ;;  %v9081_v14 = vld [vmem:[#allocation82_spill] sm:$0xff]  ;;  %v4794_v15 = vunpack.c.l.bf16 %v9082_v33  ;;  %v4525_v30 = vadd.f32 %v9083_v39, %v4324_v42  ;;  %v4328_v42 = vadd.f32 %v9087_v60, %v4028_v57  ;;  %v9092_v58 = vld [vmem:[#allocation85_spill] sm:$0xff] }
 0x3c0   : > { %4885 = vst.msk [vmem:[%s8548_s20 + $0x38] sm:$0xff] %vm355_vm1, %v4853_v2  ;;  %v4851_v10 = vmax.f32 %v4819_v38, 0.0  ;;  %v4824_v59 = vadd.f32 %v4792_v62, %v4760_v48  ;;  %v4758_v17 = vadd.f32 %v8525_v16, %v4719_v44  ;;  %v4722_v29 = vadd.f32 %v6215_v3, %v4521_v24  ;;  %v9079_v62 = vld [vmem:[#allocation52_spill] sm:$0xff]  ;;  %v9084_v44 = vld [vmem:[#allocation51_spill] sm:$0xff] }
 0x3c1   : > { %v4619_v18 = vpop.f32.mrf.mxu1  ;;  %v4327_v7 = vadd.f32 %v9079_v62, %v4027_v51  ;;  %v4025_v8 = vadd.f32 %v9081_v14, %v9080_v37  ;;  %v4026_v36 = vadd.f32 %v9089_v46, %v9088_v50  ;;  %v9096_v62 = vld [vmem:[#allocation38_spill] sm:$0xff]  ;;  %v9097_v14 = vld [vmem:[#allocation11_spill] sm:$0xff] }
 0x3c2   : > { %4883 = vst.msk [vmem:[%s8548_s20 + $0x28] sm:$0xff] %vm355_vm1, %v4851_v10  ;;  %v4856_v56 = vmax.f32 %v4824_v59, 0.0  ;;  %v4822_v53 = vadd.f32 %v4790_v27, %v4758_v17  ;;  %v4761_v34 = vadd.f32 %v8525_v16, %v4722_v29  ;;  %v4720_v43 = vadd.f32 %v4619_v18, %v4519_v26  ;;  %v8640_v27 = vpop.f32.mrf.mxu0 }
 0x3c3   : > { %v6218_v4 = vpop.f32.mrf.mxu1  ;;  %v4325_v32 = vadd.f32 %v9084_v44, %v4025_v8  ;;  %v4523_v26 = vadd.f32 %v8508_v13, %v4322_v55  ;;  %v4528_v0 = vadd.f32 %v8518_v1, %v4327_v7  ;;  %v9091_v55 = vld [vmem:[#allocation39_spill] sm:$0xff]  ;;  %v4798_v8 = vunpack.c.l.bf16 %v9097_v14 }
 0x3c4   : > { %4888 = vst.msk [vmem:[%s8548_s20 + $0x50] sm:$0xff] %vm355_vm1, %v4856_v56  ;;  %v4854_v23 = vmax.f32 %v4822_v53, 0.0  ;;  %v4825_v41 = vadd.f32 %v4793_v61, %v4761_v34  ;;  %v4759_v52 = vadd.f32 %v8525_v16, %v4720_v43  ;;  %v4725_v40 = vadd.f32 %v6218_v4, %v4524_v54  ;;  %v8658_v54 = vpop.f32.mrf.mxu0  ;;  %v9090_v43 = vld [vmem:[#allocation20_spill] sm:$0xff] }
 0x3c5   : > { %v4632_v28 = vpop.f32.mrf.mxu1  ;;  %v4797_v61 = vunpack.c.h.bf16 %v9077_v45  ;;  %v4326_v47 = vadd.f32 %v9090_v43, %v4026_v36  ;;  %v4031_v9 = vadd.f32 %v9092_v58, %v9091_v55  ;;  %v9093_v4 = vld [vmem:[#allocation12_spill] sm:$0xff]  ;;  %v4526_v1 = vadd.f32 %v8530_v31, %v4325_v32 }
 0x3c6   : > { %4886 = vst.msk [vmem:[%s8548_s20 + $0x40] sm:$0xff] %vm355_vm1, %v4854_v23  ;;  %v4857_v24 = vmax.f32 %v4825_v41, 0.0  ;;  %v4823_v2 = vadd.f32 %v4791_v19, %v4759_v52  ;;  %v4764_v38 = vadd.f32 %v8525_v16, %v4725_v40  ;;  %v4723_v48 = vadd.f32 %v4632_v28, %v4522_v25  ;;  %v9094_v41 = vld [vmem:[#allocation21_spill] sm:$0xff]  ;;  %v9095_v40 = vld [vmem:[#allocation78_spill] sm:$0xff] }
 0x3c7   : > { %v6219_v3 = vpop.f32.mrf.mxu1  ;;  %v4795_v19 = vunpack.c.h.bf16 %v9082_v33  ;;  %v4800_v45 = vunpack.c.l.bf16 %v9093_v4  ;;  %v4331_v52 = vadd.f32 %v9094_v41, %v4031_v9  ;;  %v4029_v7 = vadd.f32 %v9096_v62, %v9095_v40  ;;  %v8676_v33 = vpop.f32.mrf.mxu0  ;;  %v9111_v41 = vld [vmem:[#allocation13_spill] sm:$0xff] }
 0x3c8   : > { %4889 = vst.msk [vmem:[%s8548_s20 + $0x58] sm:$0xff] %vm355_vm1, %v4857_v24  ;;  %v4855_v10 = vmax.f32 %v4823_v2, 0.0  ;;  %v4828_v59 = vadd.f32 %v4796_v49, %v4764_v38  ;;  %v4762_v17 = vadd.f32 %v8525_v16, %v4723_v48  ;;  %v4726_v29 = vadd.f32 %v6219_v3, %v4525_v30  ;;  %v9098_v24 = vld [vmem:[#allocation54_spill] sm:$0xff]  ;;  %v9100_v48 = vld [vmem:[#allocation40_spill] sm:$0xff] }
 0x3c9   : > { %v4635_v18 = vpop.f32.mrf.mxu1  ;;  %v4529_v28 = vadd.f32 %v8552_v63, %v4328_v42  ;;  %v4329_v2 = vadd.f32 %v9098_v24, %v4029_v7  ;;  %v9099_v38 = vld [vmem:[#allocation42_spill] sm:$0xff]  ;;  %v4801_v12 = vunpack.c.h.bf16 %v9093_v4  ;;  %v4527_v63 = vadd.f32 %v8568_v11, %v4326_v47  ;;  %v6197_v46 = vpop.f32.mrf.mxu0 }
 0x3ca   : > { %4887 = vst.msk [vmem:[%s8548_s20 + $0x48] sm:$0xff] %vm355_vm1, %v4855_v10  ;;  %v4860_v13 = vmax.f32 %v4828_v59, 0.0  ;;  %v4826_v56 = vadd.f32 %v4794_v15, %v4762_v17  ;;  %v4765_v53 = vadd.f32 %v8525_v16, %v4726_v29  ;;  %v4724_v34 = vadd.f32 %v4635_v18, %v4523_v26  ;;  %v9101_v26 = vld [vmem:[#allocation53_spill] sm:$0xff]  ;;  %v9102_v59 = vld [vmem:[#allocation75_spill] sm:$0xff]  ;;  %v9103_v17 = vld [vmem:[#allocation90_spill] sm:$0xff] }
 0x3cb   : > { %v6222_v51 = vpop.f32.mrf.mxu1  ;;  %v4032_v44 = vadd.f32 %v9100_v48, %v9099_v38  ;;  %v4030_v29 = vadd.f32 %v9103_v17, %v9102_v59  ;;  %v4799_v42 = vunpack.c.h.bf16 %v9097_v14  ;;  %v4532_v50 = vadd.f32 %v8586_v35, %v4331_v52  ;;  %v9107_v47 = vld [vmem:[#allocation14_spill] sm:$0xff]  ;;  %v4482_v62 = vpop.f32.mrf.mxu0 }
 0x3cc   : > { %4892 = vst.msk [vmem:[%s8548_s20 + $0x70] sm:$0xff] %vm355_vm1, %v4860_v13  ;;  %v4858_v49 = vmax.f32 %v4826_v56, 0.0  ;;  %v4829_v20 = vadd.f32 %v4797_v61, %v4765_v53  ;;  %v4763_v25 = vadd.f32 %v8525_v16, %v4724_v34  ;;  %v4729_v23 = vadd.f32 %v6222_v51, %v4528_v0  ;;  %v9104_v0 = vld [vmem:[#allocation57_spill] sm:$0xff]  ;;  %v9105_v56 = vld [vmem:[#allocation27_spill] sm:$0xff] }
 0x3cd   : > { %v4648_v37 = vpop.f32.mrf.mxu1  ;;  %v4332_v10 = vadd.f32 %v9101_v26, %v4032_v44  ;;  %v4330_v13 = vadd.f32 %v9104_v0, %v4030_v29  ;;  %v9106_v53 = vld [vmem:[#allocation79_spill] sm:$0xff]  ;;  %v4804_v55 = vunpack.c.l.bf16 %v9107_v47  ;;  %v4530_v58 = vadd.f32 %v8604_v21, %v4329_v2 }
 0x3ce   : > { %4890 = vst.msk [vmem:[%s8548_s20 + $0x60] sm:$0xff] %vm355_vm1, %v4858_v49  ;;  %v4861_v31 = vmax.f32 %v4829_v20, 0.0  ;;  %v4827_v15 = vadd.f32 %v4795_v19, %v4763_v25  ;;  %v4768_v39 = vadd.f32 %v8525_v16, %v4729_v23  ;;  %v4727_v30 = vadd.f32 %v4648_v37, %v4526_v1  ;;  %v9109_v49 = vld [vmem:[#allocation43_spill] sm:$0xff]  ;;  %v9110_v20 = vld [vmem:[#allocation44_spill] sm:$0xff] }
 0x3cf   : > { %v6223_v32 = vpop.f32.mrf.mxu1  ;;  %v4035_v34 = vadd.f32 %v9106_v53, %v9105_v56  ;;  %v4033_v25 = vadd.f32 %v9110_v20, %v9109_v49  ;;  %v4802_v52 = vunpack.c.l.bf16 %v9111_v41  ;;  %v4533_v40 = vadd.f32 %v8622_v22, %v4332_v10  ;;  %v6200_v10 = vpop.f32.mrf.mxu0 }
 0x3d0   : > { %4893 = vst.msk [vmem:[%s8548_s20 + $0x78] sm:$0xff] %vm355_vm1, %v4861_v31  ;;  %v4859_v5 = vmax.f32 %v4827_v15, 0.0  ;;  %v4832_v57 = vadd.f32 %v4800_v45, %v4768_v39  ;;  %v4766_v3 = vadd.f32 %v8525_v16, %v4727_v30  ;;  %v4730_v61 = vadd.f32 %v6223_v32, %v4529_v28  ;;  %v9108_v45 = vld [vmem:[#allocation30_spill] sm:$0xff]  ;;  %v9113_v31 = vld [vmem:[#allocation93_spill] sm:$0xff]  ;;  %v9114_v15 = vld [vmem:[#allocation80_spill] sm:$0xff] }
 0x3d1   : > { %v4651_v60 = vpop.f32.mrf.mxu1  ;;  %v4335_v1 = vadd.f32 %v9108_v45, %v4035_v34  ;;  %v4036_v39 = vadd.f32 %v9114_v15, %v9113_v31  ;;  %v4805_v24 = vunpack.c.h.bf16 %v9107_v47  ;;  %v4531_v2 = vadd.f32 %v8640_v27, %v4330_v13  ;;  %v9115_v32 = vld [vmem:[#allocation88_spill] sm:$0xff] }
 0x3d2   : > { %4891 = vst.msk [vmem:[%s8548_s20 + $0x68] sm:$0xff] %vm355_vm1, %v4859_v5  ;;  %v4864_v11 = vmax.f32 %v4832_v57, 0.0  ;;  %v4830_v36 = vadd.f32 %v4798_v8, %v4766_v3  ;;  %v4769_v18 = vadd.f32 %v8525_v16, %v4730_v61  ;;  %v4728_v19 = vadd.f32 %v4651_v60, %v4527_v63  ;;  %v9112_v8 = vld [vmem:[#allocation56_spill] sm:$0xff]  ;;  %v9116_v63 = vld [vmem:[#allocation45_spill] sm:$0xff]  ;;  %v9117_v5 = vld [vmem:[#allocation46_spill] sm:$0xff] }
 0x3d3   : > { %v6226_v43 = vpop.f32.mrf.mxu1  ;;  %v4333_v28 = vadd.f32 %v9112_v8, %v4033_v25  ;;  %v4034_v57 = vadd.f32 %v9117_v5, %v9116_v63  ;;  %v4803_v61 = vunpack.c.h.bf16 %v9111_v41  ;;  %v4536_v26 = vadd.f32 %v8658_v54, %v4335_v1  ;;  %v9118_v60 = vld [vmem:[#allocation58_spill] sm:$0xff]  ;;  %v4495_v1 = vpop.f32.mrf.mxu0  ;;  %v9126_v41 = vld [vmem:[#allocation47_spill] sm:$0xff]  ;;  %v9128_v31 = vld [vmem:[#allocation60_spill] sm:$0xff] }
 0x3d4   : > { %4896 = vst.msk [vmem:[%s8548_s20 + $0x90] sm:$0xff] %vm355_vm1, %v4864_v11  ;;  %v4862_v35 = vmax.f32 %v4830_v36, 0.0  ;;  %v4833_v9 = vadd.f32 %v4801_v12, %v4769_v18  ;;  %v4767_v51 = vadd.f32 %v8525_v16, %v4728_v19  ;;  %v4733_v4 = vadd.f32 %v6226_v43, %v4532_v50  ;;  %v9119_v50 = vld [vmem:[#allocation81_spill] sm:$0xff]  ;;  %v9121_v19 = vld [vmem:[#allocation16_spill] sm:$0xff]  ;;  %v9122_v43 = vld [vmem:[#allocation31_spill] sm:$0xff] }
 0x3d5   : > { %v4664_v23 = vpop.f32.mrf.mxu1  ;;  %v4336_v12 = vadd.f32 %v9115_v32, %v4036_v39  ;;  %v9120_v11 = vld [vmem:[#allocation49_spill] sm:$0xff]  ;;  %v4808_v0 = vunpack.c.l.bf16 %v9121_v19  ;;  %v4534_v13 = vadd.f32 %v8676_v33, %v4333_v28  ;;  %v9129_v39 = vld [vmem:[#allocation50_spill] sm:$0xff] }
 0x3d6   : > { %4894 = vst.msk [vmem:[%s8548_s20 + $0x80] sm:$0xff] %vm355_vm1, %v4862_v35  ;;  %v4865_v21 = vmax.f32 %v4833_v9, 0.0  ;;  %v4831_v7 = vadd.f32 %v4799_v42, %v4767_v51  ;;  %v4772_v37 = vadd.f32 %v8525_v16, %v4733_v4  ;;  %v4731_v14 = vadd.f32 %v4664_v23, %v4530_v58  ;;  %v9124_v58 = vld [vmem:[#allocation96_spill] sm:$0xff]  ;;  %v9125_v51 = vld [vmem:[#allocation15_spill] sm:$0xff] }
 0x3d7   : > { %v6227_v30 = vpop.f32.mrf.mxu1  ;;  %v4334_v42 = vadd.f32 %v9118_v60, %v4034_v57  ;;  %v4039_v36 = vadd.f32 %v9120_v11, %v9119_v50  ;;  %v4806_v4 = vunpack.c.l.bf16 %v9125_v51  ;;  %v4537_v45 = vadd.f32 %v6197_v46, %v4336_v12  ;;  %v9131_v12 = vld [vmem:[#allocation59_spill] sm:$0xff]  ;;  %v9132_v57 = vld [vmem:[#allocation18_spill] sm:$0xff] }
 0x3d8   : > { %4897 = vst.msk [vmem:[%s8548_s20 + $0x98] sm:$0xff] %vm355_vm1, %v4865_v21  ;;  %v4863_v22 = vmax.f32 %v4831_v7, 0.0  ;;  %v4836_v38 = vadd.f32 %v4804_v55, %v4772_v37  ;;  %v4770_v48 = vadd.f32 %v8525_v16, %v4731_v14  ;;  %v4734_v44 = vadd.f32 %v6227_v30, %v4533_v40  ;;  %v9123_v55 = vld [vmem:[#allocation28_spill] sm:$0xff] }
 0x3d9   : > { %v4667_v3 = vpop.f32.mrf.mxu1  ;;  %v4339_v47 = vadd.f32 %v9122_v43, %v4039_v36  ;;  %v4037_v35 = vadd.f32 %v9124_v58, %v9123_v55  ;;  %v4809_v7 = vunpack.c.h.bf16 %v9121_v19  ;;  %v4535_v37 = vadd.f32 %v4482_v62, %v4334_v42 }
 0x3da   : > { %4895 = vst.msk [vmem:[%s8548_s20 + $0x88] sm:$0xff] %vm355_vm1, %v4863_v22  ;;  %v4868_v27 = vmax.f32 %v4836_v38, 0.0  ;;  %v4834_v59 = vadd.f32 %v4802_v52, %v4770_v48  ;;  %v4773_v17 = vadd.f32 %v8525_v16, %v4734_v44  ;;  %v4732_v29 = vadd.f32 %v4667_v3, %v4531_v2  ;;  %v9127_v52 = vld [vmem:[#allocation48_spill] sm:$0xff]  ;;  %v6201_v38 = vpop.f32.mrf.mxu0 }
 0x3db   : > { %v6230_v18 = vpop.f32.mrf.mxu1  ;;  %v4337_v23 = vadd.f32 %v8504_v6, %v4037_v35  ;;  %v4040_v40 = vadd.f32 %v9127_v52, %v9126_v41  ;;  %v9130_v6 = vld [vmem:[#allocation83_spill] sm:$0xff]  ;;  %v4807_v2 = vunpack.c.h.bf16 %v9125_v51  ;;  %v4540_v22 = vadd.f32 %v6200_v10, %v4339_v47 }
 0x3dc   : > { %4900 = vst.msk [vmem:[%s8548_s20 + $0xb0] sm:$0xff] %vm355_vm1, %v4868_v27  ;;  %v4866_v54 = vmax.f32 %v4834_v59, 0.0  ;;  %v4837_v56 = vadd.f32 %v4805_v24, %v4773_v17  ;;  %v4771_v53 = vadd.f32 %v8525_v16, %v4732_v29  ;;  %v4737_v34 = vadd.f32 %v6230_v18, %v4536_v26  ;;  %v9133_v29 = vld [vmem:[#allocation17_spill] sm:$0xff]  ;;  %v4498_v50 = vpop.f32.mrf.mxu0 }
 0x3dd   : > { %v4680_v9 = vpop.f32.mrf.mxu1  ;;  %v4340_v15 = vadd.f32 %v9128_v31, %v4040_v40  ;;  %v4038_v30 = vadd.f32 %v9130_v6, %v9129_v39  ;;  %v4812_v3 = vunpack.c.l.bf16 %v9132_v57  ;;  %v4810_v60 = vunpack.c.l.bf16 %v9133_v29 }
 0x3de   : > { %4898 = vst.msk [vmem:[%s8548_s20 + $0xa0] sm:$0xff] %vm355_vm1, %v4866_v54  ;;  %v4869_v33 = vmax.f32 %v4837_v56, 0.0  ;;  %v4835_v49 = vadd.f32 %v4803_v61, %v4771_v53  ;;  %v4776_v20 = vadd.f32 %v8525_v16, %v4737_v34  ;;  %v4735_v25 = vadd.f32 %v4680_v9, %v4534_v13 }
 0x3df   : > { %v6231_v21 = vpop.f32.mrf.mxu1  ;;  %v4338_v63 = vadd.f32 %v9131_v12, %v4038_v30  ;;  %v4538_v61 = vadd.f32 %v4495_v1, %v4337_v23  ;;  %v4541_v42 = vadd.f32 %v6201_v38, %v4340_v15  ;;  %v4813_v13 = vunpack.c.h.bf16 %v9132_v57 }
 0x3e0   : > { %4901 = vst.msk [vmem:[%s8548_s20 + $0xb8] sm:$0xff] %vm355_vm1, %v4869_v33  ;;  %v4867_v46 = vmax.f32 %v4835_v49, 0.0  ;;  %v4840_v14 = vadd.f32 %v4808_v0, %v4776_v20  ;;  %v4774_v8 = vadd.f32 %v8525_v16, %v4735_v25  ;;  %v4738_v28 = vadd.f32 %v6231_v21, %v4537_v45 }
 0x3e1   : > { %v4683_v24 = vpop.f32.mrf.mxu1  ;;  %v4539_v54 = vadd.f32 %v4498_v50, %v4338_v63  ;;  %v4811_v55 = vunpack.c.h.bf16 %v9133_v29 }
 0x3e2   : > { %4899 = vst.msk [vmem:[%s8548_s20 + $0xa8] sm:$0xff] %vm355_vm1, %v4867_v46  ;;  %v4872_v62 = vmax.f32 %v4840_v14, 0.0  ;;  %v4838_v48 = vadd.f32 %v4806_v4, %v4774_v8  ;;  %v4777_v44 = vadd.f32 %v8525_v16, %v4738_v28  ;;  %v4736_v32 = vadd.f32 %v4683_v24, %v4535_v37 }
 0x3e3   : > { %v6234_v5 = vpop.f32.mrf.mxu1 }
 0x3e4   : > { %4904 = vst.msk [vmem:[%s8548_s20 + $0xd0] sm:$0xff] %vm355_vm1, %v4872_v62  ;;  %v4870_v26 = vmax.f32 %v4838_v48, 0.0  ;;  %v4841_v10 = vadd.f32 %v4809_v7, %v4777_v44  ;;  %v4775_v27 = vadd.f32 %v8525_v16, %v4736_v32  ;;  %v4741_v59 = vadd.f32 %v6234_v5, %v4540_v22 }
 0x3e5   : > { %v4696_v17 = vpop.f32.mrf.mxu1 }
 0x3e6   : > { %4902 = vst.msk [vmem:[%s8548_s20 + $0xc0] sm:$0xff] %vm355_vm1, %v4870_v26  ;;  %v4873_v11 = vmax.f32 %v4841_v10, 0.0  ;;  %v4839_v36 = vadd.f32 %v4807_v2, %v4775_v27  ;;  %v4780_v18 = vadd.f32 %v8525_v16, %v4741_v59  ;;  %v4739_v19 = vadd.f32 %v4696_v17, %v4538_v61 }
 0x3e7   : > { %v6235_v0 = vpop.f32.mrf.mxu1 }
 0x3e8   : > { %4905 = vst.msk [vmem:[%s8548_s20 + $0xd8] sm:$0xff] %vm355_vm1, %v4873_v11  ;;  %v4871_v56 = vmax.f32 %v4839_v36, 0.0  ;;  %v4844_v53 = vadd.f32 %v4812_v3, %v4780_v18  ;;  %v4778_v34 = vadd.f32 %v8525_v16, %v4739_v19  ;;  %v4742_v43 = vadd.f32 %v6235_v0, %v4541_v42 }
 0x3e9   : > { %v4699_v47 = vpop.f32.mrf.mxu1 }
 0x3ea   : > { %4903 = vst.msk [vmem:[%s8548_s20 + $0xc8] sm:$0xff] %vm355_vm1, %v4871_v56  ;;  %v4876_v58 = vmax.f32 %v4844_v53, 0.0  ;;  %v4842_v35 = vadd.f32 %v4810_v60, %v4778_v34  ;;  %v4781_v9 = vadd.f32 %v8525_v16, %v4742_v43  ;;  %v4740_v51 = vadd.f32 %v4699_v47, %v4539_v54 }
 0x3ec   : > { %4908 = vst.msk [vmem:[%s8548_s20 + $0xf0] sm:$0xff] %vm355_vm1, %v4876_v58  ;;  %v4874_v4 = vmax.f32 %v4842_v35, 0.0  ;;  %v4845_v45 = vadd.f32 %v4813_v13, %v4781_v9  ;;  %v4779_v1 = vadd.f32 %v8525_v16, %v4740_v51 }
 0x3ee   : > { %4906 = vst.msk [vmem:[%s8548_s20 + $0xe0] sm:$0xff] %vm355_vm1, %v4874_v4  ;;  %v4877_v33 = vmax.f32 %v4845_v45, 0.0  ;;  %v4843_v49 = vadd.f32 %v4811_v55, %v4779_v1 }
 0x3f0   : > { %4909 = vst.msk [vmem:[%s8548_s20 + $0xf8] sm:$0xff] %vm355_vm1, %v4877_v33  ;;  %v4875_v20 = vmax.f32 %v4843_v49, 0.0 }
 0x3f2   : > { %4907 = vst.msk [vmem:[%s8548_s20 + $0xe8] sm:$0xff] %vm355_vm1, %v4875_v20 }
 0x3f3 PF: > { %s15_s18 = sadd.s32 1, %s6306_s18  }
 0x3f4   : > { %p12_p4 = scmp.ge.s32.totalorder %s15_s18, 4  }
 0x3f6   :  { %14 = sbr.rel (!%p12_p4) target bundleno = 1 (0x1), region = 88 }

</bundles_post_ra>
